<compile_context>
chip_gen: v7x
topology: tpu7x:2x2x1
jax: 0.10.0
libtpu: 0.0.40
codegen_flags: <defaults>
</compile_context>

<pallas_src>
import math
import functools

import jax
import jax.numpy as jnp
from jax.experimental import pallas as pl
from jax.experimental.pallas import tpu as pltpu


def _row_tile(m, target):
    """Largest row tile <= target (multiple of 8), or the full extent."""
    if m <= target:
        return m
    return max(8, (target // 8) * 8)


# ----------------------------------------------------------------------------
# Fused sampling-offsets + attention-weights projection (+ per-head softmax)
# ----------------------------------------------------------------------------
def _qproj_kernel(x_ref, wt_ref, b_ref, so_ref, attn_ref, *, num_head, sp):
    # Kept f32: bf16 offsets can shift sampling locations across pixel
    # boundaries (flipping bilinear corners); this matmul is tiny anyway.
    y = (jnp.dot(x_ref[...], wt_ref[...], preferred_element_type=jnp.float32)
         + b_ref[...])
    n_so = so_ref.shape[-1]
    so_ref[...] = y[:, :n_so]
    logits = y[:, n_so:]
    parts = []
    for h in range(num_head):
        lg = logits[:, h * sp:(h + 1) * sp]
        m = jnp.max(lg, axis=-1, keepdims=True)
        e = jnp.exp(lg - m)
        parts.append(e / jnp.sum(e, axis=-1, keepdims=True))
    # single lane-dense store of all heads' softmaxed weights
    attn_ref[...] = jnp.concatenate(parts, axis=-1)


def qproj_pallas(q2d, w_cat_t, b_cat, *, num_head, sp, tile_m=512):
    m, q_dim = q2d.shape
    n_all = w_cat_t.shape[1]
    n_so = num_head * sp * 2
    n_attn = num_head * sp
    tm = _row_tile(m, tile_m)
    kernel = functools.partial(_qproj_kernel, num_head=num_head, sp=sp)
    return pl.pallas_call(
        kernel,
        out_shape=(jax.ShapeDtypeStruct((m, n_so), jnp.float32),
                   jax.ShapeDtypeStruct((m, n_attn), jnp.float32)),
        grid=(pl.cdiv(m, tm),),
        in_specs=[
            pl.BlockSpec((tm, q_dim), lambda i: (i, 0)),
            pl.BlockSpec((q_dim, n_all), lambda i: (0, 0)),
            pl.BlockSpec((1, n_all), lambda i: (0, 0)),
        ],
        out_specs=(pl.BlockSpec((tm, n_so), lambda i: (i, 0)),
                   pl.BlockSpec((tm, n_attn), lambda i: (i, 0))),
        compiler_params=pltpu.CompilerParams(
            dimension_semantics=("parallel",)),
    )(q2d, w_cat_t, b_cat)


# ----------------------------------------------------------------------------
# Value projection + padding mask, row-tiled, bf16 output.
# Decoupled from the deform kernel so the deform grid can be fully parallel
# (v7x 2-TC) and its resident value block is bf16 (v7x VMEM budget).
# ----------------------------------------------------------------------------
def _vproj_kernel(x_ref, wt_ref, b_ref, keep_ref, o_ref):
    v = (jnp.dot(x_ref[...].astype(jnp.bfloat16), wt_ref[...],
                 preferred_element_type=jnp.float32) + b_ref[...])
    o_ref[...] = (v * keep_ref[...]).astype(jnp.bfloat16)


def vproj_pallas(v2d, wv_t_bf16, bv, keep2d, *, tile_m=512):
    m, vd = v2d.shape
    tm = _row_tile(m, tile_m)
    return pl.pallas_call(
        _vproj_kernel,
        out_shape=jax.ShapeDtypeStruct((m, vd), jnp.bfloat16),
        grid=(pl.cdiv(m, tm),),
        in_specs=[
            pl.BlockSpec((tm, vd), lambda i: (i, 0)),
            pl.BlockSpec((vd, vd), lambda i: (0, 0)),
            pl.BlockSpec((1, vd), lambda i: (0, 0)),
            pl.BlockSpec((tm, 1), lambda i: (i, 0)),
        ],
        out_specs=pl.BlockSpec((tm, vd), lambda i: (i, 0)),
        compiler_params=pltpu.CompilerParams(
            dimension_semantics=("parallel",)),
    )(v2d, wv_t_bf16, bv, keep2d)


# ----------------------------------------------------------------------------
# Deformable-attention core: arithmetic bilinear mask, level/chunk-blocked
# weighted aggregation, fused output projection epilogue.
# ----------------------------------------------------------------------------
def _deform_kernel(vproj_ref, xyw_ref, wout_ref, bout_ref, out_ref, *,
                   num_head, head_dim, num_scale, num_point,
                   level_shapes, level_starts, hw_chunk):
    # vproj_ref: (1, L2_PAD, V_DIM) bf16 projected+masked value (levels placed
    #            at 16-row-aligned starts; pad rows are never read)
    # xyw_ref:   (1, TILE_L1, H*S*P*3) f32, per point: (pixel x, pixel y, attn)
    # wout_ref:  (V_DIM, Q_DIM) f32 out_proj weight (transposed)
    # bout_ref:  (1, Q_DIM) f32
    # out_ref:   (1, TILE_L1, Q_DIM) f32
    tl1 = out_ref.shape[1]
    xyw = xyw_ref[0]                                   # (TILE_L1, H*S*P*3)
    accs = [jnp.zeros((tl1, head_dim), jnp.float32) for _ in range(num_head)]

    for s in range(num_scale):
        hs, ws = level_shapes[s]
        hw = hs * ws
        pstart = level_starts[s]

        # Hoist per-(head, point) query columns out of the chunk loop.
        cols = []
        for h in range(num_head):
            per_pt = []
            for p in range(num_point):
                base = ((h * num_scale + s) * num_point + p) * 3
                per_pt.append((xyw[:, base:base + 1],        # pixel x
                               xyw[:, base + 1:base + 2],    # pixel y
                               xyw[:, base + 2:base + 3]))   # attention
            cols.append(per_pt)

        for c0 in range(0, hw, hw_chunk):
            csz = min(hw_chunk, hw - c0)
            # Exact integer row/col of every flat position in this chunk using
            # f32 only (no vector int div): |rounding err| << 0.5/ws, so the
            # floor is exact for any realistic level size.
            colf = (jax.lax.broadcasted_iota(jnp.int32, (1, csz), 1)
                    .astype(jnp.float32) + float(c0))
            coly = jnp.floor((colf + 0.5) / float(ws))
            colx = colf - coly * float(ws)
            # Full-width, sublane-aligned level/chunk slab, sliced once.
            vs = vproj_ref[0, pstart + c0:pstart + c0 + csz, :]   # bf16

            for h in range(num_head):
                # wcomb kept f32 (exact colx-x; v5e-safe); cast only for MXU.
                wcomb = jnp.zeros((tl1, csz), jnp.float32)
                for p in range(num_point):
                    x, y, a = cols[h][p]
                    wx = jnp.maximum(1.0 - jnp.abs(colx - x), 0.0)
                    wy = jnp.maximum(1.0 - jnp.abs(coly - y), 0.0)
                    wcomb = wcomb + (wx * wy) * a
                accs[h] = accs[h] + jnp.dot(
                    wcomb.astype(jnp.bfloat16),
                    vs[:, h * head_dim:(h + 1) * head_dim],
                    preferred_element_type=jnp.float32)

    out_v = jnp.concatenate(accs, axis=-1)             # (TILE_L1, V_DIM) f32
    # Fused output projection (f32 operands: tiny next to the gather matmuls,
    # keeps the epilogue out of the bf16 error budget).
    out_ref[0] = (jnp.dot(out_v, wout_ref[...],
                          preferred_element_type=jnp.float32)
                  + bout_ref[...])


def deform_core_pallas(vproj_pad, xyw, wout_t, bout, *, num_head, head_dim,
                       num_scale, num_point, level_shapes, level_starts,
                       tile_l1=256, hw_chunk=1024, vmem_limit_bytes=None):
    b, l2p, v_dim = vproj_pad.shape
    l1, w3 = xyw.shape[1], xyw.shape[2]
    q_dim = wout_t.shape[1]
    tl1 = _row_tile(l1, tile_l1)
    kernel = functools.partial(
        _deform_kernel, num_head=num_head, head_dim=head_dim,
        num_scale=num_scale, num_point=num_point,
        level_shapes=tuple(level_shapes), level_starts=tuple(level_starts),
        hw_chunk=hw_chunk)

    l2_real = sum(h * w for h, w in level_shapes)
    flops = 2 * b * l1 * l2_real * v_dim + 2 * b * l1 * v_dim * q_dim
    bytes_accessed = (b * l2p * v_dim * 2 + b * l1 * w3 * 4
                      + b * l1 * q_dim * 4 + v_dim * q_dim * 4)

    return pl.pallas_call(
        kernel,
        out_shape=jax.ShapeDtypeStruct((b, l1, q_dim), jnp.float32),
        grid=(b, pl.cdiv(l1, tl1)),
        in_specs=[
            pl.BlockSpec((1, l2p, v_dim), lambda bb, i: (bb, 0, 0)),
            pl.BlockSpec((1, tl1, w3), lambda bb, i: (bb, i, 0)),
            pl.BlockSpec((v_dim, q_dim), lambda bb, i: (0, 0)),
            pl.BlockSpec((1, q_dim), lambda bb, i: (0, 0)),
        ],
        out_specs=pl.BlockSpec((1, tl1, q_dim), lambda bb, i: (bb, i, 0)),
        compiler_params=pltpu.CompilerParams(
            # No cross-iteration scratch -> both axes can be parallel
            # (megacore / v7x 2-TC sharding, also correct for B=1).
            dimension_semantics=("parallel", "parallel"),
            vmem_limit_bytes=vmem_limit_bytes),
        cost_estimate=pl.CostEstimate(
            flops=int(flops), transcendentals=0,
            bytes_accessed=int(bytes_accessed)),
    )(vproj_pad, xyw, wout_t, bout)


# ----------------------------------------------------------------------------
# Parameters (replicates ScaleAwareDeformableAttention._reset_parameters)
# ----------------------------------------------------------------------------
def init_params(key, q_dim, v_dim, num_head, num_scale, num_point):
    hsp = num_head * num_scale * num_point
    k_v, k_o = jax.random.split(key)

    def xavier_normal(k, shape):
        fan_out, fan_in = shape
        std = math.sqrt(2.0 / (fan_in + fan_out))
        return std * jax.random.normal(k, shape, jnp.float32)

    thetas = jnp.arange(num_head * num_point, dtype=jnp.float32) * (
        2.0 * math.pi / (num_head * num_point))
    grid_init = jnp.stack([jnp.cos(thetas), jnp.sin(thetas)], -1).reshape(
        num_head, 1, num_point, 2)
    grid_init = grid_init / jnp.max(jnp.abs(grid_init), axis=-1, keepdims=True)
    grid_init = jnp.tile(grid_init, (1, num_scale, 1, 1))

    return {
        "sampling_offsets_weight": jnp.zeros((hsp * 2, q_dim), jnp.float32),
        "sampling_offsets_bias": grid_init.reshape(-1),
        "attention_weights_weight": jnp.zeros((hsp, q_dim), jnp.float32),
        "attention_weights_bias": jnp.zeros((hsp,), jnp.float32),
        "value_proj_weight": xavier_normal(k_v, (v_dim, v_dim)),
        "value_proj_bias": jnp.zeros((v_dim,), jnp.float32),
        "out_proj_weight": xavier_normal(k_o, (q_dim, v_dim)),
        "out_proj_bias": jnp.zeros((q_dim,), jnp.float32),
    }


# ----------------------------------------------------------------------------
# Forward pass (Pallas-backed)
# ----------------------------------------------------------------------------
def scale_aware_deformable_attention(params, query, value, v_shape, v_mask,
                                     v_start_index, v_valid_ratios, ref_windows,
                                     *, num_head, num_scale, num_point,
                                     tile_m=512, tile_l1=256, hw_chunk=1024,
                                     vmem_limit_bytes=None):
    # v_shape / v_start_index are static Python sequences (compile-time tiling).
    b, l1, q_dim = query.shape
    l2, v_dim = value.shape[1], value.shape[2]
    head_dim = v_dim // num_head
    sp = num_scale * num_point

    level_shapes = [(int(hh), int(ww)) for hh, ww in v_shape]
    level_starts_in = [int(st) for st in v_start_index]

    # 16-row (bf16 sublane) aligned level starts in the projected-value layout.
    pad_to = 16
    padded_sizes = [((hh * ww + pad_to - 1) // pad_to) * pad_to
                    for hh, ww in level_shapes]
    padded_starts = [0]
    for s in range(1, num_scale):
        padded_starts.append(padded_starts[-1] + padded_sizes[s - 1])
    l2_pad = padded_starts[-1] + padded_sizes[-1]

    tl1 = _row_tile(l1, tile_l1)
    if vmem_limit_bytes is None:
        # Size-aware scoped-VMEM request; only override the compiler default
        # when the deform kernel's resident set would not fit it.
        chunk = min(hw_chunk, max(hh * ww for hh, ww in level_shapes))
        resident = (2 * l2_pad * v_dim * 2           # bf16 value block x2 bufs
                    + 2 * tl1 * (num_head * sp * 3) * 4
                    + 2 * tl1 * q_dim * 4
                    + 12 * tl1 * chunk * 4           # mask temporaries margin
                    + tl1 * v_dim * 4)
        if resident > 12 * 1024 * 1024:
            vmem_limit_bytes = min(int(resident * 1.25), 100 * 1024 * 1024)

    # --- fused sampling-offsets + attention-weights projection (+ softmax) ---
    w_cat_t = jnp.concatenate([params["sampling_offsets_weight"],
                               params["attention_weights_weight"]], axis=0).T
    b_cat = jnp.concatenate([params["sampling_offsets_bias"],
                             params["attention_weights_bias"]]).reshape(1, -1)
    q2d = query.reshape(b * l1, q_dim)
    so2d, attn2d = qproj_pallas(q2d, w_cat_t, b_cat,
                                num_head=num_head, sp=sp, tile_m=tile_m)
    so = so2d.reshape(b, l1, num_head, num_scale, num_point, 2)
    attn = attn2d.reshape(b, l1, num_head, num_scale, num_point)

    # --- sampling locations (cheap fused XLA elementwise) --------------------
    if ref_windows.ndim == 4:
        ref = ref_windows[:, :, None, :, None, :]
    elif ref_windows.ndim == 3:
        ref = ref_windows[:, :, None, None, None, :]
    else:
        raise RuntimeError("ref_windows should have 3 or 4 dimensions")
    loc = ref[..., :2] + so / 8.0 * ref[..., 2:]        # (b,l1,H,S,P,2)
    loc = loc.reshape(b, l1, num_head, 1, sp, 2)
    if v_valid_ratios is not None:
        loc = loc * v_valid_ratios
    loc = loc.reshape(b, l1, num_head, num_scale, num_point, 2)

    # Per-level pixel coordinates (align_corners=False) + attention, packed as
    # a single lane-dense (B, L1, H*S*P*3) side input for the deform kernel.
    ws_arr = jnp.asarray([ww for _, ww in level_shapes],
                         jnp.float32).reshape(1, 1, 1, num_scale, 1)
    hs_arr = jnp.asarray([hh for hh, _ in level_shapes],
                         jnp.float32).reshape(1, 1, 1, num_scale, 1)
    px = loc[..., 0] * ws_arr - 0.5
    py = loc[..., 1] * hs_arr - 0.5
    xyw = jnp.stack([px, py, attn], axis=-1).reshape(
        b, l1, num_head * num_scale * num_point * 3)

    # --- value projection + padding mask (row-tiled, bf16 output) ------------
    if v_mask is None:
        keep2d = jnp.ones((b * l2, 1), jnp.float32)
    else:
        keep2d = 1.0 - v_mask.reshape(b * l2, 1).astype(jnp.float32)
    wv_t = params["value_proj_weight"].T.astype(jnp.bfloat16)
    bv = params["value_proj_bias"].reshape(1, v_dim)
    vp = vproj_pallas(value.reshape(b * l2, v_dim), wv_t, bv, keep2d,
                      tile_m=tile_m).reshape(b, l2, v_dim)

    # Place levels at sublane-aligned (padded) starts; pad rows are never read.
    pieces = []
    for s in range(num_scale):
        hh, ww = level_shapes[s]
        hw = hh * ww
        st = level_starts_in[s]
        pieces.append(vp[:, st:st + hw])
        pad = padded_sizes[s] - hw
        if pad:
            pieces.append(jnp.zeros((b, pad, v_dim), jnp.bfloat16))
    vp_pad = jnp.concatenate(pieces, axis=1) if len(pieces) > 1 else pieces[0]

    # --- deformable aggregation + fused output projection (Pallas) -----------
    # TODO(synk): im2col_step of the CUDA BoxAttnFunction has no TPU analogue;
    # batching is handled by the (B, L1-tile) Pallas grid instead.
    wout_t = params["out_proj_weight"].T                 # (v_dim, q_dim) f32
    bout = params["out_proj_bias"].reshape(1, q_dim)
    out = deform_core_pallas(
        vp_pad, xyw, wout_t, bout,
        num_head=num_head, head_dim=head_dim, num_scale=num_scale,
        num_point=num_point, level_shapes=level_shapes,
        level_starts=padded_starts, tile_l1=tile_l1, hw_chunk=hw_chunk,
        vmem_limit_bytes=vmem_limit_bytes)

    return out, attn.reshape(b, l1, num_head, 1, sp)


# ----------------------------------------------------------------------------
# Pure-JAX reference (gather based, f32 HIGHEST) for validation
# ----------------------------------------------------------------------------
def reference_forward(params, query, value, v_shape, v_mask, v_start_index,
                      v_valid_ratios, ref_windows, *, num_head, num_scale,
                      num_point):
    b, l1, _ = query.shape
    l2, v_dim = value.shape[1], value.shape[2]
    head_dim = v_dim // num_head
    sp = num_scale * num_point

    def lin(x, w, bias):
        return jnp.dot(x, w.T, precision=jax.lax.Precision.HIGHEST) + bias

    value_p = lin(value, params["value_proj_weight"], params["value_proj_bias"])
    if v_mask is not None:
        value_p = jnp.where(v_mask[..., None], 0.0, value_p)
    value_p = value_p.reshape(b, l2, num_head, head_dim)

    so = lin(query, params["sampling_offsets_weight"],
             params["sampling_offsets_bias"]).reshape(
        b, l1, num_head, num_scale, num_point, 2)
    logits = lin(query, params["attention_weights_weight"],
                 params["attention_weights_bias"]).reshape(b, l1, num_head, sp)
    attn = jax.nn.softmax(logits, axis=-1)

    if ref_windows.ndim == 4:
        ref = ref_windows[:, :, None, :, None, :]
    else:
        ref = ref_windows[:, :, None, None, None, :]
    loc = ref[..., :2] + so / 8.0 * ref[..., 2:]
    if v_valid_ratios is not None:
        loc = (loc.reshape(b, l1, num_head, 1, sp, 2) * v_valid_ratios).reshape(
            b, l1, num_head, num_scale, num_point, 2)

    attn_sp = attn.reshape(b, l1, num_head, num_scale, num_point)
    out = jnp.zeros((b, l1, num_head, head_dim), jnp.float32)
    bidx = jnp.arange(b)[:, None, None, None]
    hidx = jnp.arange(num_head)[None, None, :, None]
    for s, (hs, ws) in enumerate([(int(h), int(w)) for h, w in v_shape]):
        start = int(v_start_index[s])
        v_l = value_p[:, start:start + hs * ws].reshape(b, hs, ws, num_head,
                                                        head_dim)
        x = loc[..., s, :, 0] * ws - 0.5    # (b, l1, H, P)
        y = loc[..., s, :, 1] * hs - 0.5
        x0 = jnp.floor(x)
        y0 = jnp.floor(y)
        for dy in (0, 1):
            for dx in (0, 1):
                xi = x0 + dx
                yi = y0 + dy
                wgt = (1.0 - jnp.abs(x - xi)) * (1.0 - jnp.abs(y - yi))
                valid = ((xi >= 0) & (xi < ws) &
                         (yi >= 0) & (yi < hs)).astype(jnp.float32)
                xic = jnp.clip(xi.astype(jnp.int32), 0, ws - 1)
                yic = jnp.clip(yi.astype(jnp.int32), 0, hs - 1)
                samp = v_l[bidx, yic, xic, hidx]        # (b, l1, H, P, D)
                w = (wgt * valid * attn_sp[..., s, :])[..., None]
                out = out + jnp.sum(samp * w, axis=3)
    out = out.reshape(b, l1, v_dim)
    out = lin(out, params["out_proj_weight"], params["out_proj_bias"])
    return out, attn.reshape(b, l1, num_head, 1, sp)


# ----------------------------------------------------------------------------
if __name__ == "__main__":
    q_dim, v_dim = 32, 32
    num_head, num_scale, num_point = 4, 2, 4
    b, l1 = 2, 8
    level_shapes = [(8, 8), (4, 4)]
    l2 = sum(h * w for h, w in level_shapes)
    v_start_index = [0, level_shapes[0][0] * level_shapes[0][1]]

    key = jax.random.PRNGKey(0)
    kp, kq, kv, kr1, kr2, kw1, kw2 = jax.random.split(key, 7)
    params = init_params(kp, q_dim, v_dim, num_head, num_scale, num_point)
    # Reference init zeroes the offset/attention weight matrices (softmax would
    # be uniform); add small values so the full data path is exercised.
    params["sampling_offsets_weight"] = 0.02 * jax.random.normal(
        kw1, params["sampling_offsets_weight"].shape, jnp.float32)
    params["attention_weights_weight"] = 0.2 * jax.random.normal(
        kw2, params["attention_weights_weight"].shape, jnp.float32)

    query = jax.random.normal(kq, (b, l1, q_dim), jnp.float32)
    value = jax.random.normal(kv, (b, l2, v_dim), jnp.float32)
    cxcy = jax.random.uniform(kr1, (b, l1, 2), minval=0.05, maxval=0.95)
    wh = jax.random.uniform(kr2, (b, l1, 2), minval=0.1, maxval=0.4)
    ref_windows = jnp.concatenate([cxcy, wh], axis=-1)
    v_mask = jnp.zeros((b, l2), bool).at[1, -4:].set(True)

    @jax.jit
    def run(params, query, value, v_mask, ref_windows):
        return scale_aware_deformable_attention(
            params, query, value, level_shapes, v_mask, v_start_index, None,
            ref_windows, num_head=num_head, num_scale=num_scale,
            num_point=num_point)

    out, attn = run(params, query, value, v_mask, ref_windows)
    out = jax.block_until_ready(out)
    attn = jax.block_until_ready(attn)

    ref_out, ref_attn = reference_forward(
        params, query, value, level_shapes, v_mask, v_start_index,
        None, ref_windows,
        num_head=num_head, num_scale=num_scale, num_point=num_point)

    assert out.shape == (b, l1, q_dim)
    assert attn.shape == (b, l1, num_head, 1, num_scale * num_point)
    err_o = float(jnp.max(jnp.abs(out - ref_out)))
    err_a = float(jnp.max(jnp.abs(attn - ref_attn)))
    # bf16 MXU operands in the value-proj / deform matmuls (f32 accumulation).
    assert err_o < 5e-2 and err_a < 2e-3, (err_o, err_a)
    print("KERNEL_OK")
</pallas_src>

<mosaic_0001>
module attributes {stable_mosaic.version = 11 : i64} {
  func.func @_qproj_kernel(%arg0: i32, %arg1: memref<16x32xf32, #tpu.memory_space<vmem>>, %arg2: memref<32x96xf32, #tpu.memory_space<vmem>>, %arg3: memref<1x96xf32, #tpu.memory_space<vmem>>, %arg4: memref<16x64xf32, #tpu.memory_space<vmem>>, %arg5: memref<16x32xf32, #tpu.memory_space<vmem>>) attributes {dimension_semantics = [#tpu.dimension_semantics<parallel>], iteration_bounds = array<i64: 1>, scalar_prefetch = 0 : i64, scratch_operands = 0 : i64, tpu.core_type = #tpu.core_type<tc>, window_params = [{transform_indices = @transform_0, window_bounds = array<i64: 16, 32>}, {pipeline_mode = #tpu.pipeline_mode<synchronous>, transform_indices = @transform_1, window_bounds = array<i64: 32, 96>}, {pipeline_mode = #tpu.pipeline_mode<synchronous>, transform_indices = @transform_2, window_bounds = array<i64: 1, 96>}, {transform_indices = @transform_3, window_bounds = array<i64: 16, 64>}, {transform_indices = @transform_4, window_bounds = array<i64: 16, 32>}]} {
    %c0 = arith.constant 0 : index
    %c0_0 = arith.constant 0 : index
    %0 = vector.load %arg1[%c0, %c0_0] : memref<16x32xf32, #tpu.memory_space<vmem>>, vector<16x32xf32>
    %c0_1 = arith.constant 0 : index
    %c0_2 = arith.constant 0 : index
    %1 = vector.load %arg2[%c0_1, %c0_2] : memref<32x96xf32, #tpu.memory_space<vmem>>, vector<32x96xf32>
    %cst = arith.constant dense<0.000000e+00> : vector<16x96xf32>
    %2 = tpu.matmul %0, %1, %cst {dimension_numbers = #tpu.dot_dimension_numbers<[1], [0], [0], [1], [0, 0, 1, 1], [], []>} : vector<16x32xf32>, vector<32x96xf32>, vector<16x96xf32> -> vector<16x96xf32>
    %c0_3 = arith.constant 0 : index
    %c0_4 = arith.constant 0 : index
    %3 = vector.load %arg3[%c0_3, %c0_4] : memref<1x96xf32, #tpu.memory_space<vmem>>, vector<1x96xf32>
    %4 = vector.broadcast %3 : vector<1x96xf32> to vector<16x96xf32>
    %5 = arith.addf %2, %4 : vector<16x96xf32>
    %6 = vector.extract_strided_slice %5 {offsets = [0, 0], sizes = [16, 64], strides = [1, 1]} : vector<16x96xf32> to vector<16x64xf32>
    %c0_5 = arith.constant 0 : index
    %c0_6 = arith.constant 0 : index
    %7 = vector.load %arg4[%c0_5, %c0_6] : memref<16x64xf32, #tpu.memory_space<vmem>>, vector<16x64xf32>
    tpu.vector_store %arg4[%c0_5, %c0_6], %6 {strides = array<i32>} : memref<16x64xf32, #tpu.memory_space<vmem>>, vector<16x64xf32>,
    %8 = vector.extract_strided_slice %5 {offsets = [0, 64], sizes = [16, 32], strides = [1, 1]} : vector<16x96xf32> to vector<16x32xf32>
    %9 = vector.extract_strided_slice %8 {offsets = [0, 0], sizes = [16, 8], strides = [1, 1]} : vector<16x32xf32> to vector<16x8xf32>
    %cst_7 = arith.constant dense<0xFF800000> : vector<16xf32>
    %10 = vector.multi_reduction <maximumf>, %9, %cst_7 [1] : vector<16x8xf32> to vector<16xf32>
    %11 = vector.shape_cast %10 : vector<16xf32> to vector<16x1xf32>
    %12 = vector.broadcast %11 : vector<16x1xf32> to vector<16x8xf32>
    %13 = arith.subf %9, %12 : vector<16x8xf32>
    %14 = math.exp %13 : vector<16x8xf32>
    %cst_8 = arith.constant dense<0.000000e+00> : vector<16xf32>
    %15 = vector.multi_reduction <add>, %14, %cst_8 [1] : vector<16x8xf32> to vector<16xf32>
    %16 = vector.shape_cast %15 : vector<16xf32> to vector<16x1xf32>
    %17 = vector.broadcast %16 : vector<16x1xf32> to vector<16x8xf32>
    %18 = arith.divf %14, %17 : vector<16x8xf32>
    %19 = vector.extract_strided_slice %8 {offsets = [0, 8], sizes = [16, 8], strides = [1, 1]} : vector<16x32xf32> to vector<16x8xf32>
    %cst_9 = arith.constant dense<0xFF800000> : vector<16xf32>
    %20 = vector.multi_reduction <maximumf>, %19, %cst_9 [1] : vector<16x8xf32> to vector<16xf32>
    %21 = vector.shape_cast %20 : vector<16xf32> to vector<16x1xf32>
    %22 = vector.broadcast %21 : vector<16x1xf32> to vector<16x8xf32>
    %23 = arith.subf %19, %22 : vector<16x8xf32>
    %24 = math.exp %23 : vector<16x8xf32>
    %cst_10 = arith.constant dense<0.000000e+00> : vector<16xf32>
    %25 = vector.multi_reduction <add>, %24, %cst_10 [1] : vector<16x8xf32> to vector<16xf32>
    %26 = vector.shape_cast %25 : vector<16xf32> to vector<16x1xf32>
    %27 = vector.broadcast %26 : vector<16x1xf32> to vector<16x8xf32>
    %28 = arith.divf %24, %27 : vector<16x8xf32>
    %29 = vector.extract_strided_slice %8 {offsets = [0, 16], sizes = [16, 8], strides = [1, 1]} : vector<16x32xf32> to vector<16x8xf32>
    %cst_11 = arith.constant dense<0xFF800000> : vector<16xf32>
    %30 = vector.multi_reduction <maximumf>, %29, %cst_11 [1] : vector<16x8xf32> to vector<16xf32>
    %31 = vector.shape_cast %30 : vector<16xf32> to vector<16x1xf32>
    %32 = vector.broadcast %31 : vector<16x1xf32> to vector<16x8xf32>
    %33 = arith.subf %29, %32 : vector<16x8xf32>
    %34 = math.exp %33 : vector<16x8xf32>
    %cst_12 = arith.constant dense<0.000000e+00> : vector<16xf32>
    %35 = vector.multi_reduction <add>, %34, %cst_12 [1] : vector<16x8xf32> to vector<16xf32>
    %36 = vector.shape_cast %35 : vector<16xf32> to vector<16x1xf32>
    %37 = vector.broadcast %36 : vector<16x1xf32> to vector<16x8xf32>
    %38 = arith.divf %34, %37 : vector<16x8xf32>
    %39 = vector.extract_strided_slice %8 {offsets = [0, 24], sizes = [16, 8], strides = [1, 1]} : vector<16x32xf32> to vector<16x8xf32>
    %cst_13 = arith.constant dense<0xFF800000> : vector<16xf32>
    %40 = vector.multi_reduction <maximumf>, %39, %cst_13 [1] : vector<16x8xf32> to vector<16xf32>
    %41 = vector.shape_cast %40 : vector<16xf32> to vector<16x1xf32>
    %42 = vector.broadcast %41 : vector<16x1xf32> to vector<16x8xf32>
    %43 = arith.subf %39, %42 : vector<16x8xf32>
    %44 = math.exp %43 : vector<16x8xf32>
    %cst_14 = arith.constant dense<0.000000e+00> : vector<16xf32>
    %45 = vector.multi_reduction <add>, %44, %cst_14 [1] : vector<16x8xf32> to vector<16xf32>
    %46 = vector.shape_cast %45 : vector<16xf32> to vector<16x1xf32>
    %47 = vector.broadcast %46 : vector<16x1xf32> to vector<16x8xf32>
    %48 = arith.divf %44, %47 : vector<16x8xf32>
    %49 = tpu.concatenate %18, %28, %38, %48 in 1 : vector<16x8xf32>, vector<16x8xf32>, vector<16x8xf32>, vector<16x8xf32> -> vector<16x32xf32>
    %c0_15 = arith.constant 0 : index
    %c0_16 = arith.constant 0 : index
    %50 = vector.load %arg5[%c0_15, %c0_16] : memref<16x32xf32, #tpu.memory_space<vmem>>, vector<16x32xf32>
    tpu.vector_store %arg5[%c0_15, %c0_16], %49 {strides = array<i32>} : memref<16x32xf32, #tpu.memory_space<vmem>>, vector<16x32xf32>,
    return
  }
  func.func @transform_0(%arg0: i32) -> (i32, i32) {
    %c0_i32 = arith.constant 0 : i32
    %c0_i32_0 = arith.constant 0 : i32
    return %arg0, %c0_i32 : i32, i32
  }
  func.func @transform_1(%arg0: i32) -> (i32, i32) {
    %c0_i32 = arith.constant 0 : i32
    %c0_i32_0 = arith.constant 0 : i32
    %c0_i32_1 = arith.constant 0 : i32
    return %c0_i32, %c0_i32_0 : i32, i32
  }
  func.func @transform_2(%arg0: i32) -> (i32, i32) {
    %c0_i32 = arith.constant 0 : i32
    %c0_i32_0 = arith.constant 0 : i32
    %c0_i32_1 = arith.constant 0 : i32
    return %c0_i32, %c0_i32_0 : i32, i32
  }
  func.func @transform_3(%arg0: i32) -> (i32, i32) {
    %c0_i32 = arith.constant 0 : i32
    %c0_i32_0 = arith.constant 0 : i32
    return %arg0, %c0_i32 : i32, i32
  }
  func.func @transform_4(%arg0: i32) -> (i32, i32) {
    %c0_i32 = arith.constant 0 : i32
    %c0_i32_0 = arith.constant 0 : i32
    return %arg0, %c0_i32 : i32, i32
  }
}

module attributes {stable_mosaic.version = 11 : i64} {
  func.func @_vproj_kernel(%arg0: i32, %arg1: memref<160x32xf32, #tpu.memory_space<vmem>>, %arg2: memref<32x32xbf16, #tpu.memory_space<vmem>>, %arg3: memref<1x32xf32, #tpu.memory_space<vmem>>, %arg4: memref<160x1xf32, #tpu.memory_space<vmem>>, %arg5: memref<160x32xbf16, #tpu.memory_space<vmem>>) attributes {dimension_semantics = [#tpu.dimension_semantics<parallel>], iteration_bounds = array<i64: 1>, scalar_prefetch = 0 : i64, scratch_operands = 0 : i64, tpu.core_type = #tpu.core_type<tc>, window_params = [{transform_indices = @transform_0, window_bounds = array<i64: 160, 32>}, {pipeline_mode = #tpu.pipeline_mode<synchronous>, transform_indices = @transform_1, window_bounds = array<i64: 32, 32>}, {pipeline_mode = #tpu.pipeline_mode<synchronous>, transform_indices = @transform_2, window_bounds = array<i64: 1, 32>}, {transform_indices = @transform_3, window_bounds = array<i64: 160, 1>}, {transform_indices = @transform_4, window_bounds = array<i64: 160, 32>}]} {
    %c0 = arith.constant 0 : index
    %c0_0 = arith.constant 0 : index
    %0 = vector.load %arg1[%c0, %c0_0] : memref<160x32xf32, #tpu.memory_space<vmem>>, vector<160x32xf32>
    %1 = arith.truncf %0 : vector<160x32xf32> to vector<160x32xbf16>
    %c0_1 = arith.constant 0 : index
    %c0_2 = arith.constant 0 : index
    %2 = vector.load %arg2[%c0_1, %c0_2] : memref<32x32xbf16, #tpu.memory_space<vmem>>, vector<32x32xbf16>
    %cst = arith.constant dense<0.000000e+00> : vector<160x32xf32>
    %3 = tpu.matmul %1, %2, %cst {dimension_numbers = #tpu.dot_dimension_numbers<[1], [0], [0], [1], [0, 0, 1, 1], [], []>} : vector<160x32xbf16>, vector<32x32xbf16>, vector<160x32xf32> -> vector<160x32xf32>
    %c0_3 = arith.constant 0 : index
    %c0_4 = arith.constant 0 : index
    %4 = vector.load %arg3[%c0_3, %c0_4] : memref<1x32xf32, #tpu.memory_space<vmem>>, vector<1x32xf32>
    %5 = vector.broadcast %4 : vector<1x32xf32> to vector<160x32xf32>
    %6 = arith.addf %3, %5 : vector<160x32xf32>
    %c0_5 = arith.constant 0 : index
    %c0_6 = arith.constant 0 : index
    %7 = vector.load %arg4[%c0_5, %c0_6] : memref<160x1xf32, #tpu.memory_space<vmem>>, vector<160x1xf32>
    %8 = vector.broadcast %7 : vector<160x1xf32> to vector<160x32xf32>
    %9 = arith.mulf %6, %8 : vector<160x32xf32>
    %10 = arith.truncf %9 : vector<160x32xf32> to vector<160x32xbf16>
    %c0_7 = arith.constant 0 : index
    %c0_8 = arith.constant 0 : index
    %11 = vector.load %arg5[%c0_7, %c0_8] : memref<160x32xbf16, #tpu.memory_space<vmem>>, vector<160x32xbf16>
    tpu.vector_store %arg5[%c0_7, %c0_8], %10 {strides = array<i32>} : memref<160x32xbf16, #tpu.memory_space<vmem>>, vector<160x32xbf16>,
    return
  }
  func.func @transform_0(%arg0: i32) -> (i32, i32) {
    %c0_i32 = arith.constant 0 : i32
    %c0_i32_0 = arith.constant 0 : i32
    return %arg0, %c0_i32 : i32, i32
  }
  func.func @transform_1(%arg0: i32) -> (i32, i32) {
    %c0_i32 = arith.constant 0 : i32
    %c0_i32_0 = arith.constant 0 : i32
    %c0_i32_1 = arith.constant 0 : i32
    return %c0_i32, %c0_i32_0 : i32, i32
  }
  func.func @transform_2(%arg0: i32) -> (i32, i32) {
    %c0_i32 = arith.constant 0 : i32
    %c0_i32_0 = arith.constant 0 : i32
    %c0_i32_1 = arith.constant 0 : i32
    return %c0_i32, %c0_i32_0 : i32, i32
  }
  func.func @transform_3(%arg0: i32) -> (i32, i32) {
    %c0_i32 = arith.constant 0 : i32
    %c0_i32_0 = arith.constant 0 : i32
    return %arg0, %c0_i32 : i32, i32
  }
  func.func @transform_4(%arg0: i32) -> (i32, i32) {
    %c0_i32 = arith.constant 0 : i32
    %c0_i32_0 = arith.constant 0 : i32
    return %arg0, %c0_i32 : i32, i32
  }
}

module attributes {stable_mosaic.version = 11 : i64} {
  func.func @_deform_kernel(%arg0: i32, %arg1: i32, %arg2: memref<1x80x32xbf16, #tpu.memory_space<vmem>>, %arg3: memref<1x8x96xf32, #tpu.memory_space<vmem>>, %arg4: memref<32x32xf32, #tpu.memory_space<vmem>>, %arg5: memref<1x32xf32, #tpu.memory_space<vmem>>, %arg6: memref<1x8x32xf32, #tpu.memory_space<vmem>>) attributes {dimension_semantics = [#tpu.dimension_semantics<parallel>, #tpu.dimension_semantics<parallel>], iteration_bounds = array<i64: 2, 1>, scalar_prefetch = 0 : i64, scratch_operands = 0 : i64, tpu.core_type = #tpu.core_type<tc>, window_params = [{transform_indices = @transform_0, window_bounds = array<i64: 1, 80, 32>}, {transform_indices = @transform_1, window_bounds = array<i64: 1, 8, 96>}, {pipeline_mode = #tpu.pipeline_mode<synchronous>, transform_indices = @transform_2, window_bounds = array<i64: 32, 32>}, {pipeline_mode = #tpu.pipeline_mode<synchronous>, transform_indices = @transform_3, window_bounds = array<i64: 1, 32>}, {transform_indices = @transform_4, window_bounds = array<i64: 1, 8, 32>}]} {
    %c0 = arith.constant 0 : index
    %c0_0 = arith.constant 0 : index
    %c0_1 = arith.constant 0 : index
    %0 = vector.load %arg3[%c0, %c0_0, %c0_1] : memref<1x8x96xf32, #tpu.memory_space<vmem>>, vector<1x8x96xf32>
    %1 = vector.shape_cast %0 : vector<1x8x96xf32> to vector<8x96xf32>
    %cst = arith.constant 0.000000e+00 : f32
    %2 = vector.broadcast %cst : f32 to vector<8x8xf32>
    %cst_2 = arith.constant 0.000000e+00 : f32
    %3 = vector.broadcast %cst_2 : f32 to vector<8x8xf32>
    %cst_3 = arith.constant 0.000000e+00 : f32
    %4 = vector.broadcast %cst_3 : f32 to vector<8x8xf32>
    %cst_4 = arith.constant 0.000000e+00 : f32
    %5 = vector.broadcast %cst_4 : f32 to vector<8x8xf32>
    %6 = vector.extract_strided_slice %1 {offsets = [0, 0], sizes = [8, 1], strides = [1, 1]} : vector<8x96xf32> to vector<8x1xf32>
    %7 = vector.extract_strided_slice %1 {offsets = [0, 1], sizes = [8, 1], strides = [1, 1]} : vector<8x96xf32> to vector<8x1xf32>
    %8 = vector.extract_strided_slice %1 {offsets = [0, 2], sizes = [8, 1], strides = [1, 1]} : vector<8x96xf32> to vector<8x1xf32>
    %9 = vector.extract_strided_slice %1 {offsets = [0, 3], sizes = [8, 1], strides = [1, 1]} : vector<8x96xf32> to vector<8x1xf32>
    %10 = vector.extract_strided_slice %1 {offsets = [0, 4], sizes = [8, 1], strides = [1, 1]} : vector<8x96xf32> to vector<8x1xf32>
    %11 = vector.extract_strided_slice %1 {offsets = [0, 5], sizes = [8, 1], strides = [1, 1]} : vector<8x96xf32> to vector<8x1xf32>
    %12 = vector.extract_strided_slice %1 {offsets = [0, 6], sizes = [8, 1], strides = [1, 1]} : vector<8x96xf32> to vector<8x1xf32>
    %13 = vector.extract_strided_slice %1 {offsets = [0, 7], sizes = [8, 1], strides = [1, 1]} : vector<8x96xf32> to vector<8x1xf32>
    %14 = vector.extract_strided_slice %1 {offsets = [0, 8], sizes = [8, 1], strides = [1, 1]} : vector<8x96xf32> to vector<8x1xf32>
    %15 = vector.extract_strided_slice %1 {offsets = [0, 9], sizes = [8, 1], strides = [1, 1]} : vector<8x96xf32> to vector<8x1xf32>
    %16 = vector.extract_strided_slice %1 {offsets = [0, 10], sizes = [8, 1], strides = [1, 1]} : vector<8x96xf32> to vector<8x1xf32>
    %17 = vector.extract_strided_slice %1 {offsets = [0, 11], sizes = [8, 1], strides = [1, 1]} : vector<8x96xf32> to vector<8x1xf32>
    %18 = vector.extract_strided_slice %1 {offsets = [0, 24], sizes = [8, 1], strides = [1, 1]} : vector<8x96xf32> to vector<8x1xf32>
    %19 = vector.extract_strided_slice %1 {offsets = [0, 25], sizes = [8, 1], strides = [1, 1]} : vector<8x96xf32> to vector<8x1xf32>
    %20 = vector.extract_strided_slice %1 {offsets = [0, 26], sizes = [8, 1], strides = [1, 1]} : vector<8x96xf32> to vector<8x1xf32>
    %21 = vector.extract_strided_slice %1 {offsets = [0, 27], sizes = [8, 1], strides = [1, 1]} : vector<8x96xf32> to vector<8x1xf32>
    %22 = vector.extract_strided_slice %1 {offsets = [0, 28], sizes = [8, 1], strides = [1, 1]} : vector<8x96xf32> to vector<8x1xf32>
    %23 = vector.extract_strided_slice %1 {offsets = [0, 29], sizes = [8, 1], strides = [1, 1]} : vector<8x96xf32> to vector<8x1xf32>
    %24 = vector.extract_strided_slice %1 {offsets = [0, 30], sizes = [8, 1], strides = [1, 1]} : vector<8x96xf32> to vector<8x1xf32>
    %25 = vector.extract_strided_slice %1 {offsets = [0, 31], sizes = [8, 1], strides = [1, 1]} : vector<8x96xf32> to vector<8x1xf32>
    %26 = vector.extract_strided_slice %1 {offsets = [0, 32], sizes = [8, 1], strides = [1, 1]} : vector<8x96xf32> to vector<8x1xf32>
    %27 = vector.extract_strided_slice %1 {offsets = [0, 33], sizes = [8, 1], strides = [1, 1]} : vector<8x96xf32> to vector<8x1xf32>
    %28 = vector.extract_strided_slice %1 {offsets = [0, 34], sizes = [8, 1], strides = [1, 1]} : vector<8x96xf32> to vector<8x1xf32>
    %29 = vector.extract_strided_slice %1 {offsets = [0, 35], sizes = [8, 1], strides = [1, 1]} : vector<8x96xf32> to vector<8x1xf32>
    %30 = vector.extract_strided_slice %1 {offsets = [0, 48], sizes = [8, 1], strides = [1, 1]} : vector<8x96xf32> to vector<8x1xf32>
    %31 = vector.extract_strided_slice %1 {offsets = [0, 49], sizes = [8, 1], strides = [1, 1]} : vector<8x96xf32> to vector<8x1xf32>
    %32 = vector.extract_strided_slice %1 {offsets = [0, 50], sizes = [8, 1], strides = [1, 1]} : vector<8x96xf32> to vector<8x1xf32>
    %33 = vector.extract_strided_slice %1 {offsets = [0, 51], sizes = [8, 1], strides = [1, 1]} : vector<8x96xf32> to vector<8x1xf32>
    %34 = vector.extract_strided_slice %1 {offsets = [0, 52], sizes = [8, 1], strides = [1, 1]} : vector<8x96xf32> to vector<8x1xf32>
    %35 = vector.extract_strided_slice %1 {offsets = [0, 53], sizes = [8, 1], strides = [1, 1]} : vector<8x96xf32> to vector<8x1xf32>
    %36 = vector.extract_strided_slice %1 {offsets = [0, 54], sizes = [8, 1], strides = [1, 1]} : vector<8x96xf32> to vector<8x1xf32>
    %37 = vector.extract_strided_slice %1 {offsets = [0, 55], sizes = [8, 1], strides = [1, 1]} : vector<8x96xf32> to vector<8x1xf32>
    %38 = vector.extract_strided_slice %1 {offsets = [0, 56], sizes = [8, 1], strides = [1, 1]} : vector<8x96xf32> to vector<8x1xf32>
    %39 = vector.extract_strided_slice %1 {offsets = [0, 57], sizes = [8, 1], strides = [1, 1]} : vector<8x96xf32> to vector<8x1xf32>
    %40 = vector.extract_strided_slice %1 {offsets = [0, 58], sizes = [8, 1], strides = [1, 1]} : vector<8x96xf32> to vector<8x1xf32>
    %41 = vector.extract_strided_slice %1 {offsets = [0, 59], sizes = [8, 1], strides = [1, 1]} : vector<8x96xf32> to vector<8x1xf32>
    %42 = vector.extract_strided_slice %1 {offsets = [0, 72], sizes = [8, 1], strides = [1, 1]} : vector<8x96xf32> to vector<8x1xf32>
    %43 = vector.extract_strided_slice %1 {offsets = [0, 73], sizes = [8, 1], strides = [1, 1]} : vector<8x96xf32> to vector<8x1xf32>
    %44 = vector.extract_strided_slice %1 {offsets = [0, 74], sizes = [8, 1], strides = [1, 1]} : vector<8x96xf32> to vector<8x1xf32>
    %45 = vector.extract_strided_slice %1 {offsets = [0, 75], sizes = [8, 1], strides = [1, 1]} : vector<8x96xf32> to vector<8x1xf32>
    %46 = vector.extract_strided_slice %1 {offsets = [0, 76], sizes = [8, 1], strides = [1, 1]} : vector<8x96xf32> to vector<8x1xf32>
    %47 = vector.extract_strided_slice %1 {offsets = [0, 77], sizes = [8, 1], strides = [1, 1]} : vector<8x96xf32> to vector<8x1xf32>
    %48 = vector.extract_strided_slice %1 {offsets = [0, 78], sizes = [8, 1], strides = [1, 1]} : vector<8x96xf32> to vector<8x1xf32>
    %49 = vector.extract_strided_slice %1 {offsets = [0, 79], sizes = [8, 1], strides = [1, 1]} : vector<8x96xf32> to vector<8x1xf32>
    %50 = vector.extract_strided_slice %1 {offsets = [0, 80], sizes = [8, 1], strides = [1, 1]} : vector<8x96xf32> to vector<8x1xf32>
    %51 = vector.extract_strided_slice %1 {offsets = [0, 81], sizes = [8, 1], strides = [1, 1]} : vector<8x96xf32> to vector<8x1xf32>
    %52 = vector.extract_strided_slice %1 {offsets = [0, 82], sizes = [8, 1], strides = [1, 1]} : vector<8x96xf32> to vector<8x1xf32>
    %53 = vector.extract_strided_slice %1 {offsets = [0, 83], sizes = [8, 1], strides = [1, 1]} : vector<8x96xf32> to vector<8x1xf32>
    %54 = tpu.iota {dimensions = array<i32: 1>} : vector<1x64xi32>
    %55 = arith.sitofp %54 : vector<1x64xi32> to vector<1x64xf32>
    %cst_5 = arith.constant 0.000000e+00 : f32
    %56 = vector.broadcast %cst_5 : f32 to vector<1x64xf32>
    %57 = arith.addf %55, %56 : vector<1x64xf32>
    %cst_6 = arith.constant 5.000000e-01 : f32
    %58 = vector.broadcast %cst_6 : f32 to vector<1x64xf32>
    %59 = arith.addf %57, %58 : vector<1x64xf32>
    %cst_7 = arith.constant 8.000000e+00 : f32
    %60 = vector.broadcast %cst_7 : f32 to vector<1x64xf32>
    %61 = arith.divf %59, %60 : vector<1x64xf32>
    %62 = math.floor %61 : vector<1x64xf32>
    %cst_8 = arith.constant 8.000000e+00 : f32
    %63 = vector.broadcast %cst_8 : f32 to vector<1x64xf32>
    %64 = arith.mulf %62, %63 : vector<1x64xf32>
    %65 = arith.subf %57, %64 : vector<1x64xf32>
    %c0_9 = arith.constant 0 : index
    %c0_10 = arith.constant 0 : index
    %c0_11 = arith.constant 0 : index
    %66 = vector.load %arg2[%c0_9, %c0_10, %c0_11] : memref<1x80x32xbf16, #tpu.memory_space<vmem>>, vector<1x64x32xbf16>
    %67 = vector.shape_cast %66 : vector<1x64x32xbf16> to vector<64x32xbf16>
    %cst_12 = arith.constant 0.000000e+00 : f32
    %68 = vector.broadcast %cst_12 : f32 to vector<8x64xf32>
    %69 = vector.broadcast %65 : vector<1x64xf32> to vector<8x64xf32>
    %70 = vector.broadcast %6 : vector<8x1xf32> to vector<8x64xf32>
    %71 = arith.subf %69, %70 : vector<8x64xf32>
    %72 = math.absf %71 : vector<8x64xf32>
    %cst_13 = arith.constant 1.000000e+00 : f32
    %73 = vector.broadcast %cst_13 : f32 to vector<8x64xf32>
    %74 = arith.subf %73, %72 : vector<8x64xf32>
    %cst_14 = arith.constant 0.000000e+00 : f32
    %75 = vector.broadcast %cst_14 : f32 to vector<8x64xf32>
    %76 = arith.maximumf %74, %75 : vector<8x64xf32>
    %77 = vector.broadcast %62 : vector<1x64xf32> to vector<8x64xf32>
    %78 = vector.broadcast %7 : vector<8x1xf32> to vector<8x64xf32>
    %79 = arith.subf %77, %78 : vector<8x64xf32>
    %80 = math.absf %79 : vector<8x64xf32>
    %cst_15 = arith.constant 1.000000e+00 : f32
    %81 = vector.broadcast %cst_15 : f32 to vector<8x64xf32>
    %82 = arith.subf %81, %80 : vector<8x64xf32>
    %cst_16 = arith.constant 0.000000e+00 : f32
    %83 = vector.broadcast %cst_16 : f32 to vector<8x64xf32>
    %84 = arith.maximumf %82, %83 : vector<8x64xf32>
    %85 = arith.mulf %76, %84 : vector<8x64xf32>
    %86 = vector.broadcast %8 : vector<8x1xf32> to vector<8x64xf32>
    %87 = arith.mulf %85, %86 : vector<8x64xf32>
    %88 = arith.addf %68, %87 : vector<8x64xf32>
    %89 = vector.broadcast %65 : vector<1x64xf32> to vector<8x64xf32>
    %90 = vector.broadcast %9 : vector<8x1xf32> to vector<8x64xf32>
    %91 = arith.subf %89, %90 : vector<8x64xf32>
    %92 = math.absf %91 : vector<8x64xf32>
    %cst_17 = arith.constant 1.000000e+00 : f32
    %93 = vector.broadcast %cst_17 : f32 to vector<8x64xf32>
    %94 = arith.subf %93, %92 : vector<8x64xf32>
    %cst_18 = arith.constant 0.000000e+00 : f32
    %95 = vector.broadcast %cst_18 : f32 to vector<8x64xf32>
    %96 = arith.maximumf %94, %95 : vector<8x64xf32>
    %97 = vector.broadcast %62 : vector<1x64xf32> to vector<8x64xf32>
    %98 = vector.broadcast %10 : vector<8x1xf32> to vector<8x64xf32>
    %99 = arith.subf %97, %98 : vector<8x64xf32>
    %100 = math.absf %99 : vector<8x64xf32>
    %cst_19 = arith.constant 1.000000e+00 : f32
    %101 = vector.broadcast %cst_19 : f32 to vector<8x64xf32>
    %102 = arith.subf %101, %100 : vector<8x64xf32>
    %cst_20 = arith.constant 0.000000e+00 : f32
    %103 = vector.broadcast %cst_20 : f32 to vector<8x64xf32>
    %104 = arith.maximumf %102, %103 : vector<8x64xf32>
    %105 = arith.mulf %96, %104 : vector<8x64xf32>
    %106 = vector.broadcast %11 : vector<8x1xf32> to vector<8x64xf32>
    %107 = arith.mulf %105, %106 : vector<8x64xf32>
    %108 = arith.addf %88, %107 : vector<8x64xf32>
    %109 = vector.broadcast %65 : vector<1x64xf32> to vector<8x64xf32>
    %110 = vector.broadcast %12 : vector<8x1xf32> to vector<8x64xf32>
    %111 = arith.subf %109, %110 : vector<8x64xf32>
    %112 = math.absf %111 : vector<8x64xf32>
    %cst_21 = arith.constant 1.000000e+00 : f32
    %113 = vector.broadcast %cst_21 : f32 to vector<8x64xf32>
    %114 = arith.subf %113, %112 : vector<8x64xf32>
    %cst_22 = arith.constant 0.000000e+00 : f32
    %115 = vector.broadcast %cst_22 : f32 to vector<8x64xf32>
    %116 = arith.maximumf %114, %115 : vector<8x64xf32>
    %117 = vector.broadcast %62 : vector<1x64xf32> to vector<8x64xf32>
    %118 = vector.broadcast %13 : vector<8x1xf32> to vector<8x64xf32>
    %119 = arith.subf %117, %118 : vector<8x64xf32>
    %120 = math.absf %119 : vector<8x64xf32>
    %cst_23 = arith.constant 1.000000e+00 : f32
    %121 = vector.broadcast %cst_23 : f32 to vector<8x64xf32>
    %122 = arith.subf %121, %120 : vector<8x64xf32>
    %cst_24 = arith.constant 0.000000e+00 : f32
    %123 = vector.broadcast %cst_24 : f32 to vector<8x64xf32>
    %124 = arith.maximumf %122, %123 : vector<8x64xf32>
    %125 = arith.mulf %116, %124 : vector<8x64xf32>
    %126 = vector.broadcast %14 : vector<8x1xf32> to vector<8x64xf32>
    %127 = arith.mulf %125, %126 : vector<8x64xf32>
    %128 = arith.addf %108, %127 : vector<8x64xf32>
    %129 = vector.broadcast %65 : vector<1x64xf32> to vector<8x64xf32>
    %130 = vector.broadcast %15 : vector<8x1xf32> to vector<8x64xf32>
    %131 = arith.subf %129, %130 : vector<8x64xf32>
    %132 = math.absf %131 : vector<8x64xf32>
    %cst_25 = arith.constant 1.000000e+00 : f32
    %133 = vector.broadcast %cst_25 : f32 to vector<8x64xf32>
    %134 = arith.subf %133, %132 : vector<8x64xf32>
    %cst_26 = arith.constant 0.000000e+00 : f32
    %135 = vector.broadcast %cst_26 : f32 to vector<8x64xf32>
    %136 = arith.maximumf %134, %135 : vector<8x64xf32>
    %137 = vector.broadcast %62 : vector<1x64xf32> to vector<8x64xf32>
    %138 = vector.broadcast %16 : vector<8x1xf32> to vector<8x64xf32>
    %139 = arith.subf %137, %138 : vector<8x64xf32>
    %140 = math.absf %139 : vector<8x64xf32>
    %cst_27 = arith.constant 1.000000e+00 : f32
    %141 = vector.broadcast %cst_27 : f32 to vector<8x64xf32>
    %142 = arith.subf %141, %140 : vector<8x64xf32>
    %cst_28 = arith.constant 0.000000e+00 : f32
    %143 = vector.broadcast %cst_28 : f32 to vector<8x64xf32>
    %144 = arith.maximumf %142, %143 : vector<8x64xf32>
    %145 = arith.mulf %136, %144 : vector<8x64xf32>
    %146 = vector.broadcast %17 : vector<8x1xf32> to vector<8x64xf32>
    %147 = arith.mulf %145, %146 : vector<8x64xf32>
    %148 = arith.addf %128, %147 : vector<8x64xf32>
    %149 = arith.truncf %148 : vector<8x64xf32> to vector<8x64xbf16>
    %150 = vector.extract_strided_slice %67 {offsets = [0, 0], sizes = [64, 8], strides = [1, 1]} : vector<64x32xbf16> to vector<64x8xbf16>
    %cst_29 = arith.constant dense<0.000000e+00> : vector<8x8xf32>
    %151 = tpu.matmul %149, %150, %cst_29 {dimension_numbers = #tpu.dot_dimension_numbers<[1], [0], [0], [1], [0, 0, 1, 1], [], []>} : vector<8x64xbf16>, vector<64x8xbf16>, vector<8x8xf32> -> vector<8x8xf32>
    %152 = arith.addf %2, %151 : vector<8x8xf32>
    %cst_30 = arith.constant 0.000000e+00 : f32
    %153 = vector.broadcast %cst_30 : f32 to vector<8x64xf32>
    %154 = vector.broadcast %65 : vector<1x64xf32> to vector<8x64xf32>
    %155 = vector.broadcast %18 : vector<8x1xf32> to vector<8x64xf32>
    %156 = arith.subf %154, %155 : vector<8x64xf32>
    %157 = math.absf %156 : vector<8x64xf32>
    %cst_31 = arith.constant 1.000000e+00 : f32
    %158 = vector.broadcast %cst_31 : f32 to vector<8x64xf32>
    %159 = arith.subf %158, %157 : vector<8x64xf32>
    %cst_32 = arith.constant 0.000000e+00 : f32
    %160 = vector.broadcast %cst_32 : f32 to vector<8x64xf32>
    %161 = arith.maximumf %159, %160 : vector<8x64xf32>
    %162 = vector.broadcast %62 : vector<1x64xf32> to vector<8x64xf32>
    %163 = vector.broadcast %19 : vector<8x1xf32> to vector<8x64xf32>
    %164 = arith.subf %162, %163 : vector<8x64xf32>
    %165 = math.absf %164 : vector<8x64xf32>
    %cst_33 = arith.constant 1.000000e+00 : f32
    %166 = vector.broadcast %cst_33 : f32 to vector<8x64xf32>
    %167 = arith.subf %166, %165 : vector<8x64xf32>
    %cst_34 = arith.constant 0.000000e+00 : f32
    %168 = vector.broadcast %cst_34 : f32 to vector<8x64xf32>
    %169 = arith.maximumf %167, %168 : vector<8x64xf32>
    %170 = arith.mulf %161, %169 : vector<8x64xf32>
    %171 = vector.broadcast %20 : vector<8x1xf32> to vector<8x64xf32>
    %172 = arith.mulf %170, %171 : vector<8x64xf32>
    %173 = arith.addf %153, %172 : vector<8x64xf32>
    %174 = vector.broadcast %65 : vector<1x64xf32> to vector<8x64xf32>
    %175 = vector.broadcast %21 : vector<8x1xf32> to vector<8x64xf32>
    %176 = arith.subf %174, %175 : vector<8x64xf32>
    %177 = math.absf %176 : vector<8x64xf32>
    %cst_35 = arith.constant 1.000000e+00 : f32
    %178 = vector.broadcast %cst_35 : f32 to vector<8x64xf32>
    %179 = arith.subf %178, %177 : vector<8x64xf32>
    %cst_36 = arith.constant 0.000000e+00 : f32
    %180 = vector.broadcast %cst_36 : f32 to vector<8x64xf32>
    %181 = arith.maximumf %179, %180 : vector<8x64xf32>
    %182 = vector.broadcast %62 : vector<1x64xf32> to vector<8x64xf32>
    %183 = vector.broadcast %22 : vector<8x1xf32> to vector<8x64xf32>
    %184 = arith.subf %182, %183 : vector<8x64xf32>
    %185 = math.absf %184 : vector<8x64xf32>
    %cst_37 = arith.constant 1.000000e+00 : f32
    %186 = vector.broadcast %cst_37 : f32 to vector<8x64xf32>
    %187 = arith.subf %186, %185 : vector<8x64xf32>
    %cst_38 = arith.constant 0.000000e+00 : f32
    %188 = vector.broadcast %cst_38 : f32 to vector<8x64xf32>
    %189 = arith.maximumf %187, %188 : vector<8x64xf32>
    %190 = arith.mulf %181, %189 : vector<8x64xf32>
    %191 = vector.broadcast %23 : vector<8x1xf32> to vector<8x64xf32>
    %192 = arith.mulf %190, %191 : vector<8x64xf32>
    %193 = arith.addf %173, %192 : vector<8x64xf32>
    %194 = vector.broadcast %65 : vector<1x64xf32> to vector<8x64xf32>
    %195 = vector.broadcast %24 : vector<8x1xf32> to vector<8x64xf32>
    %196 = arith.subf %194, %195 : vector<8x64xf32>
    %197 = math.absf %196 : vector<8x64xf32>
    %cst_39 = arith.constant 1.000000e+00 : f32
    %198 = vector.broadcast %cst_39 : f32 to vector<8x64xf32>
    %199 = arith.subf %198, %197 : vector<8x64xf32>
    %cst_40 = arith.constant 0.000000e+00 : f32
    %200 = vector.broadcast %cst_40 : f32 to vector<8x64xf32>
    %201 = arith.maximumf %199, %200 : vector<8x64xf32>
    %202 = vector.broadcast %62 : vector<1x64xf32> to vector<8x64xf32>
    %203 = vector.broadcast %25 : vector<8x1xf32> to vector<8x64xf32>
    %204 = arith.subf %202, %203 : vector<8x64xf32>
    %205 = math.absf %204 : vector<8x64xf32>
    %cst_41 = arith.constant 1.000000e+00 : f32
    %206 = vector.broadcast %cst_41 : f32 to vector<8x64xf32>
    %207 = arith.subf %206, %205 : vector<8x64xf32>
    %cst_42 = arith.constant 0.000000e+00 : f32
    %208 = vector.broadcast %cst_42 : f32 to vector<8x64xf32>
    %209 = arith.maximumf %207, %208 : vector<8x64xf32>
    %210 = arith.mulf %201, %209 : vector<8x64xf32>
    %211 = vector.broadcast %26 : vector<8x1xf32> to vector<8x64xf32>
    %212 = arith.mulf %210, %211 : vector<8x64xf32>
    %213 = arith.addf %193, %212 : vector<8x64xf32>
    %214 = vector.broadcast %65 : vector<1x64xf32> to vector<8x64xf32>
    %215 = vector.broadcast %27 : vector<8x1xf32> to vector<8x64xf32>
    %216 = arith.subf %214, %215 : vector<8x64xf32>
    %217 = math.absf %216 : vector<8x64xf32>
    %cst_43 = arith.constant 1.000000e+00 : f32
    %218 = vector.broadcast %cst_43 : f32 to vector<8x64xf32>
    %219 = arith.subf %218, %217 : vector<8x64xf32>
    %cst_44 = arith.constant 0.000000e+00 : f32
    %220 = vector.broadcast %cst_44 : f32 to vector<8x64xf32>
    %221 = arith.maximumf %219, %220 : vector<8x64xf32>
    %222 = vector.broadcast %62 : vector<1x64xf32> to vector<8x64xf32>
    %223 = vector.broadcast %28 : vector<8x1xf32> to vector<8x64xf32>
    %224 = arith.subf %222, %223 : vector<8x64xf32>
    %225 = math.absf %224 : vector<8x64xf32>
    %cst_45 = arith.constant 1.000000e+00 : f32
    %226 = vector.broadcast %cst_45 : f32 to vector<8x64xf32>
    %227 = arith.subf %226, %225 : vector<8x64xf32>
    %cst_46 = arith.constant 0.000000e+00 : f32
    %228 = vector.broadcast %cst_46 : f32 to vector<8x64xf32>
    %229 = arith.maximumf %227, %228 : vector<8x64xf32>
    %230 = arith.mulf %221, %229 : vector<8x64xf32>
    %231 = vector.broadcast %29 : vector<8x1xf32> to vector<8x64xf32>
    %232 = arith.mulf %230, %231 : vector<8x64xf32>
    %233 = arith.addf %213, %232 : vector<8x64xf32>
    %234 = arith.truncf %233 : vector<8x64xf32> to vector<8x64xbf16>
    %235 = vector.extract_strided_slice %67 {offsets = [0, 8], sizes = [64, 8], strides = [1, 1]} : vector<64x32xbf16> to vector<64x8xbf16>
    %cst_47 = arith.constant dense<0.000000e+00> : vector<8x8xf32>
    %236 = tpu.matmul %234, %235, %cst_47 {dimension_numbers = #tpu.dot_dimension_numbers<[1], [0], [0], [1], [0, 0, 1, 1], [], []>} : vector<8x64xbf16>, vector<64x8xbf16>, vector<8x8xf32> -> vector<8x8xf32>
    %237 = arith.addf %3, %236 : vector<8x8xf32>
    %cst_48 = arith.constant 0.000000e+00 : f32
    %238 = vector.broadcast %cst_48 : f32 to vector<8x64xf32>
    %239 = vector.broadcast %65 : vector<1x64xf32> to vector<8x64xf32>
    %240 = vector.broadcast %30 : vector<8x1xf32> to vector<8x64xf32>
    %241 = arith.subf %239, %240 : vector<8x64xf32>
    %242 = math.absf %241 : vector<8x64xf32>
    %cst_49 = arith.constant 1.000000e+00 : f32
    %243 = vector.broadcast %cst_49 : f32 to vector<8x64xf32>
    %244 = arith.subf %243, %242 : vector<8x64xf32>
    %cst_50 = arith.constant 0.000000e+00 : f32
    %245 = vector.broadcast %cst_50 : f32 to vector<8x64xf32>
    %246 = arith.maximumf %244, %245 : vector<8x64xf32>
    %247 = vector.broadcast %62 : vector<1x64xf32> to vector<8x64xf32>
    %248 = vector.broadcast %31 : vector<8x1xf32> to vector<8x64xf32>
    %249 = arith.subf %247, %248 : vector<8x64xf32>
    %250 = math.absf %249 : vector<8x64xf32>
    %cst_51 = arith.constant 1.000000e+00 : f32
    %251 = vector.broadcast %cst_51 : f32 to vector<8x64xf32>
    %252 = arith.subf %251, %250 : vector<8x64xf32>
    %cst_52 = arith.constant 0.000000e+00 : f32
    %253 = vector.broadcast %cst_52 : f32 to vector<8x64xf32>
    %254 = arith.maximumf %252, %253 : vector<8x64xf32>
    %255 = arith.mulf %246, %254 : vector<8x64xf32>
    %256 = vector.broadcast %32 : vector<8x1xf32> to vector<8x64xf32>
    %257 = arith.mulf %255, %256 : vector<8x64xf32>
    %258 = arith.addf %238, %257 : vector<8x64xf32>
    %259 = vector.broadcast %65 : vector<1x64xf32> to vector<8x64xf32>
    %260 = vector.broadcast %33 : vector<8x1xf32> to vector<8x64xf32>
    %261 = arith.subf %259, %260 : vector<8x64xf32>
    %262 = math.absf %261 : vector<8x64xf32>
    %cst_53 = arith.constant 1.000000e+00 : f32
    %263 = vector.broadcast %cst_53 : f32 to vector<8x64xf32>
    %264 = arith.subf %263, %262 : vector<8x64xf32>
    %cst_54 = arith.constant 0.000000e+00 : f32
    %265 = vector.broadcast %cst_54 : f32 to vector<8x64xf32>
    %266 = arith.maximumf %264, %265 : vector<8x64xf32>
    %267 = vector.broadcast %62 : vector<1x64xf32> to vector<8x64xf32>
    %268 = vector.broadcast %34 : vector<8x1xf32> to vector<8x64xf32>
    %269 = arith.subf %267, %268 : vector<8x64xf32>
    %270 = math.absf %269 : vector<8x64xf32>
    %cst_55 = arith.constant 1.000000e+00 : f32
    %271 = vector.broadcast %cst_55 : f32 to vector<8x64xf32>
    %272 = arith.subf %271, %270 : vector<8x64xf32>
    %cst_56 = arith.constant 0.000000e+00 : f32
    %273 = vector.broadcast %cst_56 : f32 to vector<8x64xf32>
    %274 = arith.maximumf %272, %273 : vector<8x64xf32>
    %275 = arith.mulf %266, %274 : vector<8x64xf32>
    %276 = vector.broadcast %35 : vector<8x1xf32> to vector<8x64xf32>
    %277 = arith.mulf %275, %276 : vector<8x64xf32>
    %278 = arith.addf %258, %277 : vector<8x64xf32>
    %279 = vector.broadcast %65 : vector<1x64xf32> to vector<8x64xf32>
    %280 = vector.broadcast %36 : vector<8x1xf32> to vector<8x64xf32>
    %281 = arith.subf %279, %280 : vector<8x64xf32>
    %282 = math.absf %281 : vector<8x64xf32>
    %cst_57 = arith.constant 1.000000e+00 : f32
    %283 = vector.broadcast %cst_57 : f32 to vector<8x64xf32>
    %284 = arith.subf %283, %282 : vector<8x64xf32>
    %cst_58 = arith.constant 0.000000e+00 : f32
    %285 = vector.broadcast %cst_58 : f32 to vector<8x64xf32>
    %286 = arith.maximumf %284, %285 : vector<8x64xf32>
    %287 = vector.broadcast %62 : vector<1x64xf32> to vector<8x64xf32>
    %288 = vector.broadcast %37 : vector<8x1xf32> to vector<8x64xf32>
    %289 = arith.subf %287, %288 : vector<8x64xf32>
    %290 = math.absf %289 : vector<8x64xf32>
    %cst_59 = arith.constant 1.000000e+00 : f32
    %291 = vector.broadcast %cst_59 : f32 to vector<8x64xf32>
    %292 = arith.subf %291, %290 : vector<8x64xf32>
    %cst_60 = arith.constant 0.000000e+00 : f32
    %293 = vector.broadcast %cst_60 : f32 to vector<8x64xf32>
    %294 = arith.maximumf %292, %293 : vector<8x64xf32>
    %295 = arith.mulf %286, %294 : vector<8x64xf32>
    %296 = vector.broadcast %38 : vector<8x1xf32> to vector<8x64xf32>
    %297 = arith.mulf %295, %296 : vector<8x64xf32>
    %298 = arith.addf %278, %297 : vector<8x64xf32>
    %299 = vector.broadcast %65 : vector<1x64xf32> to vector<8x64xf32>
    %300 = vector.broadcast %39 : vector<8x1xf32> to vector<8x64xf32>
    %301 = arith.subf %299, %300 : vector<8x64xf32>
    %302 = math.absf %301 : vector<8x64xf32>
    %cst_61 = arith.constant 1.000000e+00 : f32
    %303 = vector.broadcast %cst_61 : f32 to vector<8x64xf32>
    %304 = arith.subf %303, %302 : vector<8x64xf32>
    %cst_62 = arith.constant 0.000000e+00 : f32
    %305 = vector.broadcast %cst_62 : f32 to vector<8x64xf32>
    %306 = arith.maximumf %304, %305 : vector<8x64xf32>
    %307 = vector.broadcast %62 : vector<1x64xf32> to vector<8x64xf32>
    %308 = vector.broadcast %40 : vector<8x1xf32> to vector<8x64xf32>
    %309 = arith.subf %307, %308 : vector<8x64xf32>
    %310 = math.absf %309 : vector<8x64xf32>
    %cst_63 = arith.constant 1.000000e+00 : f32
    %311 = vector.broadcast %cst_63 : f32 to vector<8x64xf32>
    %312 = arith.subf %311, %310 : vector<8x64xf32>
    %cst_64 = arith.constant 0.000000e+00 : f32
    %313 = vector.broadcast %cst_64 : f32 to vector<8x64xf32>
    %314 = arith.maximumf %312, %313 : vector<8x64xf32>
    %315 = arith.mulf %306, %314 : vector<8x64xf32>
    %316 = vector.broadcast %41 : vector<8x1xf32> to vector<8x64xf32>
    %317 = arith.mulf %315, %316 : vector<8x64xf32>
    %318 = arith.addf %298, %317 : vector<8x64xf32>
    %319 = arith.truncf %318 : vector<8x64xf32> to vector<8x64xbf16>
    %320 = vector.extract_strided_slice %67 {offsets = [0, 16], sizes = [64, 8], strides = [1, 1]} : vector<64x32xbf16> to vector<64x8xbf16>
    %cst_65 = arith.constant dense<0.000000e+00> : vector<8x8xf32>
    %321 = tpu.matmul %319, %320, %cst_65 {dimension_numbers = #tpu.dot_dimension_numbers<[1], [0], [0], [1], [0, 0, 1, 1], [], []>} : vector<8x64xbf16>, vector<64x8xbf16>, vector<8x8xf32> -> vector<8x8xf32>
    %322 = arith.addf %4, %321 : vector<8x8xf32>
    %cst_66 = arith.constant 0.000000e+00 : f32
    %323 = vector.broadcast %cst_66 : f32 to vector<8x64xf32>
    %324 = vector.broadcast %65 : vector<1x64xf32> to vector<8x64xf32>
    %325 = vector.broadcast %42 : vector<8x1xf32> to vector<8x64xf32>
    %326 = arith.subf %324, %325 : vector<8x64xf32>
    %327 = math.absf %326 : vector<8x64xf32>
    %cst_67 = arith.constant 1.000000e+00 : f32
    %328 = vector.broadcast %cst_67 : f32 to vector<8x64xf32>
    %329 = arith.subf %328, %327 : vector<8x64xf32>
    %cst_68 = arith.constant 0.000000e+00 : f32
    %330 = vector.broadcast %cst_68 : f32 to vector<8x64xf32>
    %331 = arith.maximumf %329, %330 : vector<8x64xf32>
    %332 = vector.broadcast %62 : vector<1x64xf32> to vector<8x64xf32>
    %333 = vector.broadcast %43 : vector<8x1xf32> to vector<8x64xf32>
    %334 = arith.subf %332, %333 : vector<8x64xf32>
    %335 = math.absf %334 : vector<8x64xf32>
    %cst_69 = arith.constant 1.000000e+00 : f32
    %336 = vector.broadcast %cst_69 : f32 to vector<8x64xf32>
    %337 = arith.subf %336, %335 : vector<8x64xf32>
    %cst_70 = arith.constant 0.000000e+00 : f32
    %338 = vector.broadcast %cst_70 : f32 to vector<8x64xf32>
    %339 = arith.maximumf %337, %338 : vector<8x64xf32>
    %340 = arith.mulf %331, %339 : vector<8x64xf32>
    %341 = vector.broadcast %44 : vector<8x1xf32> to vector<8x64xf32>
    %342 = arith.mulf %340, %341 : vector<8x64xf32>
    %343 = arith.addf %323, %342 : vector<8x64xf32>
    %344 = vector.broadcast %65 : vector<1x64xf32> to vector<8x64xf32>
    %345 = vector.broadcast %45 : vector<8x1xf32> to vector<8x64xf32>
    %346 = arith.subf %344, %345 : vector<8x64xf32>
    %347 = math.absf %346 : vector<8x64xf32>
    %cst_71 = arith.constant 1.000000e+00 : f32
    %348 = vector.broadcast %cst_71 : f32 to vector<8x64xf32>
    %349 = arith.subf %348, %347 : vector<8x64xf32>
    %cst_72 = arith.constant 0.000000e+00 : f32
    %350 = vector.broadcast %cst_72 : f32 to vector<8x64xf32>
    %351 = arith.maximumf %349, %350 : vector<8x64xf32>
    %352 = vector.broadcast %62 : vector<1x64xf32> to vector<8x64xf32>
    %353 = vector.broadcast %46 : vector<8x1xf32> to vector<8x64xf32>
    %354 = arith.subf %352, %353 : vector<8x64xf32>
    %355 = math.absf %354 : vector<8x64xf32>
    %cst_73 = arith.constant 1.000000e+00 : f32
    %356 = vector.broadcast %cst_73 : f32 to vector<8x64xf32>
    %357 = arith.subf %356, %355 : vector<8x64xf32>
    %cst_74 = arith.constant 0.000000e+00 : f32
    %358 = vector.broadcast %cst_74 : f32 to vector<8x64xf32>
    %359 = arith.maximumf %357, %358 : vector<8x64xf32>
    %360 = arith.mulf %351, %359 : vector<8x64xf32>
    %361 = vector.broadcast %47 : vector<8x1xf32> to vector<8x64xf32>
    %362 = arith.mulf %360, %361 : vector<8x64xf32>
    %363 = arith.addf %343, %362 : vector<8x64xf32>
    %364 = vector.broadcast %65 : vector<1x64xf32> to vector<8x64xf32>
    %365 = vector.broadcast %48 : vector<8x1xf32> to vector<8x64xf32>
    %366 = arith.subf %364, %365 : vector<8x64xf32>
    %367 = math.absf %366 : vector<8x64xf32>
    %cst_75 = arith.constant 1.000000e+00 : f32
    %368 = vector.broadcast %cst_75 : f32 to vector<8x64xf32>
    %369 = arith.subf %368, %367 : vector<8x64xf32>
    %cst_76 = arith.constant 0.000000e+00 : f32
    %370 = vector.broadcast %cst_76 : f32 to vector<8x64xf32>
    %371 = arith.maximumf %369, %370 : vector<8x64xf32>
    %372 = vector.broadcast %62 : vector<1x64xf32> to vector<8x64xf32>
    %373 = vector.broadcast %49 : vector<8x1xf32> to vector<8x64xf32>
    %374 = arith.subf %372, %373 : vector<8x64xf32>
    %375 = math.absf %374 : vector<8x64xf32>
    %cst_77 = arith.constant 1.000000e+00 : f32
    %376 = vector.broadcast %cst_77 : f32 to vector<8x64xf32>
    %377 = arith.subf %376, %375 : vector<8x64xf32>
    %cst_78 = arith.constant 0.000000e+00 : f32
    %378 = vector.broadcast %cst_78 : f32 to vector<8x64xf32>
    %379 = arith.maximumf %377, %378 : vector<8x64xf32>
    %380 = arith.mulf %371, %379 : vector<8x64xf32>
    %381 = vector.broadcast %50 : vector<8x1xf32> to vector<8x64xf32>
    %382 = arith.mulf %380, %381 : vector<8x64xf32>
    %383 = arith.addf %363, %382 : vector<8x64xf32>
    %384 = vector.broadcast %65 : vector<1x64xf32> to vector<8x64xf32>
    %385 = vector.broadcast %51 : vector<8x1xf32> to vector<8x64xf32>
    %386 = arith.subf %384, %385 : vector<8x64xf32>
    %387 = math.absf %386 : vector<8x64xf32>
    %cst_79 = arith.constant 1.000000e+00 : f32
    %388 = vector.broadcast %cst_79 : f32 to vector<8x64xf32>
    %389 = arith.subf %388, %387 : vector<8x64xf32>
    %cst_80 = arith.constant 0.000000e+00 : f32
    %390 = vector.broadcast %cst_80 : f32 to vector<8x64xf32>
    %391 = arith.maximumf %389, %390 : vector<8x64xf32>
    %392 = vector.broadcast %62 : vector<1x64xf32> to vector<8x64xf32>
    %393 = vector.broadcast %52 : vector<8x1xf32> to vector<8x64xf32>
    %394 = arith.subf %392, %393 : vector<8x64xf32>
    %395 = math.absf %394 : vector<8x64xf32>
    %cst_81 = arith.constant 1.000000e+00 : f32
    %396 = vector.broadcast %cst_81 : f32 to vector<8x64xf32>
    %397 = arith.subf %396, %395 : vector<8x64xf32>
    %cst_82 = arith.constant 0.000000e+00 : f32
    %398 = vector.broadcast %cst_82 : f32 to vector<8x64xf32>
    %399 = arith.maximumf %397, %398 : vector<8x64xf32>
    %400 = arith.mulf %391, %399 : vector<8x64xf32>
    %401 = vector.broadcast %53 : vector<8x1xf32> to vector<8x64xf32>
    %402 = arith.mulf %400, %401 : vector<8x64xf32>
    %403 = arith.addf %383, %402 : vector<8x64xf32>
    %404 = arith.truncf %403 : vector<8x64xf32> to vector<8x64xbf16>
    %405 = vector.extract_strided_slice %67 {offsets = [0, 24], sizes = [64, 8], strides = [1, 1]} : vector<64x32xbf16> to vector<64x8xbf16>
    %cst_83 = arith.constant dense<0.000000e+00> : vector<8x8xf32>
    %406 = tpu.matmul %404, %405, %cst_83 {dimension_numbers = #tpu.dot_dimension_numbers<[1], [0], [0], [1], [0, 0, 1, 1], [], []>} : vector<8x64xbf16>, vector<64x8xbf16>, vector<8x8xf32> -> vector<8x8xf32>
    %407 = arith.addf %5, %406 : vector<8x8xf32>
    %408 = vector.extract_strided_slice %1 {offsets = [0, 12], sizes = [8, 1], strides = [1, 1]} : vector<8x96xf32> to vector<8x1xf32>
    %409 = vector.extract_strided_slice %1 {offsets = [0, 13], sizes = [8, 1], strides = [1, 1]} : vector<8x96xf32> to vector<8x1xf32>
    %410 = vector.extract_strided_slice %1 {offsets = [0, 14], sizes = [8, 1], strides = [1, 1]} : vector<8x96xf32> to vector<8x1xf32>
    %411 = vector.extract_strided_slice %1 {offsets = [0, 15], sizes = [8, 1], strides = [1, 1]} : vector<8x96xf32> to vector<8x1xf32>
    %412 = vector.extract_strided_slice %1 {offsets = [0, 16], sizes = [8, 1], strides = [1, 1]} : vector<8x96xf32> to vector<8x1xf32>
    %413 = vector.extract_strided_slice %1 {offsets = [0, 17], sizes = [8, 1], strides = [1, 1]} : vector<8x96xf32> to vector<8x1xf32>
    %414 = vector.extract_strided_slice %1 {offsets = [0, 18], sizes = [8, 1], strides = [1, 1]} : vector<8x96xf32> to vector<8x1xf32>
    %415 = vector.extract_strided_slice %1 {offsets = [0, 19], sizes = [8, 1], strides = [1, 1]} : vector<8x96xf32> to vector<8x1xf32>
    %416 = vector.extract_strided_slice %1 {offsets = [0, 20], sizes = [8, 1], strides = [1, 1]} : vector<8x96xf32> to vector<8x1xf32>
    %417 = vector.extract_strided_slice %1 {offsets = [0, 21], sizes = [8, 1], strides = [1, 1]} : vector<8x96xf32> to vector<8x1xf32>
    %418 = vector.extract_strided_slice %1 {offsets = [0, 22], sizes = [8, 1], strides = [1, 1]} : vector<8x96xf32> to vector<8x1xf32>
    %419 = vector.extract_strided_slice %1 {offsets = [0, 23], sizes = [8, 1], strides = [1, 1]} : vector<8x96xf32> to vector<8x1xf32>
    %420 = vector.extract_strided_slice %1 {offsets = [0, 36], sizes = [8, 1], strides = [1, 1]} : vector<8x96xf32> to vector<8x1xf32>
    %421 = vector.extract_strided_slice %1 {offsets = [0, 37], sizes = [8, 1], strides = [1, 1]} : vector<8x96xf32> to vector<8x1xf32>
    %422 = vector.extract_strided_slice %1 {offsets = [0, 38], sizes = [8, 1], strides = [1, 1]} : vector<8x96xf32> to vector<8x1xf32>
    %423 = vector.extract_strided_slice %1 {offsets = [0, 39], sizes = [8, 1], strides = [1, 1]} : vector<8x96xf32> to vector<8x1xf32>
    %424 = vector.extract_strided_slice %1 {offsets = [0, 40], sizes = [8, 1], strides = [1, 1]} : vector<8x96xf32> to vector<8x1xf32>
    %425 = vector.extract_strided_slice %1 {offsets = [0, 41], sizes = [8, 1], strides = [1, 1]} : vector<8x96xf32> to vector<8x1xf32>
    %426 = vector.extract_strided_slice %1 {offsets = [0, 42], sizes = [8, 1], strides = [1, 1]} : vector<8x96xf32> to vector<8x1xf32>
    %427 = vector.extract_strided_slice %1 {offsets = [0, 43], sizes = [8, 1], strides = [1, 1]} : vector<8x96xf32> to vector<8x1xf32>
    %428 = vector.extract_strided_slice %1 {offsets = [0, 44], sizes = [8, 1], strides = [1, 1]} : vector<8x96xf32> to vector<8x1xf32>
    %429 = vector.extract_strided_slice %1 {offsets = [0, 45], sizes = [8, 1], strides = [1, 1]} : vector<8x96xf32> to vector<8x1xf32>
    %430 = vector.extract_strided_slice %1 {offsets = [0, 46], sizes = [8, 1], strides = [1, 1]} : vector<8x96xf32> to vector<8x1xf32>
    %431 = vector.extract_strided_slice %1 {offsets = [0, 47], sizes = [8, 1], strides = [1, 1]} : vector<8x96xf32> to vector<8x1xf32>
    %432 = vector.extract_strided_slice %1 {offsets = [0, 60], sizes = [8, 1], strides = [1, 1]} : vector<8x96xf32> to vector<8x1xf32>
    %433 = vector.extract_strided_slice %1 {offsets = [0, 61], sizes = [8, 1], strides = [1, 1]} : vector<8x96xf32> to vector<8x1xf32>
    %434 = vector.extract_strided_slice %1 {offsets = [0, 62], sizes = [8, 1], strides = [1, 1]} : vector<8x96xf32> to vector<8x1xf32>
    %435 = vector.extract_strided_slice %1 {offsets = [0, 63], sizes = [8, 1], strides = [1, 1]} : vector<8x96xf32> to vector<8x1xf32>
    %436 = vector.extract_strided_slice %1 {offsets = [0, 64], sizes = [8, 1], strides = [1, 1]} : vector<8x96xf32> to vector<8x1xf32>
    %437 = vector.extract_strided_slice %1 {offsets = [0, 65], sizes = [8, 1], strides = [1, 1]} : vector<8x96xf32> to vector<8x1xf32>
    %438 = vector.extract_strided_slice %1 {offsets = [0, 66], sizes = [8, 1], strides = [1, 1]} : vector<8x96xf32> to vector<8x1xf32>
    %439 = vector.extract_strided_slice %1 {offsets = [0, 67], sizes = [8, 1], strides = [1, 1]} : vector<8x96xf32> to vector<8x1xf32>
    %440 = vector.extract_strided_slice %1 {offsets = [0, 68], sizes = [8, 1], strides = [1, 1]} : vector<8x96xf32> to vector<8x1xf32>
    %441 = vector.extract_strided_slice %1 {offsets = [0, 69], sizes = [8, 1], strides = [1, 1]} : vector<8x96xf32> to vector<8x1xf32>
    %442 = vector.extract_strided_slice %1 {offsets = [0, 70], sizes = [8, 1], strides = [1, 1]} : vector<8x96xf32> to vector<8x1xf32>
    %443 = vector.extract_strided_slice %1 {offsets = [0, 71], sizes = [8, 1], strides = [1, 1]} : vector<8x96xf32> to vector<8x1xf32>
    %444 = vector.extract_strided_slice %1 {offsets = [0, 84], sizes = [8, 1], strides = [1, 1]} : vector<8x96xf32> to vector<8x1xf32>
    %445 = vector.extract_strided_slice %1 {offsets = [0, 85], sizes = [8, 1], strides = [1, 1]} : vector<8x96xf32> to vector<8x1xf32>
    %446 = vector.extract_strided_slice %1 {offsets = [0, 86], sizes = [8, 1], strides = [1, 1]} : vector<8x96xf32> to vector<8x1xf32>
    %447 = vector.extract_strided_slice %1 {offsets = [0, 87], sizes = [8, 1], strides = [1, 1]} : vector<8x96xf32> to vector<8x1xf32>
    %448 = vector.extract_strided_slice %1 {offsets = [0, 88], sizes = [8, 1], strides = [1, 1]} : vector<8x96xf32> to vector<8x1xf32>
    %449 = vector.extract_strided_slice %1 {offsets = [0, 89], sizes = [8, 1], strides = [1, 1]} : vector<8x96xf32> to vector<8x1xf32>
    %450 = vector.extract_strided_slice %1 {offsets = [0, 90], sizes = [8, 1], strides = [1, 1]} : vector<8x96xf32> to vector<8x1xf32>
    %451 = vector.extract_strided_slice %1 {offsets = [0, 91], sizes = [8, 1], strides = [1, 1]} : vector<8x96xf32> to vector<8x1xf32>
    %452 = vector.extract_strided_slice %1 {offsets = [0, 92], sizes = [8, 1], strides = [1, 1]} : vector<8x96xf32> to vector<8x1xf32>
    %453 = vector.extract_strided_slice %1 {offsets = [0, 93], sizes = [8, 1], strides = [1, 1]} : vector<8x96xf32> to vector<8x1xf32>
    %454 = vector.extract_strided_slice %1 {offsets = [0, 94], sizes = [8, 1], strides = [1, 1]} : vector<8x96xf32> to vector<8x1xf32>
    %455 = vector.extract_strided_slice %1 {offsets = [0, 95], sizes = [8, 1], strides = [1, 1]} : vector<8x96xf32> to vector<8x1xf32>
    %456 = tpu.iota {dimensions = array<i32: 1>} : vector<1x16xi32>
    %457 = arith.sitofp %456 : vector<1x16xi32> to vector<1x16xf32>
    %cst_84 = arith.constant 0.000000e+00 : f32
    %458 = vector.broadcast %cst_84 : f32 to vector<1x16xf32>
    %459 = arith.addf %457, %458 : vector<1x16xf32>
    %cst_85 = arith.constant 5.000000e-01 : f32
    %460 = vector.broadcast %cst_85 : f32 to vector<1x16xf32>
    %461 = arith.addf %459, %460 : vector<1x16xf32>
    %cst_86 = arith.constant 4.000000e+00 : f32
    %462 = vector.broadcast %cst_86 : f32 to vector<1x16xf32>
    %463 = arith.divf %461, %462 : vector<1x16xf32>
    %464 = math.floor %463 : vector<1x16xf32>
    %cst_87 = arith.constant 4.000000e+00 : f32
    %465 = vector.broadcast %cst_87 : f32 to vector<1x16xf32>
    %466 = arith.mulf %464, %465 : vector<1x16xf32>
    %467 = arith.subf %459, %466 : vector<1x16xf32>
    %c0_88 = arith.constant 0 : index
    %c64 = arith.constant 64 : index
    %c0_89 = arith.constant 0 : index
    %468 = vector.load %arg2[%c0_88, %c64, %c0_89] : memref<1x80x32xbf16, #tpu.memory_space<vmem>>, vector<1x16x32xbf16>
    %469 = vector.shape_cast %468 : vector<1x16x32xbf16> to vector<16x32xbf16>
    %cst_90 = arith.constant 0.000000e+00 : f32
    %470 = vector.broadcast %cst_90 : f32 to vector<8x16xf32>
    %471 = vector.broadcast %467 : vector<1x16xf32> to vector<8x16xf32>
    %472 = vector.broadcast %408 : vector<8x1xf32> to vector<8x16xf32>
    %473 = arith.subf %471, %472 : vector<8x16xf32>
    %474 = math.absf %473 : vector<8x16xf32>
    %cst_91 = arith.constant 1.000000e+00 : f32
    %475 = vector.broadcast %cst_91 : f32 to vector<8x16xf32>
    %476 = arith.subf %475, %474 : vector<8x16xf32>
    %cst_92 = arith.constant 0.000000e+00 : f32
    %477 = vector.broadcast %cst_92 : f32 to vector<8x16xf32>
    %478 = arith.maximumf %476, %477 : vector<8x16xf32>
    %479 = vector.broadcast %464 : vector<1x16xf32> to vector<8x16xf32>
    %480 = vector.broadcast %409 : vector<8x1xf32> to vector<8x16xf32>
    %481 = arith.subf %479, %480 : vector<8x16xf32>
    %482 = math.absf %481 : vector<8x16xf32>
    %cst_93 = arith.constant 1.000000e+00 : f32
    %483 = vector.broadcast %cst_93 : f32 to vector<8x16xf32>
    %484 = arith.subf %483, %482 : vector<8x16xf32>
    %cst_94 = arith.constant 0.000000e+00 : f32
    %485 = vector.broadcast %cst_94 : f32 to vector<8x16xf32>
    %486 = arith.maximumf %484, %485 : vector<8x16xf32>
    %487 = arith.mulf %478, %486 : vector<8x16xf32>
    %488 = vector.broadcast %410 : vector<8x1xf32> to vector<8x16xf32>
    %489 = arith.mulf %487, %488 : vector<8x16xf32>
    %490 = arith.addf %470, %489 : vector<8x16xf32>
    %491 = vector.broadcast %467 : vector<1x16xf32> to vector<8x16xf32>
    %492 = vector.broadcast %411 : vector<8x1xf32> to vector<8x16xf32>
    %493 = arith.subf %491, %492 : vector<8x16xf32>
    %494 = math.absf %493 : vector<8x16xf32>
    %cst_95 = arith.constant 1.000000e+00 : f32
    %495 = vector.broadcast %cst_95 : f32 to vector<8x16xf32>
    %496 = arith.subf %495, %494 : vector<8x16xf32>
    %cst_96 = arith.constant 0.000000e+00 : f32
    %497 = vector.broadcast %cst_96 : f32 to vector<8x16xf32>
    %498 = arith.maximumf %496, %497 : vector<8x16xf32>
    %499 = vector.broadcast %464 : vector<1x16xf32> to vector<8x16xf32>
    %500 = vector.broadcast %412 : vector<8x1xf32> to vector<8x16xf32>
    %501 = arith.subf %499, %500 : vector<8x16xf32>
    %502 = math.absf %501 : vector<8x16xf32>
    %cst_97 = arith.constant 1.000000e+00 : f32
    %503 = vector.broadcast %cst_97 : f32 to vector<8x16xf32>
    %504 = arith.subf %503, %502 : vector<8x16xf32>
    %cst_98 = arith.constant 0.000000e+00 : f32
    %505 = vector.broadcast %cst_98 : f32 to vector<8x16xf32>
    %506 = arith.maximumf %504, %505 : vector<8x16xf32>
    %507 = arith.mulf %498, %506 : vector<8x16xf32>
    %508 = vector.broadcast %413 : vector<8x1xf32> to vector<8x16xf32>
    %509 = arith.mulf %507, %508 : vector<8x16xf32>
    %510 = arith.addf %490, %509 : vector<8x16xf32>
    %511 = vector.broadcast %467 : vector<1x16xf32> to vector<8x16xf32>
    %512 = vector.broadcast %414 : vector<8x1xf32> to vector<8x16xf32>
    %513 = arith.subf %511, %512 : vector<8x16xf32>
    %514 = math.absf %513 : vector<8x16xf32>
    %cst_99 = arith.constant 1.000000e+00 : f32
    %515 = vector.broadcast %cst_99 : f32 to vector<8x16xf32>
    %516 = arith.subf %515, %514 : vector<8x16xf32>
    %cst_100 = arith.constant 0.000000e+00 : f32
    %517 = vector.broadcast %cst_100 : f32 to vector<8x16xf32>
    %518 = arith.maximumf %516, %517 : vector<8x16xf32>
    %519 = vector.broadcast %464 : vector<1x16xf32> to vector<8x16xf32>
    %520 = vector.broadcast %415 : vector<8x1xf32> to vector<8x16xf32>
    %521 = arith.subf %519, %520 : vector<8x16xf32>
    %522 = math.absf %521 : vector<8x16xf32>
    %cst_101 = arith.constant 1.000000e+00 : f32
    %523 = vector.broadcast %cst_101 : f32 to vector<8x16xf32>
    %524 = arith.subf %523, %522 : vector<8x16xf32>
    %cst_102 = arith.constant 0.000000e+00 : f32
    %525 = vector.broadcast %cst_102 : f32 to vector<8x16xf32>
    %526 = arith.maximumf %524, %525 : vector<8x16xf32>
    %527 = arith.mulf %518, %526 : vector<8x16xf32>
    %528 = vector.broadcast %416 : vector<8x1xf32> to vector<8x16xf32>
    %529 = arith.mulf %527, %528 : vector<8x16xf32>
    %530 = arith.addf %510, %529 : vector<8x16xf32>
    %531 = vector.broadcast %467 : vector<1x16xf32> to vector<8x16xf32>
    %532 = vector.broadcast %417 : vector<8x1xf32> to vector<8x16xf32>
    %533 = arith.subf %531, %532 : vector<8x16xf32>
    %534 = math.absf %533 : vector<8x16xf32>
    %cst_103 = arith.constant 1.000000e+00 : f32
    %535 = vector.broadcast %cst_103 : f32 to vector<8x16xf32>
    %536 = arith.subf %535, %534 : vector<8x16xf32>
    %cst_104 = arith.constant 0.000000e+00 : f32
    %537 = vector.broadcast %cst_104 : f32 to vector<8x16xf32>
    %538 = arith.maximumf %536, %537 : vector<8x16xf32>
    %539 = vector.broadcast %464 : vector<1x16xf32> to vector<8x16xf32>
    %540 = vector.broadcast %418 : vector<8x1xf32> to vector<8x16xf32>
    %541 = arith.subf %539, %540 : vector<8x16xf32>
    %542 = math.absf %541 : vector<8x16xf32>
    %cst_105 = arith.constant 1.000000e+00 : f32
    %543 = vector.broadcast %cst_105 : f32 to vector<8x16xf32>
    %544 = arith.subf %543, %542 : vector<8x16xf32>
    %cst_106 = arith.constant 0.000000e+00 : f32
    %545 = vector.broadcast %cst_106 : f32 to vector<8x16xf32>
    %546 = arith.maximumf %544, %545 : vector<8x16xf32>
    %547 = arith.mulf %538, %546 : vector<8x16xf32>
    %548 = vector.broadcast %419 : vector<8x1xf32> to vector<8x16xf32>
    %549 = arith.mulf %547, %548 : vector<8x16xf32>
    %550 = arith.addf %530, %549 : vector<8x16xf32>
    %551 = arith.truncf %550 : vector<8x16xf32> to vector<8x16xbf16>
    %552 = vector.extract_strided_slice %469 {offsets = [0, 0], sizes = [16, 8], strides = [1, 1]} : vector<16x32xbf16> to vector<16x8xbf16>
    %cst_107 = arith.constant dense<0.000000e+00> : vector<8x8xf32>
    %553 = tpu.matmul %551, %552, %cst_107 {dimension_numbers = #tpu.dot_dimension_numbers<[1], [0], [0], [1], [0, 0, 1, 1], [], []>} : vector<8x16xbf16>, vector<16x8xbf16>, vector<8x8xf32> -> vector<8x8xf32>
    %554 = arith.addf %152, %553 : vector<8x8xf32>
    %cst_108 = arith.constant 0.000000e+00 : f32
    %555 = vector.broadcast %cst_108 : f32 to vector<8x16xf32>
    %556 = vector.broadcast %467 : vector<1x16xf32> to vector<8x16xf32>
    %557 = vector.broadcast %420 : vector<8x1xf32> to vector<8x16xf32>
    %558 = arith.subf %556, %557 : vector<8x16xf32>
    %559 = math.absf %558 : vector<8x16xf32>
    %cst_109 = arith.constant 1.000000e+00 : f32
    %560 = vector.broadcast %cst_109 : f32 to vector<8x16xf32>
    %561 = arith.subf %560, %559 : vector<8x16xf32>
    %cst_110 = arith.constant 0.000000e+00 : f32
    %562 = vector.broadcast %cst_110 : f32 to vector<8x16xf32>
    %563 = arith.maximumf %561, %562 : vector<8x16xf32>
    %564 = vector.broadcast %464 : vector<1x16xf32> to vector<8x16xf32>
    %565 = vector.broadcast %421 : vector<8x1xf32> to vector<8x16xf32>
    %566 = arith.subf %564, %565 : vector<8x16xf32>
    %567 = math.absf %566 : vector<8x16xf32>
    %cst_111 = arith.constant 1.000000e+00 : f32
    %568 = vector.broadcast %cst_111 : f32 to vector<8x16xf32>
    %569 = arith.subf %568, %567 : vector<8x16xf32>
    %cst_112 = arith.constant 0.000000e+00 : f32
    %570 = vector.broadcast %cst_112 : f32 to vector<8x16xf32>
    %571 = arith.maximumf %569, %570 : vector<8x16xf32>
    %572 = arith.mulf %563, %571 : vector<8x16xf32>
    %573 = vector.broadcast %422 : vector<8x1xf32> to vector<8x16xf32>
    %574 = arith.mulf %572, %573 : vector<8x16xf32>
    %575 = arith.addf %555, %574 : vector<8x16xf32>
    %576 = vector.broadcast %467 : vector<1x16xf32> to vector<8x16xf32>
    %577 = vector.broadcast %423 : vector<8x1xf32> to vector<8x16xf32>
    %578 = arith.subf %576, %577 : vector<8x16xf32>
    %579 = math.absf %578 : vector<8x16xf32>
    %cst_113 = arith.constant 1.000000e+00 : f32
    %580 = vector.broadcast %cst_113 : f32 to vector<8x16xf32>
    %581 = arith.subf %580, %579 : vector<8x16xf32>
    %cst_114 = arith.constant 0.000000e+00 : f32
    %582 = vector.broadcast %cst_114 : f32 to vector<8x16xf32>
    %583 = arith.maximumf %581, %582 : vector<8x16xf32>
    %584 = vector.broadcast %464 : vector<1x16xf32> to vector<8x16xf32>
    %585 = vector.broadcast %424 : vector<8x1xf32> to vector<8x16xf32>
    %586 = arith.subf %584, %585 : vector<8x16xf32>
    %587 = math.absf %586 : vector<8x16xf32>
    %cst_115 = arith.constant 1.000000e+00 : f32
    %588 = vector.broadcast %cst_115 : f32 to vector<8x16xf32>
    %589 = arith.subf %588, %587 : vector<8x16xf32>
    %cst_116 = arith.constant 0.000000e+00 : f32
    %590 = vector.broadcast %cst_116 : f32 to vector<8x16xf32>
    %591 = arith.maximumf %589, %590 : vector<8x16xf32>
    %592 = arith.mulf %583, %591 : vector<8x16xf32>
    %593 = vector.broadcast %425 : vector<8x1xf32> to vector<8x16xf32>
    %594 = arith.mulf %592, %593 : vector<8x16xf32>
    %595 = arith.addf %575, %594 : vector<8x16xf32>
    %596 = vector.broadcast %467 : vector<1x16xf32> to vector<8x16xf32>
    %597 = vector.broadcast %426 : vector<8x1xf32> to vector<8x16xf32>
    %598 = arith.subf %596, %597 : vector<8x16xf32>
    %599 = math.absf %598 : vector<8x16xf32>
    %cst_117 = arith.constant 1.000000e+00 : f32
    %600 = vector.broadcast %cst_117 : f32 to vector<8x16xf32>
    %601 = arith.subf %600, %599 : vector<8x16xf32>
    %cst_118 = arith.constant 0.000000e+00 : f32
    %602 = vector.broadcast %cst_118 : f32 to vector<8x16xf32>
    %603 = arith.maximumf %601, %602 : vector<8x16xf32>
    %604 = vector.broadcast %464 : vector<1x16xf32> to vector<8x16xf32>
    %605 = vector.broadcast %427 : vector<8x1xf32> to vector<8x16xf32>
    %606 = arith.subf %604, %605 : vector<8x16xf32>
    %607 = math.absf %606 : vector<8x16xf32>
    %cst_119 = arith.constant 1.000000e+00 : f32
    %608 = vector.broadcast %cst_119 : f32 to vector<8x16xf32>
    %609 = arith.subf %608, %607 : vector<8x16xf32>
    %cst_120 = arith.constant 0.000000e+00 : f32
    %610 = vector.broadcast %cst_120 : f32 to vector<8x16xf32>
    %611 = arith.maximumf %609, %610 : vector<8x16xf32>
    %612 = arith.mulf %603, %611 : vector<8x16xf32>
    %613 = vector.broadcast %428 : vector<8x1xf32> to vector<8x16xf32>
    %614 = arith.mulf %612, %613 : vector<8x16xf32>
    %615 = arith.addf %595, %614 : vector<8x16xf32>
    %616 = vector.broadcast %467 : vector<1x16xf32> to vector<8x16xf32>
    %617 = vector.broadcast %429 : vector<8x1xf32> to vector<8x16xf32>
    %618 = arith.subf %616, %617 : vector<8x16xf32>
    %619 = math.absf %618 : vector<8x16xf32>
    %cst_121 = arith.constant 1.000000e+00 : f32
    %620 = vector.broadcast %cst_121 : f32 to vector<8x16xf32>
    %621 = arith.subf %620, %619 : vector<8x16xf32>
    %cst_122 = arith.constant 0.000000e+00 : f32
    %622 = vector.broadcast %cst_122 : f32 to vector<8x16xf32>
    %623 = arith.maximumf %621, %622 : vector<8x16xf32>
    %624 = vector.broadcast %464 : vector<1x16xf32> to vector<8x16xf32>
    %625 = vector.broadcast %430 : vector<8x1xf32> to vector<8x16xf32>
    %626 = arith.subf %624, %625 : vector<8x16xf32>
    %627 = math.absf %626 : vector<8x16xf32>
    %cst_123 = arith.constant 1.000000e+00 : f32
    %628 = vector.broadcast %cst_123 : f32 to vector<8x16xf32>
    %629 = arith.subf %628, %627 : vector<8x16xf32>
    %cst_124 = arith.constant 0.000000e+00 : f32
    %630 = vector.broadcast %cst_124 : f32 to vector<8x16xf32>
    %631 = arith.maximumf %629, %630 : vector<8x16xf32>
    %632 = arith.mulf %623, %631 : vector<8x16xf32>
    %633 = vector.broadcast %431 : vector<8x1xf32> to vector<8x16xf32>
    %634 = arith.mulf %632, %633 : vector<8x16xf32>
    %635 = arith.addf %615, %634 : vector<8x16xf32>
    %636 = arith.truncf %635 : vector<8x16xf32> to vector<8x16xbf16>
    %637 = vector.extract_strided_slice %469 {offsets = [0, 8], sizes = [16, 8], strides = [1, 1]} : vector<16x32xbf16> to vector<16x8xbf16>
    %cst_125 = arith.constant dense<0.000000e+00> : vector<8x8xf32>
    %638 = tpu.matmul %636, %637, %cst_125 {dimension_numbers = #tpu.dot_dimension_numbers<[1], [0], [0], [1], [0, 0, 1, 1], [], []>} : vector<8x16xbf16>, vector<16x8xbf16>, vector<8x8xf32> -> vector<8x8xf32>
    %639 = arith.addf %237, %638 : vector<8x8xf32>
    %cst_126 = arith.constant 0.000000e+00 : f32
    %640 = vector.broadcast %cst_126 : f32 to vector<8x16xf32>
    %641 = vector.broadcast %467 : vector<1x16xf32> to vector<8x16xf32>
    %642 = vector.broadcast %432 : vector<8x1xf32> to vector<8x16xf32>
    %643 = arith.subf %641, %642 : vector<8x16xf32>
    %644 = math.absf %643 : vector<8x16xf32>
    %cst_127 = arith.constant 1.000000e+00 : f32
    %645 = vector.broadcast %cst_127 : f32 to vector<8x16xf32>
    %646 = arith.subf %645, %644 : vector<8x16xf32>
    %cst_128 = arith.constant 0.000000e+00 : f32
    %647 = vector.broadcast %cst_128 : f32 to vector<8x16xf32>
    %648 = arith.maximumf %646, %647 : vector<8x16xf32>
    %649 = vector.broadcast %464 : vector<1x16xf32> to vector<8x16xf32>
    %650 = vector.broadcast %433 : vector<8x1xf32> to vector<8x16xf32>
    %651 = arith.subf %649, %650 : vector<8x16xf32>
    %652 = math.absf %651 : vector<8x16xf32>
    %cst_129 = arith.constant 1.000000e+00 : f32
    %653 = vector.broadcast %cst_129 : f32 to vector<8x16xf32>
    %654 = arith.subf %653, %652 : vector<8x16xf32>
    %cst_130 = arith.constant 0.000000e+00 : f32
    %655 = vector.broadcast %cst_130 : f32 to vector<8x16xf32>
    %656 = arith.maximumf %654, %655 : vector<8x16xf32>
    %657 = arith.mulf %648, %656 : vector<8x16xf32>
    %658 = vector.broadcast %434 : vector<8x1xf32> to vector<8x16xf32>
    %659 = arith.mulf %657, %658 : vector<8x16xf32>
    %660 = arith.addf %640, %659 : vector<8x16xf32>
    %661 = vector.broadcast %467 : vector<1x16xf32> to vector<8x16xf32>
    %662 = vector.broadcast %435 : vector<8x1xf32> to vector<8x16xf32>
    %663 = arith.subf %661, %662 : vector<8x16xf32>
    %664 = math.absf %663 : vector<8x16xf32>
    %cst_131 = arith.constant 1.000000e+00 : f32
    %665 = vector.broadcast %cst_131 : f32 to vector<8x16xf32>
    %666 = arith.subf %665, %664 : vector<8x16xf32>
    %cst_132 = arith.constant 0.000000e+00 : f32
    %667 = vector.broadcast %cst_132 : f32 to vector<8x16xf32>
    %668 = arith.maximumf %666, %667 : vector<8x16xf32>
    %669 = vector.broadcast %464 : vector<1x16xf32> to vector<8x16xf32>
    %670 = vector.broadcast %436 : vector<8x1xf32> to vector<8x16xf32>
    %671 = arith.subf %669, %670 : vector<8x16xf32>
    %672 = math.absf %671 : vector<8x16xf32>
    %cst_133 = arith.constant 1.000000e+00 : f32
    %673 = vector.broadcast %cst_133 : f32 to vector<8x16xf32>
    %674 = arith.subf %673, %672 : vector<8x16xf32>
    %cst_134 = arith.constant 0.000000e+00 : f32
    %675 = vector.broadcast %cst_134 : f32 to vector<8x16xf32>
    %676 = arith.maximumf %674, %675 : vector<8x16xf32>
    %677 = arith.mulf %668, %676 : vector<8x16xf32>
    %678 = vector.broadcast %437 : vector<8x1xf32> to vector<8x16xf32>
    %679 = arith.mulf %677, %678 : vector<8x16xf32>
    %680 = arith.addf %660, %679 : vector<8x16xf32>
    %681 = vector.broadcast %467 : vector<1x16xf32> to vector<8x16xf32>
    %682 = vector.broadcast %438 : vector<8x1xf32> to vector<8x16xf32>
    %683 = arith.subf %681, %682 : vector<8x16xf32>
    %684 = math.absf %683 : vector<8x16xf32>
    %cst_135 = arith.constant 1.000000e+00 : f32
    %685 = vector.broadcast %cst_135 : f32 to vector<8x16xf32>
    %686 = arith.subf %685, %684 : vector<8x16xf32>
    %cst_136 = arith.constant 0.000000e+00 : f32
    %687 = vector.broadcast %cst_136 : f32 to vector<8x16xf32>
    %688 = arith.maximumf %686, %687 : vector<8x16xf32>
    %689 = vector.broadcast %464 : vector<1x16xf32> to vector<8x16xf32>
    %690 = vector.broadcast %439 : vector<8x1xf32> to vector<8x16xf32>
    %691 = arith.subf %689, %690 : vector<8x16xf32>
    %692 = math.absf %691 : vector<8x16xf32>
    %cst_137 = arith.constant 1.000000e+00 : f32
    %693 = vector.broadcast %cst_137 : f32 to vector<8x16xf32>
    %694 = arith.subf %693, %692 : vector<8x16xf32>
    %cst_138 = arith.constant 0.000000e+00 : f32
    %695 = vector.broadcast %cst_138 : f32 to vector<8x16xf32>
    %696 = arith.maximumf %694, %695 : vector<8x16xf32>
    %697 = arith.mulf %688, %696 : vector<8x16xf32>
    %698 = vector.broadcast %440 : vector<8x1xf32> to vector<8x16xf32>
    %699 = arith.mulf %697, %698 : vector<8x16xf32>
    %700 = arith.addf %680, %699 : vector<8x16xf32>
    %701 = vector.broadcast %467 : vector<1x16xf32> to vector<8x16xf32>
    %702 = vector.broadcast %441 : vector<8x1xf32> to vector<8x16xf32>
    %703 = arith.subf %701, %702 : vector<8x16xf32>
    %704 = math.absf %703 : vector<8x16xf32>
    %cst_139 = arith.constant 1.000000e+00 : f32
    %705 = vector.broadcast %cst_139 : f32 to vector<8x16xf32>
    %706 = arith.subf %705, %704 : vector<8x16xf32>
    %cst_140 = arith.constant 0.000000e+00 : f32
    %707 = vector.broadcast %cst_140 : f32 to vector<8x16xf32>
    %708 = arith.maximumf %706, %707 : vector<8x16xf32>
    %709 = vector.broadcast %464 : vector<1x16xf32> to vector<8x16xf32>
    %710 = vector.broadcast %442 : vector<8x1xf32> to vector<8x16xf32>
    %711 = arith.subf %709, %710 : vector<8x16xf32>
    %712 = math.absf %711 : vector<8x16xf32>
    %cst_141 = arith.constant 1.000000e+00 : f32
    %713 = vector.broadcast %cst_141 : f32 to vector<8x16xf32>
    %714 = arith.subf %713, %712 : vector<8x16xf32>
    %cst_142 = arith.constant 0.000000e+00 : f32
    %715 = vector.broadcast %cst_142 : f32 to vector<8x16xf32>
    %716 = arith.maximumf %714, %715 : vector<8x16xf32>
    %717 = arith.mulf %708, %716 : vector<8x16xf32>
    %718 = vector.broadcast %443 : vector<8x1xf32> to vector<8x16xf32>
    %719 = arith.mulf %717, %718 : vector<8x16xf32>
    %720 = arith.addf %700, %719 : vector<8x16xf32>
    %721 = arith.truncf %720 : vector<8x16xf32> to vector<8x16xbf16>
    %722 = vector.extract_strided_slice %469 {offsets = [0, 16], sizes = [16, 8], strides = [1, 1]} : vector<16x32xbf16> to vector<16x8xbf16>
    %cst_143 = arith.constant dense<0.000000e+00> : vector<8x8xf32>
    %723 = tpu.matmul %721, %722, %cst_143 {dimension_numbers = #tpu.dot_dimension_numbers<[1], [0], [0], [1], [0, 0, 1, 1], [], []>} : vector<8x16xbf16>, vector<16x8xbf16>, vector<8x8xf32> -> vector<8x8xf32>
    %724 = arith.addf %322, %723 : vector<8x8xf32>
    %cst_144 = arith.constant 0.000000e+00 : f32
    %725 = vector.broadcast %cst_144 : f32 to vector<8x16xf32>
    %726 = vector.broadcast %467 : vector<1x16xf32> to vector<8x16xf32>
    %727 = vector.broadcast %444 : vector<8x1xf32> to vector<8x16xf32>
    %728 = arith.subf %726, %727 : vector<8x16xf32>
    %729 = math.absf %728 : vector<8x16xf32>
    %cst_145 = arith.constant 1.000000e+00 : f32
    %730 = vector.broadcast %cst_145 : f32 to vector<8x16xf32>
    %731 = arith.subf %730, %729 : vector<8x16xf32>
    %cst_146 = arith.constant 0.000000e+00 : f32
    %732 = vector.broadcast %cst_146 : f32 to vector<8x16xf32>
    %733 = arith.maximumf %731, %732 : vector<8x16xf32>
    %734 = vector.broadcast %464 : vector<1x16xf32> to vector<8x16xf32>
    %735 = vector.broadcast %445 : vector<8x1xf32> to vector<8x16xf32>
    %736 = arith.subf %734, %735 : vector<8x16xf32>
    %737 = math.absf %736 : vector<8x16xf32>
    %cst_147 = arith.constant 1.000000e+00 : f32
    %738 = vector.broadcast %cst_147 : f32 to vector<8x16xf32>
    %739 = arith.subf %738, %737 : vector<8x16xf32>
    %cst_148 = arith.constant 0.000000e+00 : f32
    %740 = vector.broadcast %cst_148 : f32 to vector<8x16xf32>
    %741 = arith.maximumf %739, %740 : vector<8x16xf32>
    %742 = arith.mulf %733, %741 : vector<8x16xf32>
    %743 = vector.broadcast %446 : vector<8x1xf32> to vector<8x16xf32>
    %744 = arith.mulf %742, %743 : vector<8x16xf32>
    %745 = arith.addf %725, %744 : vector<8x16xf32>
    %746 = vector.broadcast %467 : vector<1x16xf32> to vector<8x16xf32>
    %747 = vector.broadcast %447 : vector<8x1xf32> to vector<8x16xf32>
    %748 = arith.subf %746, %747 : vector<8x16xf32>
    %749 = math.absf %748 : vector<8x16xf32>
    %cst_149 = arith.constant 1.000000e+00 : f32
    %750 = vector.broadcast %cst_149 : f32 to vector<8x16xf32>
    %751 = arith.subf %750, %749 : vector<8x16xf32>
    %cst_150 = arith.constant 0.000000e+00 : f32
    %752 = vector.broadcast %cst_150 : f32 to vector<8x16xf32>
    %753 = arith.maximumf %751, %752 : vector<8x16xf32>
    %754 = vector.broadcast %464 : vector<1x16xf32> to vector<8x16xf32>
    %755 = vector.broadcast %448 : vector<8x1xf32> to vector<8x16xf32>
    %756 = arith.subf %754, %755 : vector<8x16xf32>
    %757 = math.absf %756 : vector<8x16xf32>
    %cst_151 = arith.constant 1.000000e+00 : f32
    %758 = vector.broadcast %cst_151 : f32 to vector<8x16xf32>
    %759 = arith.subf %758, %757 : vector<8x16xf32>
    %cst_152 = arith.constant 0.000000e+00 : f32
    %760 = vector.broadcast %cst_152 : f32 to vector<8x16xf32>
    %761 = arith.maximumf %759, %760 : vector<8x16xf32>
    %762 = arith.mulf %753, %761 : vector<8x16xf32>
    %763 = vector.broadcast %449 : vector<8x1xf32> to vector<8x16xf32>
    %764 = arith.mulf %762, %763 : vector<8x16xf32>
    %765 = arith.addf %745, %764 : vector<8x16xf32>
    %766 = vector.broadcast %467 : vector<1x16xf32> to vector<8x16xf32>
    %767 = vector.broadcast %450 : vector<8x1xf32> to vector<8x16xf32>
    %768 = arith.subf %766, %767 : vector<8x16xf32>
    %769 = math.absf %768 : vector<8x16xf32>
    %cst_153 = arith.constant 1.000000e+00 : f32
    %770 = vector.broadcast %cst_153 : f32 to vector<8x16xf32>
    %771 = arith.subf %770, %769 : vector<8x16xf32>
    %cst_154 = arith.constant 0.000000e+00 : f32
    %772 = vector.broadcast %cst_154 : f32 to vector<8x16xf32>
    %773 = arith.maximumf %771, %772 : vector<8x16xf32>
    %774 = vector.broadcast %464 : vector<1x16xf32> to vector<8x16xf32>
    %775 = vector.broadcast %451 : vector<8x1xf32> to vector<8x16xf32>
    %776 = arith.subf %774, %775 : vector<8x16xf32>
    %777 = math.absf %776 : vector<8x16xf32>
    %cst_155 = arith.constant 1.000000e+00 : f32
    %778 = vector.broadcast %cst_155 : f32 to vector<8x16xf32>
    %779 = arith.subf %778, %777 : vector<8x16xf32>
    %cst_156 = arith.constant 0.000000e+00 : f32
    %780 = vector.broadcast %cst_156 : f32 to vector<8x16xf32>
    %781 = arith.maximumf %779, %780 : vector<8x16xf32>
    %782 = arith.mulf %773, %781 : vector<8x16xf32>
    %783 = vector.broadcast %452 : vector<8x1xf32> to vector<8x16xf32>
    %784 = arith.mulf %782, %783 : vector<8x16xf32>
    %785 = arith.addf %765, %784 : vector<8x16xf32>
    %786 = vector.broadcast %467 : vector<1x16xf32> to vector<8x16xf32>
    %787 = vector.broadcast %453 : vector<8x1xf32> to vector<8x16xf32>
    %788 = arith.subf %786, %787 : vector<8x16xf32>
    %789 = math.absf %788 : vector<8x16xf32>
    %cst_157 = arith.constant 1.000000e+00 : f32
    %790 = vector.broadcast %cst_157 : f32 to vector<8x16xf32>
    %791 = arith.subf %790, %789 : vector<8x16xf32>
    %cst_158 = arith.constant 0.000000e+00 : f32
    %792 = vector.broadcast %cst_158 : f32 to vector<8x16xf32>
    %793 = arith.maximumf %791, %792 : vector<8x16xf32>
    %794 = vector.broadcast %464 : vector<1x16xf32> to vector<8x16xf32>
    %795 = vector.broadcast %454 : vector<8x1xf32> to vector<8x16xf32>
    %796 = arith.subf %794, %795 : vector<8x16xf32>
    %797 = math.absf %796 : vector<8x16xf32>
    %cst_159 = arith.constant 1.000000e+00 : f32
    %798 = vector.broadcast %cst_159 : f32 to vector<8x16xf32>
    %799 = arith.subf %798, %797 : vector<8x16xf32>
    %cst_160 = arith.constant 0.000000e+00 : f32
    %800 = vector.broadcast %cst_160 : f32 to vector<8x16xf32>
    %801 = arith.maximumf %799, %800 : vector<8x16xf32>
    %802 = arith.mulf %793, %801 : vector<8x16xf32>
    %803 = vector.broadcast %455 : vector<8x1xf32> to vector<8x16xf32>
    %804 = arith.mulf %802, %803 : vector<8x16xf32>
    %805 = arith.addf %785, %804 : vector<8x16xf32>
    %806 = arith.truncf %805 : vector<8x16xf32> to vector<8x16xbf16>
    %807 = vector.extract_strided_slice %469 {offsets = [0, 24], sizes = [16, 8], strides = [1, 1]} : vector<16x32xbf16> to vector<16x8xbf16>
    %cst_161 = arith.constant dense<0.000000e+00> : vector<8x8xf32>
    %808 = tpu.matmul %806, %807, %cst_161 {dimension_numbers = #tpu.dot_dimension_numbers<[1], [0], [0], [1], [0, 0, 1, 1], [], []>} : vector<8x16xbf16>, vector<16x8xbf16>, vector<8x8xf32> -> vector<8x8xf32>
    %809 = arith.addf %407, %808 : vector<8x8xf32>
    %810 = tpu.concatenate %554, %639, %724, %809 in 1 : vector<8x8xf32>, vector<8x8xf32>, vector<8x8xf32>, vector<8x8xf32> -> vector<8x32xf32>
    %c0_162 = arith.constant 0 : index
    %c0_163 = arith.constant 0 : index
    %811 = vector.load %arg4[%c0_162, %c0_163] : memref<32x32xf32, #tpu.memory_space<vmem>>, vector<32x32xf32>
    %cst_164 = arith.constant dense<0.000000e+00> : vector<8x32xf32>
    %812 = tpu.matmul %810, %811, %cst_164 {dimension_numbers = #tpu.dot_dimension_numbers<[1], [0], [0], [1], [0, 0, 1, 1], [], []>} : vector<8x32xf32>, vector<32x32xf32>, vector<8x32xf32> -> vector<8x32xf32>
    %c0_165 = arith.constant 0 : index
    %c0_166 = arith.constant 0 : index
    %813 = vector.load %arg5[%c0_165, %c0_166] : memref<1x32xf32, #tpu.memory_space<vmem>>, vector<1x32xf32>
    %814 = vector.broadcast %813 : vector<1x32xf32> to vector<8x32xf32>
    %815 = arith.addf %812, %814 : vector<8x32xf32>
    %c0_167 = arith.constant 0 : index
    %c0_168 = arith.constant 0 : index
    %c0_169 = arith.constant 0 : index
    %816 = vector.load %arg6[%c0_167, %c0_168, %c0_169] : memref<1x8x32xf32, #tpu.memory_space<vmem>>, vector<1x8x32xf32>
    %817 = vector.shape_cast %816 : vector<1x8x32xf32> to vector<8x32xf32>
    %818 = vector.shape_cast %815 : vector<8x32xf32> to vector<1x8x32xf32>
    tpu.vector_store %arg6[%c0_167, %c0_168, %c0_169], %818 {strides = array<i32>} : memref<1x8x32xf32, #tpu.memory_space<vmem>>, vector<1x8x32xf32>,
    return
  }
  func.func @transform_0(%arg0: i32, %arg1: i32) -> (i32, i32, i32) {
    %c0_i32 = arith.constant 0 : i32
    %c0_i32_0 = arith.constant 0 : i32
    %c0_i32_1 = arith.constant 0 : i32
    return %arg0, %c0_i32, %c0_i32_0 : i32, i32, i32
  }
  func.func @transform_1(%arg0: i32, %arg1: i32) -> (i32, i32, i32) {
    %c0_i32 = arith.constant 0 : i32
    %c0_i32_0 = arith.constant 0 : i32
    return %arg0, %arg1, %c0_i32 : i32, i32, i32
  }
  func.func @transform_2(%arg0: i32, %arg1: i32) -> (i32, i32) {
    %c0_i32 = arith.constant 0 : i32
    %c0_i32_0 = arith.constant 0 : i32
    %c0_i32_1 = arith.constant 0 : i32
    return %c0_i32, %c0_i32_0 : i32, i32
  }
  func.func @transform_3(%arg0: i32, %arg1: i32) -> (i32, i32) {
    %c0_i32 = arith.constant 0 : i32
    %c0_i32_0 = arith.constant 0 : i32
    %c0_i32_1 = arith.constant 0 : i32
    return %c0_i32, %c0_i32_0 : i32, i32
  }
  func.func @transform_4(%arg0: i32, %arg1: i32) -> (i32, i32, i32) {
    %c0_i32 = arith.constant 0 : i32
    %c0_i32_0 = arith.constant 0 : i32
    return %arg0, %arg1, %c0_i32 : i32, i32, i32
  }
}

</mosaic_0001>

<bundles_post_ra>
// kernel: run.3
= control target key start
LH: loop header
LB: loop body
LE: loop exit
PB: predicated region body
PF: predicated region fallthrough
CT: control target
= control target key end

     0   :  { %vm29_vm0 = vcmask 261120   ;;  %vm111_vm1 = vcmask 523264   ;;  %vm146_vm2 = vcmask 654912   ;;  %vm114_vm3 = vcmask 589312   ;;  %s355_s5 = smov 48   ;;  %s356_s6 = smov 40   ;;  %s453_s1 = inlined_call_operand.vmem [shape: f32[32,96], index: 1, kind: input, shape index: {}]   ;;  %s454_s0 = inlined_call_operand.vmem [shape: f32[16,32], index: 0, kind: input, shape index: {}]   ;;  %s455_s2 = inlined_call_operand.vmem [shape: f32[1,96], index: 2, kind: input, shape index: {}]   ;;  %s456_s3 = inlined_call_operand.vmem [shape: f32[16,64], index: 3, kind: output, shape index: {0}]   ;;  %s457_s4 = inlined_call_operand.vmem [shape: f32[16,32], index: 4, kind: output, shape index: {1}]  }
   0x1   :  { %v18_v0 = vld [vmem:[%s453_s1] sm:$0xff]  ;;  %v19_v1 = vld [vmem:[%s453_s1 + $0x8] sm:$0xff]  ;;  %v20_v2 = vld [vmem:[%s453_s1 + $0x10] sm:$0xff]  ;;  %vm177_vm4 = vcmask 720512   ;;  %vm208_vm5 = vcmask 786112   ;;  %vm135_vm6 = vcmask 64512  }
   0x2   :  { %v309_v3 = vpack.c.bf16 %v19_v1, %v18_v0  ;;  %v21_v4 = vld [vmem:[%s453_s1 + $0x18] sm:$0xff]  ;;  %v16_v5 = vld [vmem:[%s454_s0] sm:$0xff]  ;;  %v17_v7 = vld [vmem:[%s454_s0 + $0x8] sm:$0xff]  ;;  %vm273_vm7 = vcmask 130048   ;;  %vm276_vm8 = vcmask 195584  }
   0x3   :  { %v313_v6 = vpack.c.bf16 %v21_v4, %v20_v2  ;;  %306 = vmatprep.mubr.msk.f32.mxu0 %vm29_vm0, %v16_v5  ;;  %v289_v8 = vld [vmem:[%s455_s2] ss:$0 sm:$0xff]  ;;  %s353_s2 = smov 64  }
   0x4   :  { %310 = vmatprep.subr.bf16.mxu0 %v309_v3 }
   0x5   :  { %312 = vmatpush3.bf16.msra.mxu0 %v309_v3 }
   0x6   :  { %314 = vmatprep.subr.bf16.mxu0 %v313_v6 }
   0x9   :  { %316 = vmatpush3.bf16.msra.mxu0 %v313_v6 }
   0xc   :  { %307 = vmatmul.mubr.msk.f32.vlgmr.msra.gmra.mrb[0].mxu0 %vm29_vm0, %v17_v7 }
  0xdf   :  { %v308_v9 = vpop.f32.mrb[0].mxu0 }
  0xe0   :  { %v108_v10 = vadd.f32 %v308_v9, %v289_v8  ;;  %v102_v11 = vpop.f32.mrb[1].mxu0 }
  0xe1   :  { %v103_v12 = vadd.f32 %v289_v8, %v102_v11 }
  0xe2   :  { %113 = vst.msk [vmem:[%s456_s3 + $0x8] sm:$0xff] %vm111_vm1, %v108_v10  ;;  %v150_v13 = vsel %vm146_vm2, %v108_v10, -inf  ;;  %v118_v14 = vsel %vm114_vm3, %v108_v10, -inf  ;;  %v181_v15 = vsel %vm177_vm4, %v108_v10, -inf  ;;  %v212_v19 = vsel %vm208_vm5, %v108_v10, -inf }
  0xe3   :  { %112 = vst.msk [vmem:[%s456_s3] sm:$0xff] %vm111_vm1, %v103_v12  ;;  %151 = vmax.xlane.f32.xlu1 %v150_v13  ;;  %119 = vmax.xlane.f32.xlu0 %v118_v14  ;;  %v115_v16 = vsel %vm114_vm3, %v103_v12, -inf  ;;  %v147_v17 = vsel %vm146_vm2, %v103_v12, -inf  ;;  %v178_v18 = vsel %vm177_vm4, %v103_v12, -inf  ;;  %v209_v20 = vsel %vm208_vm5, %v103_v12, -inf  ;;  %s354_s3 = smov 56  }
  0xe7   :  { %182 = vmax.xlane.f32.xlu1 %v181_v15  ;;  %116 = vmax.xlane.f32.xlu0 %v115_v16 }
  0xeb   :  { %148 = vmax.xlane.f32.xlu1 %v147_v17  ;;  %179 = vmax.xlane.f32.xlu0 %v178_v18 }
  0xef   :  { %213 = vmax.xlane.f32.xlu1 %v212_v19  ;;  %210 = vmax.xlane.f32.xlu0 %v209_v20 }
 0x170   :  { %v152_v21 = vpop.xlane.xlu1 %151  ;;  %v120_v22 = vpop.xlane.xlu0 %119 }
 0x171   :  { %v154_v23 = vsub.f32 %v108_v10, %v152_v21  ;;  %v122_v24 = vsub.f32 %v108_v10, %v120_v22 }
 0x173   :  { %v125_v25 = vmul.f32 1.442695, %v122_v24  ;;  %v157_v28 = vmul.f32 1.442695, %v154_v23 }
 0x174   :  { %v183_v26 = vpop.xlane.xlu1 %182  ;;  %v117_v27 = vpop.xlane.xlu0 %116 }
 0x175   :  { %v185_v29 = vsub.f32 %v108_v10, %v183_v26  ;;  %v121_v30 = vsub.f32 %v103_v12, %v117_v27  ;;  %321 = vpow2.f32 %v125_v25 }
 0x176   :  { %323 = vpow2.f32 %v157_v28 }
 0x177   :  { %v123_v31 = vmul.f32 1.442695, %v121_v30  ;;  %v188_v34 = vmul.f32 1.442695, %v185_v29 }
 0x178   :  { %v149_v32 = vpop.xlane.xlu1 %148  ;;  %v180_v33 = vpop.xlane.xlu0 %179 }
 0x179   :  { %v153_v35 = vsub.f32 %v103_v12, %v149_v32  ;;  %v184_v36 = vsub.f32 %v103_v12, %v180_v33  ;;  %325 = vpow2.f32 %v123_v31 }
 0x17a   :  { %327 = vpow2.f32 %v188_v34 }
 0x17b   :  { %v186_v37 = vmul.f32 1.442695, %v184_v36  ;;  %v155_v40 = vmul.f32 1.442695, %v153_v35 }
 0x17c   :  { %v214_v38 = vpop.xlane.xlu1 %213  ;;  %v211_v39 = vpop.xlane.xlu0 %210 }
 0x17d   :  { %v215_v41 = vsub.f32 %v103_v12, %v211_v39  ;;  %329 = vpow2.f32 %v186_v37  ;;  %v216_v42 = vsub.f32 %v108_v10, %v214_v38 }
 0x17e   :  { %331 = vpow2.f32 %v155_v40 }
 0x17f   :  { %v217_v43 = vmul.f32 1.442695, %v215_v41  ;;  %v322_v44 = vpop.eup %321  ;;  %v219_v45 = vmul.f32 1.442695, %v216_v42 }
 0x180   :  { %131 = vrot.lane.b32.xlu1 %v322_v44, %s353_s2  ;;  %v324_v46 = vpop.eup %323 }
 0x181   :  { %333 = vpow2.f32 %v217_v43 }
 0x182   :  { %335 = vpow2.f32 %v219_v45 }
 0x183   :  { %v414_v47 = vpop.eup %325 }
 0x184   :  { %163 = vrot.lane.b32.xlu1 %v324_v46, %s354_s3  ;;  %129 = vrot.lane.b32.xlu0 %v414_v47, %s353_s2  ;;  %v328_v48 = vpop.eup %327 }
 0x187   :  { %v418_v49 = vpop.eup %329 }
 0x188   :  { %194 = vrot.lane.b32.xlu1 %v328_v48, %s355_s5  ;;  %192 = vrot.lane.b32.xlu0 %v418_v49, %s355_s5  ;;  %v332_v50 = vpop.eup %331 }
 0x18b   :  { %v421_v51 = vpop.eup %333 }
 0x18c   :  { %161 = vrot.lane.b32.xlu1 %v332_v50, %s354_s3  ;;  %223 = vrot.lane.b32.xlu0 %v421_v51, %s356_s6  ;;  %v336_v52 = vpop.eup %335 }
 0x190   :  { %225 = vrot.lane.b32.xlu1 %v336_v52, %s356_s6 }
 0x1f2   :  { %v132_v53 = vpop.permute.xlu1 %131 }
 0x1f3   :  { %v139_v54 = vsel %vm135_vm6, %v132_v53, 0.0 }
 0x1f4   :  { %140 = vadd.xlane.f32.xlu1 %v139_v54 }
 0x1f6   :  { %v164_v55 = vpop.permute.xlu1 %163  ;;  %v130_v57 = vpop.permute.xlu0 %129 }
 0x1f7   :  { %v170_v56 = vsel %vm135_vm6, %v164_v55, 0.0  ;;  %v136_v60 = vsel %vm135_vm6, %v130_v57, 0.0 }
 0x1f8   :  { %171 = vadd.xlane.f32.xlu0 %v170_v56 }
 0x1fa   :  { %v195_v58 = vpop.permute.xlu1 %194  ;;  %v193_v61 = vpop.permute.xlu0 %192 }
 0x1fb   :  { %v201_v59 = vsel %vm135_vm6, %v195_v58, 0.0  ;;  %v198_v2 = vsel %vm135_vm6, %v193_v61, 0.0 }
 0x1fc   :  { %202 = vadd.xlane.f32.xlu1 %v201_v59  ;;  %137 = vadd.xlane.f32.xlu0 %v136_v60 }
 0x1fe   :  { %v162_v62 = vpop.permute.xlu1 %161  ;;  %v224_v3 = vpop.permute.xlu0 %223 }
 0x1ff   :  { %v167_v63 = vsel %vm135_vm6, %v162_v62, 0.0  ;;  %v229_v4 = vsel %vm135_vm6, %v224_v3, 0.0 }
 0x200   :  { %168 = vadd.xlane.f32.xlu0 %v167_v63 }
 0x202   :  { %v226_v0 = vpop.permute.xlu1 %225 }
 0x203   :  { %v232_v1 = vsel %vm135_vm6, %v226_v0, 0.0 }
 0x204   :  { %233 = vadd.xlane.f32.xlu1 %v232_v1  ;;  %199 = vadd.xlane.f32.xlu0 %v198_v2 }
 0x208   :  { %230 = vadd.xlane.f32.xlu0 %v229_v4 }
 0x281   :  { %v141_v5 = vpop.xlane.xlu1 %140 }
 0x282   :  { %337 = vrcp.f32 %v141_v5 }
 0x285   :  { %v172_v6 = vpop.xlane.xlu0 %171 }
 0x286   :  { %339 = vrcp.f32 %v172_v6 }
 0x289   :  { %v203_v7 = vpop.xlane.xlu1 %202  ;;  %v138_v8 = vpop.xlane.xlu0 %137 }
 0x28a   :  { %341 = vrcp.f32 %v203_v7 }
 0x28b   :  { %343 = vrcp.f32 %v138_v8 }
 0x28c   :  { %v338_v9 = vpop.eup %337 }
 0x28d   :  { %v169_v10 = vpop.xlane.xlu0 %168  ;;  %v145_v11 = vmul.f32 %v338_v9, %v322_v44 }
 0x28e   :  { %345 = vrcp.f32 %v169_v10 }
 0x28f   :  { %243 = vrot.lane.b32.xlu1 %v145_v11, %s353_s2 }
 0x290   :  { %v340_v12 = vpop.eup %339 }
 0x291   :  { %v234_v13 = vpop.xlane.xlu1 %233  ;;  %v200_v14 = vpop.xlane.xlu0 %199  ;;  %v176_v15 = vmul.f32 %v340_v12, %v324_v46 }
 0x292   :  { %347 = vrcp.f32 %v234_v13 }
 0x293   :  { %349 = vrcp.f32 %v200_v14  ;;  %251 = vrot.lane.b32.xlu1 %v176_v15, %s353_s2 }
 0x294   :  { %v342_v16 = vpop.eup %341 }
 0x295   :  { %v344_v17 = vpop.eup %343  ;;  %v231_v18 = vpop.xlane.xlu0 %230  ;;  %v207_v19 = vmul.f32 %v342_v16, %v328_v48 }
 0x296   :  { %351 = vrcp.f32 %v231_v18  ;;  %v143_v20 = vmul.f32 %v344_v17, %v414_v47 }
 0x297   :  { %259 = vrot.lane.b32.xlu1 %v207_v19, %s353_s2 }
 0x298   :  { %v346_v21 = vpop.eup %345  ;;  %241 = vrot.lane.b32.xlu0 %v143_v20, %s353_s2 }
 0x299   :  { %v174_v22 = vmul.f32 %v346_v21, %v332_v50 }
 0x29b   :  { %249 = vrot.lane.b32.xlu1 %v174_v22, %s353_s2 }
 0x29c   :  { %v348_v23 = vpop.eup %347 }
 0x29d   :  { %v350_v24 = vpop.eup %349  ;;  %v238_v25 = vmul.f32 %v348_v23, %v336_v52 }
 0x29e   :  { %v205_v26 = vmul.f32 %v350_v24, %v418_v49 }
 0x29f   :  { %267 = vrot.lane.b32.xlu1 %v238_v25, %s353_s2 }
 0x2a0   :  { %v352_v27 = vpop.eup %351  ;;  %257 = vrot.lane.b32.xlu0 %v205_v26, %s353_s2 }
 0x2a1   :  { %v236_v28 = vmul.f32 %v352_v27, %v421_v51 }
 0x2a4   :  { %265 = vrot.lane.b32.xlu0 %v236_v28, %s353_s2 }
 0x301   :  { %v244_v29 = vpop.permute.xlu1 %243 }
 0x305   :  { %v252_v30 = vpop.permute.xlu1 %251 }
 0x306   :  { %v272_v34 = vsel %vm135_vm6, %v244_v29, %v252_v30 }
 0x309   :  { %v260_v31 = vpop.permute.xlu1 %259 }
 0x30a   :  { %v242_v33 = vpop.permute.xlu0 %241  ;;  %v275_v35 = vsel %vm273_vm7, %v272_v34, %v260_v31 }
 0x30d   :  { %v250_v32 = vpop.permute.xlu1 %249 }
 0x30e   :  { %v271_v39 = vsel %vm135_vm6, %v242_v33, %v250_v32 }
 0x311   :  { %v268_v36 = vpop.permute.xlu1 %267 }
 0x312   :  { %v278_v37 = vsel %vm276_vm8, %v275_v35, %v268_v36  ;;  %v258_v38 = vpop.permute.xlu0 %257 }
 0x313   :  { %280 = vst.msk [vmem:[%s457_s4 + $0x8] sm:$0xff] %vm29_vm0, %v278_v37  ;;  %v274_v40 = vsel %vm273_vm7, %v271_v39, %v258_v38 }
 0x316   :  { %v266_v41 = vpop.permute.xlu0 %265 }
 0x317   :  { %v277_v42 = vsel %vm276_vm8, %v274_v40, %v266_v41 }
 0x318   :  { %279 = vst.msk [vmem:[%s457_s4] sm:$0xff] %vm29_vm0, %v277_v42 }

// kernel: run.4
= control target key start
LH: loop header
LB: loop body
LE: loop exit
PB: predicated region body
PF: predicated region fallthrough
CT: control target
= control target key end

     0   :  { %v558_v1 = vmov 0   ;;  %vm71_vm0 = vcmask 261120   ;;  %vm435_vm1 = vcmask 257024   ;;  %s852_s1 = inlined_call_operand.vmem [shape: bf16[32,32], index: 1, kind: input, shape index: {}]   ;;  %s853_s0 = inlined_call_operand.vmem [shape: f32[160,32], index: 0, kind: input, shape index: {}]   ;;  %s854_s3 = inlined_call_operand.vmem [shape: f32[160,1], index: 3, kind: input, shape index: {}]   ;;  %s855_s2 = inlined_call_operand.vmem [shape: f32[1,32], index: 2, kind: input, shape index: {}]   ;;  %s856_s4 = inlined_call_operand.vmem [shape: bf16[160,32], index: 4, kind: output, shape index: {}]  }
   0x1   :  { %v556_v0 = vld [vmem:[%s852_s1] sm:$0xff]   ;;  %555 = vset.pattern.permute.xlu1 %v558_v1  ;;  %554 = vset.pattern.permute.xlu0 %v558_v1  ;;  %v557_v2 = vld [vmem:[%s852_s1 + $0x8] sm:$0xff]   ;;  %v20_v8 = vld [vmem:[%s853_s0 + $0x10] sm:$0xff] }
   0x2   :  { %525 = vmatprep.subr.bf16.mxu0 %v556_v0  ;;  %549 = vmatprep.subr.bf16.mxu1 %v556_v0  ;;  %v18_v3 = vld [vmem:[%s853_s0] sm:$0xff]  ;;  %v19_v4 = vld [vmem:[%s853_s0 + $0x8] sm:$0xff]  ;;  %v21_v9 = vld [vmem:[%s853_s0 + $0x18] sm:$0xff] }
   0x3   :  { %v30_v5 = vld [vmem:[%s853_s0 + $0x60] sm:$0xff]  ;;  %526 = vmatpush3.bf16.msra.mxu0 %v556_v0  ;;  %551 = vmatpush3.bf16.msra.mxu1 %v556_v0  ;;  %v38_v6 = vpack.c.bf16 %v19_v4, %v18_v3  ;;  %v31_v7 = vld [vmem:[%s853_s0 + $0x68] sm:$0xff]  ;;  %v32_v11 = vld [vmem:[%s853_s0 + $0x70] sm:$0xff]  ;;  %v39_v17 = vpack.c.bf16 %v21_v9, %v20_v8 }
   0x4   :  { %527 = vmatprep.subr.bf16.mxu0 %v557_v2  ;;  %550 = vmatprep.subr.bf16.mxu1 %v557_v2  ;;  %v44_v10 = vpack.c.bf16 %v31_v7, %v30_v5  ;;  %v33_v12 = vld [vmem:[%s853_s0 + $0x78] sm:$0xff]  ;;  %v22_v13 = vld [vmem:[%s853_s0 + $0x20] sm:$0xff]  ;;  %v23_v14 = vld [vmem:[%s853_s0 + $0x28] sm:$0xff] }
   0x5   :  { %529 = vmatprep.mubr.msk.bf16.mxu0 %vm71_vm0, %v38_v6  ;;  %v34_v15 = vld [vmem:[%s853_s0 + $0x80] sm:$0xff]  ;;  %v35_v16 = vld [vmem:[%s853_s0 + $0x88] sm:$0xff]  ;;  %v45_v18 = vpack.c.bf16 %v33_v12, %v32_v11  ;;  %v40_v19 = vpack.c.bf16 %v23_v14, %v22_v13  ;;  %v217_v21 = vld [vmem:[%s854_s3 + $0x10] sm:$0xff] }
   0x6   :  { %541 = vmatprep.mubr.msk.bf16.mxu1 %vm71_vm0, %v44_v10  ;;  %v46_v20 = vpack.c.bf16 %v35_v16, %v34_v15  ;;  %247 = vperm.xlu1 %555, %v217_v21   ;;  %v215_v22 = vld [vmem:[%s854_s3] sm:$0xff]  ;;  %v24_v23 = vld [vmem:[%s853_s0 + $0x30] sm:$0xff]  ;;  %v218_v24 = vld [vmem:[%s854_s3 + $0x18] sm:$0xff] }
   0x7   :  { %528 = vmatpush3.bf16.msra.mxu0 %v557_v2  ;;  %552 = vmatpush3.bf16.msra.mxu1 %v557_v2  ;;  %v25_v25 = vld [vmem:[%s853_s0 + $0x38] sm:$0xff]  ;;  %v36_v26 = vld [vmem:[%s853_s0 + $0x90] sm:$0xff]  ;;  %v26_v28 = vld [vmem:[%s853_s0 + $0x40] sm:$0xff] }
   0x8   :  { %v37_v27 = vld [vmem:[%s853_s0 + $0x98] sm:$0xff]  ;;  %v27_v29 = vld [vmem:[%s853_s0 + $0x48] sm:$0xff]  ;;  %237 = vperm.xlu0 %554, %v215_v22   ;;  %v41_v31 = vpack.c.bf16 %v25_v25, %v24_v23  ;;  %v219_v35 = vld [vmem:[%s854_s3 + $0x20] sm:$0xff] }
   0x9   :  { %v216_v30 = vld [vmem:[%s854_s3 + $0x8] sm:$0xff]  ;;  %v47_v32 = vpack.c.bf16 %v37_v27, %v36_v26  ;;  %v42_v34 = vpack.c.bf16 %v27_v29, %v26_v28  ;;  %v222_v36 = vld [vmem:[%s854_s3 + $0x38] sm:$0xff]  ;;  %v28_v37 = vld [vmem:[%s853_s0 + $0x50] sm:$0xff] }
   0xa   :  { %530 = vmatmul.mubr.msk.bf16.vlgmr.msra.gmra.mrb[0].mxu0 %vm71_vm0, %v39_v17  ;;  %542 = vmatmul.mubr.msk.bf16.vlgmr.msra.gmra.mrb[0].mxu1 %vm71_vm0, %v45_v18  ;;  %v220_v33 = vld [vmem:[%s854_s3 + $0x28] sm:$0xff]  ;;  %v29_v38 = vld [vmem:[%s853_s0 + $0x58] sm:$0xff]  ;;  %v221_v39 = vld [vmem:[%s854_s3 + $0x30] sm:$0xff] }
   0xb   :  { %533 = vmatprep.mubr.msk.bf16.mxu0 %vm71_vm0, %v40_v19  ;;  %545 = vmatprep.mubr.msk.bf16.mxu1 %vm71_vm0, %v46_v20  ;;  %v43_v40 = vpack.c.bf16 %v29_v38, %v28_v37  ;;  %v224_v41 = vld [vmem:[%s854_s3 + $0x48] sm:$0xff]  ;;  %v223_v42 = vld [vmem:[%s854_s3 + $0x40] sm:$0xff]  ;;  %v226_v43 = vld [vmem:[%s854_s3 + $0x58] sm:$0xff] }
   0xc   :  { %252 = vperm.xlu1 %555, %v218_v24   ;;  %242 = vperm.xlu0 %554, %v216_v30   ;;  %v225_v44 = vld [vmem:[%s854_s3 + $0x50] sm:$0xff]  ;;  %v228_v45 = vld [vmem:[%s854_s3 + $0x68] sm:$0xff]  ;;  %v227_v46 = vld [vmem:[%s854_s3 + $0x60] sm:$0xff] }
   0xd   :  { %v230_v47 = vld [vmem:[%s854_s3 + $0x78] sm:$0xff]  ;;  %v229_v48 = vld [vmem:[%s854_s3 + $0x70] sm:$0xff]  ;;  %v232_v49 = vld [vmem:[%s854_s3 + $0x88] sm:$0xff] }
   0xe   :  { %v231_v50 = vld [vmem:[%s854_s3 + $0x80] sm:$0xff]  ;;  %v234_v51 = vld [vmem:[%s854_s3 + $0x98] sm:$0xff]  ;;  %v233_v52 = vld [vmem:[%s854_s3 + $0x90] sm:$0xff] }
   0xf   :  { %v739_v4 = vld [vmem:[%s855_s2] ss:$0 sm:$0xff] }
  0x10   :  { %262 = vperm.xlu1 %555, %v220_v33   ;;  %257 = vperm.xlu0 %554, %v219_v35  }
  0x12   :  { %534 = vmatmul.mubr.msk.bf16.gmra.mrb[4].mxu0 %vm71_vm0, %v41_v31  ;;  %546 = vmatmul.mubr.msk.bf16.gmra.mrb[4].mxu1 %vm71_vm0, %v47_v32 }
  0x13   :  { %537 = vmatprep.mubr.msk.bf16.mxu0 %vm71_vm0, %v42_v34 }
  0x14   :  { %272 = vperm.xlu1 %555, %v222_v36   ;;  %267 = vperm.xlu0 %554, %v221_v39  }
  0x18   :  { %282 = vperm.xlu1 %555, %v224_v41   ;;  %277 = vperm.xlu0 %554, %v223_v42  }
  0x1a   :  { %538 = vmatmul.mubr.msk.bf16.gmra.mrb[8].mxu0 %vm71_vm0, %v43_v40 }
  0x1c   :  { %292 = vperm.xlu1 %555, %v226_v43   ;;  %287 = vperm.xlu0 %554, %v225_v44  }
  0x20   :  { %302 = vperm.xlu1 %555, %v228_v45   ;;  %297 = vperm.xlu0 %554, %v227_v46  }
  0x24   :  { %312 = vperm.xlu1 %555, %v230_v47   ;;  %307 = vperm.xlu0 %554, %v229_v48  }
  0x28   :  { %322 = vperm.xlu1 %555, %v232_v49   ;;  %317 = vperm.xlu0 %554, %v231_v50  }
  0x2c   :  { %332 = vperm.xlu1 %555, %v234_v51   ;;  %327 = vperm.xlu0 %554, %v233_v52  }
  0x85   :  { %v248_v54 = vpop.permute.xlu1 %247 }
  0x87   :  { %v238_v53 = vpop.permute.xlu0 %237 }
  0x8b   :  { %v243_v55 = vpop.permute.xlu0 %242  ;;  %v253_v56 = vpop.permute.xlu1 %252 }
  0x8f   :  { %v720_v57 = vpop.permute.xlu0 %257  ;;  %v722_v58 = vpop.permute.xlu1 %262 }
  0x93   :  { %v724_v59 = vpop.permute.xlu0 %267  ;;  %v726_v60 = vpop.permute.xlu1 %272 }
  0x97   :  { %v728_v61 = vpop.permute.xlu0 %277  ;;  %v730_v62 = vpop.permute.xlu1 %282 }
  0x9b   :  { %v732_v63 = vpop.permute.xlu0 %287  ;;  %v734_v0 = vpop.permute.xlu1 %292 }
  0x9f   :  { %v298_v1 = vpop.permute.xlu0 %297  ;;  %v303_v2 = vpop.permute.xlu1 %302 }
  0xa3   :  { %v308_v3 = vpop.permute.xlu0 %307  ;;  %v313_v5 = vpop.permute.xlu1 %312 }
  0xa7   :  { %v741_v6 = vpop.permute.xlu0 %317  ;;  %v323_v31 = vpop.permute.xlu1 %322 }
  0xab   :  { %v328_v36 = vpop.permute.xlu0 %327 }
  0xdd   :  { %v531_v7 = vpop.f32.mrb[0].mxu0  ;;  %v543_v8 = vpop.f32.mrb[0].mxu1 }
  0xde   :  { %v145_v9 = vadd.f32 %v531_v7, %v739_v4  ;;  %v193_v10 = vadd.f32 %v543_v8, %v739_v4  ;;  %v136_v11 = vpop.f32.mrb[1].mxu0  ;;  %v184_v12 = vpop.f32.mrb[1].mxu1 }
  0xdf   :  { %v137_v13 = vadd.f32 %v739_v4, %v136_v11  ;;  %v185_v14 = vadd.f32 %v739_v4, %v184_v12  ;;  %v532_v15 = vpop.f32.mrb[2].mxu0  ;;  %v544_v16 = vpop.f32.mrb[2].mxu1 }
  0xe0   :  { %v337_v17 = vmul.f32 %v248_v54, %v145_v9  ;;  %v349_v18 = vmul.f32 %v308_v3, %v193_v10  ;;  %v148_v19 = vadd.f32 %v532_v15, %v739_v4  ;;  %v196_v20 = vadd.f32 %v544_v16, %v739_v4  ;;  %v139_v21 = vpop.f32.mrb[3].mxu0  ;;  %v187_v22 = vpop.f32.mrb[3].mxu1 }
  0xe1   :  { %v335_v23 = vmul.f32 %v238_v53, %v137_v13  ;;  %v347_v24 = vmul.f32 %v298_v1, %v185_v14  ;;  %v140_v25 = vadd.f32 %v739_v4, %v139_v21  ;;  %v188_v26 = vadd.f32 %v739_v4, %v187_v22  ;;  %v333_v1 = vpop.permute.xlu1 %332 }
  0xe2   :  { %v495_v27 = vpack.c.bf16 %v337_v17, %v337_v17  ;;  %v507_v28 = vpack.c.bf16 %v349_v18, %v349_v18  ;;  %v338_v29 = vmul.f32 %v253_v56, %v148_v19  ;;  %v350_v30 = vmul.f32 %v313_v5, %v196_v20 }
  0xe3   :  { %v493_v32 = vpack.c.bf16 %v335_v23, %v335_v23  ;;  %v505_v33 = vpack.c.bf16 %v347_v24, %v347_v24  ;;  %v336_v34 = vmul.f32 %v243_v55, %v140_v25  ;;  %v348_v35 = vmul.f32 %v303_v2, %v188_v26 }
  0xe4   :  { %438 = vst.msk [vmem:[%s856_s4 + $0x8] sm:$0xf] %vm435_vm1, %v495_v27  ;;  %450 = vst.msk [vmem:[%s856_s4 + $0x38] sm:$0xf] %vm435_vm1, %v507_v28  ;;  %v496_v37 = vpack.c.bf16 %v338_v29, %v338_v29  ;;  %v508_v38 = vpack.c.bf16 %v350_v30, %v350_v30 }
  0xe5   :  { %436 = vst.msk [vmem:[%s856_s4] sm:$0xf] %vm435_vm1, %v493_v32  ;;  %448 = vst.msk [vmem:[%s856_s4 + $0x30] sm:$0xf] %vm435_vm1, %v505_v33  ;;  %v494_v39 = vpack.c.bf16 %v336_v34, %v336_v34  ;;  %v506_v40 = vpack.c.bf16 %v348_v35, %v348_v35  ;;  %v535_v41 = vpop.f32.mrb[4].mxu0  ;;  %v547_v42 = vpop.f32.mrb[4].mxu1 }
  0xe6   :  { %439 = vst.msk [vmem:[%s856_s4 + $0xc] sm:$0xf] %vm435_vm1, %v496_v37  ;;  %451 = vst.msk [vmem:[%s856_s4 + $0x3c] sm:$0xf] %vm435_vm1, %v508_v38  ;;  %v161_v43 = vadd.f32 %v535_v41, %v739_v4  ;;  %v209_v44 = vadd.f32 %v547_v42, %v739_v4  ;;  %v152_v45 = vpop.f32.mrb[5].mxu0  ;;  %v200_v46 = vpop.f32.mrb[5].mxu1 }
  0xe7   :  { %437 = vst.msk [vmem:[%s856_s4 + $0x4] sm:$0xf] %vm435_vm1, %v494_v39  ;;  %449 = vst.msk [vmem:[%s856_s4 + $0x34] sm:$0xf] %vm435_vm1, %v506_v40  ;;  %v153_v47 = vadd.f32 %v739_v4, %v152_v45  ;;  %v201_v48 = vadd.f32 %v739_v4, %v200_v46  ;;  %v536_v49 = vpop.f32.mrb[6].mxu0  ;;  %v548_v50 = vpop.f32.mrb[6].mxu1 }
  0xe8   :  { %v341_v51 = vmul.f32 %v724_v59, %v161_v43  ;;  %v353_v52 = vmul.f32 %v328_v36, %v209_v44  ;;  %v164_v53 = vadd.f32 %v536_v49, %v739_v4  ;;  %v212_v54 = vadd.f32 %v548_v50, %v739_v4  ;;  %v155_v55 = vpop.f32.mrb[7].mxu0  ;;  %v203_v56 = vpop.f32.mrb[7].mxu1 }
  0xe9   :  { %v339_v2 = vmul.f32 %v720_v57, %v153_v47  ;;  %v351_v3 = vmul.f32 %v741_v6, %v201_v48  ;;  %v156_v5 = vadd.f32 %v739_v4, %v155_v55  ;;  %v204_v7 = vadd.f32 %v739_v4, %v203_v56 }
  0xea   :  { %v499_v8 = vpack.c.bf16 %v341_v51, %v341_v51  ;;  %v511_v9 = vpack.c.bf16 %v353_v52, %v353_v52  ;;  %v342_v59 = vmul.f32 %v726_v60, %v164_v53  ;;  %v354_v10 = vmul.f32 %v333_v1, %v212_v54 }
  0xeb   :  { %v497_v11 = vpack.c.bf16 %v339_v2, %v339_v2  ;;  %v509_v12 = vpack.c.bf16 %v351_v3, %v351_v3  ;;  %v340_v13 = vmul.f32 %v722_v58, %v156_v5  ;;  %v352_v14 = vmul.f32 %v323_v31, %v204_v7 }
  0xec   :  { %442 = vst.msk [vmem:[%s856_s4 + $0x18] sm:$0xf] %vm435_vm1, %v499_v8  ;;  %454 = vst.msk [vmem:[%s856_s4 + $0x48] sm:$0xf] %vm435_vm1, %v511_v9  ;;  %v500_v57 = vpack.c.bf16 %v342_v59, %v342_v59  ;;  %v512_v6 = vpack.c.bf16 %v354_v10, %v354_v10 }
  0xed   :  { %440 = vst.msk [vmem:[%s856_s4 + $0x10] sm:$0xf] %vm435_vm1, %v497_v11  ;;  %452 = vst.msk [vmem:[%s856_s4 + $0x40] sm:$0xf] %vm435_vm1, %v509_v12  ;;  %v498_v58 = vpack.c.bf16 %v340_v13, %v340_v13  ;;  %v510_v60 = vpack.c.bf16 %v352_v14, %v352_v14  ;;  %v539_v15 = vpop.f32.mrb[8].mxu0 }
  0xee   :  { %443 = vst.msk [vmem:[%s856_s4 + $0x1c] sm:$0xf] %vm435_vm1, %v500_v57  ;;  %455 = vst.msk [vmem:[%s856_s4 + $0x4c] sm:$0xf] %vm435_vm1, %v512_v6  ;;  %v177_v16 = vadd.f32 %v539_v15, %v739_v4  ;;  %v168_v17 = vpop.f32.mrb[9].mxu0 }
  0xef   :  { %441 = vst.msk [vmem:[%s856_s4 + $0x14] sm:$0xf] %vm435_vm1, %v498_v58  ;;  %453 = vst.msk [vmem:[%s856_s4 + $0x44] sm:$0xf] %vm435_vm1, %v510_v60  ;;  %v169_v18 = vadd.f32 %v739_v4, %v168_v17  ;;  %v540_v19 = vpop.f32.mrb[10].mxu0 }
  0xf0   :  { %v345_v20 = vmul.f32 %v732_v63, %v177_v16  ;;  %v180_v21 = vadd.f32 %v540_v19, %v739_v4  ;;  %v171_v22 = vpop.f32.mrb[11].mxu0 }
  0xf1   :  { %v343_v23 = vmul.f32 %v728_v61, %v169_v18  ;;  %v172_v24 = vadd.f32 %v739_v4, %v171_v22 }
  0xf2   :  { %v503_v25 = vpack.c.bf16 %v345_v20, %v345_v20  ;;  %v346_v26 = vmul.f32 %v734_v0, %v180_v21 }
  0xf3   :  { %v501_v27 = vpack.c.bf16 %v343_v23, %v343_v23  ;;  %v344_v28 = vmul.f32 %v730_v62, %v172_v24 }
  0xf4   :  { %446 = vst.msk [vmem:[%s856_s4 + $0x28] sm:$0xf] %vm435_vm1, %v503_v25  ;;  %v504_v29 = vpack.c.bf16 %v346_v26, %v346_v26 }
  0xf5   :  { %444 = vst.msk [vmem:[%s856_s4 + $0x20] sm:$0xf] %vm435_vm1, %v501_v27  ;;  %v502_v61 = vpack.c.bf16 %v344_v28, %v344_v28 }
  0xf6   :  { %447 = vst.msk [vmem:[%s856_s4 + $0x2c] sm:$0xf] %vm435_vm1, %v504_v29 }
  0xf7   :  { %445 = vst.msk [vmem:[%s856_s4 + $0x24] sm:$0xf] %vm435_vm1, %v502_v61 }

// kernel: run.5
= control target key start
LH: loop header
LB: loop body
LE: loop exit
PB: predicated region body
PF: predicated region fallthrough
CT: control target
= control target key end

     0   :  { %9 = vsyncpa [#allocation3], 0  ;;  %s2863_s0 = inlined_call_operand.vmem [shape: bf16[2,80,32], index: 0, kind: input, shape index: {}]   ;;  %s2864_s1 = inlined_call_operand.vmem [shape: f32[2,8,96], index: 1, kind: input, shape index: {}]   ;;  %s2865_s2 = inlined_call_operand.vmem [shape: f32[32,32], index: 2, kind: input, shape index: {}]   ;;  %s2866_s3 = inlined_call_operand.vmem [shape: f32[1,32], index: 3, kind: input, shape index: {}]   ;;  %s2867_s4 = inlined_call_operand.hbm [shape: f32[2,8,32], index: 4, kind: output, shape index: {}]  }
   0x1   :  { %11 = vsyncpa [#allocation3 + $0x1], 0  ;;  %s2272_s15 = smov 0   ;;  %s2274_s16 = smov 0  }
   0x2   :  { %s2276_s17 = smov 0   ;;  %s2278_s18 = smov 0  }
   0x3   :  { %s2280_s19 = smov 0   ;;  %s2282_s20 = smov 0  }
   0x4 LB: > { %s1632_s21 = sadd.s32 4294967295, %s2139_s20   ;;  %s1633_s22 = sadd.s32 4294967294, %s2139_s20   ;;  %s2139_s20 = sphi %s2282_s20, %s17_s20   ;;  %s2135_s19 = sphi %s2280_s19, %s2874_s19   ;;  %s2131_s18 = sphi %s2278_s18, %s2873_s18   ;;  %s2127_s17 = sphi %s2276_s17, %s2872_s17   ;;  %s2123_s16 = sphi %s2274_s16, %s2871_s16   ;;  %s2119_s15 = sphi %s2272_s15, %s2870_s15  }
   0x5   : > { %s29_s23 = sadd.s32 1, %s2135_s19  ;;  %s134_s24 = sadd.s32 1, %s2127_s17 }
   0x6   : > { %p31_p0 = scmp.ge.s32.totalorder %s29_s23, 2  ;;  %p144_p1 = scmp.ne.s32.totalorder %s2127_s17, %s2123_s16 }
   0x7   : > { %p145_p2 = scmp.eq.s32.totalorder %s1632_s21, 1  ;;  %p150_p3 = scmp.ne.s32.totalorder %s2123_s16, %s2119_s15 }
   0x8   : > { %s2876_s23 = smov (%p31_p0, %s29_s23), 0  ;;  %p151_p5 = scmp.eq.s32.totalorder %s1633_s22, 1 }
   0x9   : > { %p2312_p4 = por %p145_p2, %p144_p1  ;;  %s129_s26 = ssub.s32 %s2135_s19, %s2876_s23 }
   0xa   : > { %p1636_p6 = scmp.ge.s32.totalorder %s2139_s20, 1  ;;  %p132_p7 = scmp.eq.s32.totalorder %s129_s26, 0 }
   0xb   : > { %p2319_p8 = por %p151_p5, %p150_p3  ;;  %p193_p9 = scmp.lt.s32.totalorder %s2139_s20, 3 }
   0xc   : > { %s2325_s28 = scalar_select %p132_p7, %s2127_s17, %s134_s24  }
   0xd   : > { %p194_p10 = pnand %p1636_p6, %p193_p9 }
   0xe   : > { %p226_p11 = scmp.lt.s32.totalorder (!%p194_p10), %s2131_s18, 1  ;;  %v2141_v0 = vmov (!%p194_p10), 15   ;;  %v2142_v1 = vmov (!%p194_p10), 12   ;;  %v2143_v3 = vmov (!%p194_p10), 16   ;;  %v2144_v4 = vmov (!%p194_p10), 13   ;;  %s2173_s12 = smov (!%p194_p10), 120  }
   0xf   : > { %197 = sbr.rel (%p194_p10) target bundleno = 1054 (0x41e), region = 36  ;;  %1960 = vset.pattern.permute.xlu1 (!%p194_p10), %v2141_v0  ;;  %1958 = vset.pattern.permute.xlu0 (!%p194_p10), %v2142_v1  ;;  %v2145_v5 = vmov (!%p194_p10), 36   ;;  %v2146_v6 = vmov (!%p194_p10), 37   ;;  %v2147_v7 = vmov (!%p194_p10), 39   ;;  %v2148_v8 = vmov (!%p194_p10), 18   ;;  %s2205_s13 = smov (!%p194_p10), 104  }
  0x10   : > { %v2149_v9 = vmov (!%p194_p10), 40   ;;  %v2150_v10 = vmov (!%p194_p10), 43   ;;  %v2151_v11 = vmov (!%p194_p10), 19   ;;  %v2152_v12 = vmov (!%p194_p10), 45   ;;  %s2214_s14 = smov (!%p194_p10), 112   ;;  %s2245_s9 = smov (!%p194_p10), 24  }
  0x11   : > { %v2153_v13 = vmov (!%p194_p10), 42   ;;  %v2154_v14 = vmov (!%p194_p10), 17   ;;  %v2155_v15 = vmov (!%p194_p10), 21   ;;  %v2156_v16 = vmov (!%p194_p10), 20   ;;  %s223_s10 = sand.u32 (!%p194_p10), 1, %s2123_s16  }
  0x12   : > { %v2157_v17 = vmov (!%p194_p10), 22   ;;  %v2158_v18 = vmov (!%p194_p10), 0   ;;  %v2159_v19 = vmov (!%p194_p10), 46   ;;  %v2160_v20 = vmov (!%p194_p10), 4  }
  0x13   : > { %v2161_v21 = vmov (!%p194_p10), 14   ;;  %v2162_v22 = vmov (!%p194_p10), 25   ;;  %v2163_v23 = vmov (!%p194_p10), 38   ;;  %v2164_v24 = vmov (!%p194_p10), 6  }
  0x14   : > { %v2165_v25 = vmov (!%p194_p10), 41   ;;  %v2166_v26 = vmov (!%p194_p10), 31   ;;  %v2167_v27 = vmov (!%p194_p10), 44   ;;  %v2168_v28 = vmov (!%p194_p10), 33  }
  0x15   : > { %v2169_v29 = vmov (!%p194_p10), 23   ;;  %v2170_v30 = vmov (!%p194_p10), 61   ;;  %v2171_v32 = vmov (!%p194_p10), 0.0   ;;  %v2172_v33 = vmov (!%p194_p10), 1  }
  0x16   : > { %s227_s29 = scalar_select %p226_p11, %s2131_s18, 1  ;;  %1692 = vmatprep.subr.bf16.mxu0 %v2171_v32  ;;  %1710 = vmatprep.subr.bf16.mxu1 %v2171_v32  ;;  %v2174_v34 = vmov 85   ;;  %vm2175_vm0 = vmmov 0   ;;  %v2176_v35 = vmov 3   ;;  %v2177_v36 = vmov 2  }
  0x17   : > { %1694 = vmatprep.mubr.msk.bf16.mxu0 %vm2175_vm0, %v2171_v32  ;;  %1712 = vmatprep.mubr.msk.bf16.mxu1 %vm2175_vm0, %v2171_v32  ;;  %v2178_v37 = vmov 47   ;;  %v2179_v38 = vmov 67   ;;  %v2180_v39 = vmov 24   ;;  %v2181_v40 = vmov 90  }
  0x18   : > { %s1639_s30 = sshll.u32 %s227_s29, 3  ;;  %s1797_s5 = smul.u32 40, %s227_s29  ;;  %v2182_v41 = vmov 27   ;;  %v2183_v42 = vmov 69   ;;  %v2184_v44 = vmov 28   ;;  %v2185_v45 = vmov 94  }
  0x19   : > { %s2332_s8 = scalar_lea.vmem %s2864_s1, %s1639_s30  ;;  %v2186_v46 = vmov 7   ;;  %v2187_v48 = vmov 30   ;;  %v2188_v49 = vmov 65   ;;  %v2189_v50 = vmov 9   ;;  %s2243_s29 = smov 8  }
  0x1a   : > { %v2335_v2 = vld [vmem:[%s2332_s8] sm:$0xff]  ;;  %s2340_s11 = scalar_lea.vmem %s2863_s0, %s1797_s5  ;;  %v2190_v51 = vmov 68   ;;  %v2191_v52 = vmov 10   ;;  %v2192_v53 = vmov 71   ;;  %v2193_v54 = vmov 34   ;;  %s1535_s30 = scalar_lea.sflag [#allocation3], %s223_s10 }
  0x1b   : > { %662 = vperm.xlu1 %1960, %v2335_v2   ;;  %639 = vperm.xlu0 %1958, %v2335_v2   ;;  %v2373_v31 = vld [vmem:[%s2340_s11 + $0x20] sm:$0xff]   ;;  %v2404_v47 = vld [vmem:[%s2340_s11 + $0x8] sm:$0xff]   ;;  %v2194_v57 = vmov 51   ;;  %v2195_v58 = vmov 60   ;;  %v2196_v61 = vmov 72   ;;  %v2197_v62 = vmov 63  }
  0x1c   : > { %1693 = vmatpush3.bf16.msra.mxu0 %v2373_v31  ;;  %v2396_v43 = vld [vmem:[%s2340_s11] sm:$0xff]   ;;  %v2198_v1 = vmov 76   ;;  %vm737_vm1 = vcmask 130048   ;;  %vm805_vm2 = vcmask 523264   ;;  %vm1443_vm3 = vcmask 64512  }
  0x1d   : > { %1698 = vmatprep.subr.bf16.mxu0 %v2171_v32  ;;  %vm1446_vm4 = vcmask 195584   ;;  %vm1459_vm5 = vcmask 261120  }
  0x1f   : > { %1961 = vset.pattern.permute.xlu1 %v2143_v3  ;;  %1959 = vset.pattern.permute.xlu0 %v2144_v4  ;;  %v2199_v3 = vmov 64   ;;  %v2433_v4 = vld [vmem:[%s2340_s11 + $0x18] sm:$0xff]  }
  0x20   : > { %670 = vperm.xlu1 %1961, %v2335_v2   ;;  %647 = vperm.xlu0 %1959, %v2335_v2  }
  0x24   : > { %1962 = vset.pattern.permute.xlu1 %v2145_v5  ;;  %1963 = vset.pattern.permute.xlu0 %v2146_v6  ;;  %v240_v5 = vlaneseq }
  0x25   : > { %850 = vperm.xlu1 %1962, %v2335_v2   ;;  %858 = vperm.xlu0 %1963, %v2335_v2  }
  0x29   : > { %1964 = vset.pattern.permute.xlu1 %v2147_v7  ;;  %1966 = vset.pattern.permute.xlu0 %v2148_v8  ;;  %v241_v8 = vand.u32 127, %v240_v5 }
  0x2a   : > { %873 = vperm.xlu1 %1964, %v2335_v2   ;;  %685 = vperm.xlu0 %1966, %v2335_v2  }
  0x2e   : > { %1965 = vset.pattern.permute.xlu1 %v2149_v9  ;;  %1969 = vset.pattern.permute.xlu0 %v2150_v10  ;;  %v2200_v9 = vmov 84   ;;  %v2201_v10 = vmov 79  }
  0x2f   : > { %881 = vperm.xlu1 %1965, %v2335_v2   ;;  %904 = vperm.xlu0 %1969, %v2335_v2  }
  0x33   : > { %1967 = vset.pattern.permute.xlu1 %v2151_v11  ;;  %1972 = vset.pattern.permute.xlu0 %v2152_v12 }
  0x34   : > { %693 = vperm.xlu1 %1967, %v2335_v2   ;;  %919 = vperm.xlu0 %1972, %v2335_v2  }
  0x38   : > { %1968 = vset.pattern.permute.xlu1 %v2153_v13  ;;  %1975 = vset.pattern.permute.xlu0 %v2154_v14  ;;  %v2448_v13 = vcvt.s32.f32 %v241_v8  ;;  %v2202_v14 = vmov 87  }
  0x39   : > { %896 = vperm.xlu1 %1968, %v2335_v2   ;;  %679 = vperm.xlu0 %1975, %v2335_v2  }
  0x3d   : > { %1970 = vset.pattern.permute.xlu1 %v2155_v15  ;;  %1978 = vset.pattern.permute.xlu0 %v2156_v16  ;;  %v2203_v15 = vmov 81   ;;  %v244_v16 = vadd.f32 0.5, %v2448_v13 }
  0x3e   : > { %708 = vperm.xlu1 %1970, %v2335_v2   ;;  %702 = vperm.xlu0 %1978, %v2335_v2  }
  0x42   : > { %1971 = vset.pattern.permute.xlu1 %v2157_v17  ;;  %1981 = vset.pattern.permute.xlu0 %v2158_v18 }
  0x43   : > { %716 = vperm.xlu1 %1971, %v2335_v2   ;;  %260 = vperm.xlu0 %1981, %v2335_v2  }
  0x47   : > { %1973 = vset.pattern.permute.xlu1 %v2159_v19  ;;  %1984 = vset.pattern.permute.xlu0 %v2160_v20  ;;  %v2204_v19 = vmov 88   ;;  %v632_v20 = vmul.f32 0.25, %v244_v16 }
  0x48   : > { %927 = vperm.xlu1 %1973, %v2335_v2   ;;  %291 = vperm.xlu0 %1984, %v2335_v2  }
  0x4c   : > { %1974 = vset.pattern.permute.xlu1 %v2161_v21  ;;  %1987 = vset.pattern.permute.xlu0 %v2162_v22 }
  0x4d   : > { %656 = vperm.xlu1 %1974, %v2335_v2   ;;  %361 = vperm.xlu0 %1987, %v2335_v2  }
  0x51   : > { %1976 = vset.pattern.permute.xlu1 %v2163_v23  ;;  %1990 = vset.pattern.permute.xlu0 %v2164_v24  ;;  %v2206_v23 = vmov 53   ;;  %v2207_v24 = vmov 5  }
  0x52   : > { %867 = vperm.xlu1 %1976, %v2335_v2   ;;  %306 = vperm.xlu0 %1990, %v2335_v2  }
  0x56   : > { %1977 = vset.pattern.permute.xlu1 %v2165_v25  ;;  %1993 = vset.pattern.permute.xlu0 %v2166_v26  ;;  %v2464_v25 = vfloor.f32 %v632_v20  ;;  %v2216_v20 = vmov 8  }
  0x57   : > { %890 = vperm.xlu1 %1977, %v2335_v2   ;;  %407 = vperm.xlu0 %1993, %v2335_v2  }
  0x5b   : > { %1979 = vset.pattern.permute.xlu1 %v2167_v27  ;;  %1996 = vset.pattern.permute.xlu0 %v2168_v28  ;;  %v634_v28 = vmul.f32 4.0, %v2464_v25 }
  0x5c   : > { %913 = vperm.xlu1 %1979, %v2335_v2   ;;  %422 = vperm.xlu0 %1996, %v2335_v2  }
  0x60   : > { %1980 = vset.pattern.permute.xlu1 %v2169_v29  ;;  %1999 = vset.pattern.permute.xlu0 %v2170_v30  ;;  %v2208_v29 = vmov 66   ;;  %v2209_v30 = vmov 56  }
  0x61   : > { %725 = vperm.xlu1 %1980, %v2335_v2   ;;  %1052 = vperm.xlu0 %1999, %v2335_v2  }
  0x65   : > { %1982 = vset.pattern.permute.xlu1 %v2172_v33  ;;  %942 = vrot.lane.b32.xlu0 %v2373_v31, %s2173_s12 }
  0x66   : > { %268 = vperm.xlu1 %1982, %v2335_v2   ;;  %2003 = vset.pattern.permute.xlu0 %v2174_v34 }
  0x69   : > { %1246 = vperm.xlu0 %2003, %v2335_v2  }
  0x6a   : > { %1983 = vset.pattern.permute.xlu1 %v2176_v35  ;;  %v2478_v35 = vsub.f32 %v2448_v13, %v634_v28 }
  0x6b   : > { %283 = vperm.xlu1 %1983, %v2335_v2  }
  0x6d   : > { %2006 = vset.pattern.permute.xlu0 %v2177_v36  ;;  %v2210_v36 = vmov 26  }
  0x6e   : > { %277 = vperm.xlu0 %2006, %v2335_v2  }
  0x6f   : > { %1985 = vset.pattern.permute.xlu1 %v2178_v37 }
  0x70   : > { %936 = vperm.xlu1 %1985, %v2335_v2  }
  0x72   : > { %2009 = vset.pattern.permute.xlu0 %v2179_v38 }
  0x73   : > { %1098 = vperm.xlu0 %2009, %v2335_v2  }
  0x74   : > { %1986 = vset.pattern.permute.xlu1 %v2180_v39 }
  0x75   : > { %353 = vperm.xlu1 %1986, %v2335_v2  }
  0x77   : > { %2012 = vset.pattern.permute.xlu0 %v2181_v40 }
  0x78   : > { %1284 = vperm.xlu0 %2012, %v2335_v2  }
  0x79   : > { %1988 = vset.pattern.permute.xlu1 %v2182_v41 }
  0x7a   : > { %376 = vperm.xlu1 %1988, %v2335_v2  }
  0x7c   : > { %2015 = vset.pattern.permute.xlu0 %v2183_v42 }
  0x7d   : > { %1113 = vperm.xlu0 %2015, %v2335_v2  }
  0x7e   : > { %1989 = vset.pattern.permute.xlu1 %v2184_v44 }
  0x7f   : > { %384 = vperm.xlu1 %1989, %v2335_v2  }
  0x81   : > { %988 = vrot.lane.b32.xlu0 %v2396_v43, %s2173_s12 }
  0x82   : > { %2019 = vset.pattern.permute.xlu0 %v2185_v45  ;;  %v2211_v45 = vmov 29  }
  0x83   : > { %1991 = vset.pattern.permute.xlu1 %v2186_v46  ;;  %v2212_v46 = vmov 83  }
  0x84   : > { %314 = vperm.xlu1 %1991, %v2335_v2  }
  0x85   : > { %1315 = vperm.xlu0 %2019, %v2335_v2  }
  0x88   : > { %1992 = vset.pattern.permute.xlu1 %v2187_v48 }
  0x89   : > { %399 = vperm.xlu1 %1992, %v2335_v2   ;;  %990 = vrot.lane.b32.xlu0 %v2404_v47, %s2173_s12 }
  0x8a   : > { %2023 = vset.pattern.permute.xlu0 %v2188_v49 }
  0x8d   : > { %1994 = vset.pattern.permute.xlu1 %v2189_v50  ;;  %1084 = vperm.xlu0 %2023, %v2335_v2  }
  0x8e   : > { %329 = vperm.xlu1 %1994, %v2335_v2  }
  0x91   : > { %2026 = vset.pattern.permute.xlu0 %v2190_v51 }
  0x92   : > { %1995 = vset.pattern.permute.xlu1 %v2191_v52  ;;  %1107 = vperm.xlu0 %2026, %v2335_v2  }
  0x93   : > { %337 = vperm.xlu1 %1995, %v2335_v2  }
  0x96   : > { %2028 = vset.pattern.permute.xlu0 %v2192_v53  ;;  %v2504_v53 = vld [vmem:[%s2340_s11 + $0x10] sm:$0xff]   ;;  %s1637_s11 = sshll.u32 %s223_s10, 3 }
  0x97   : > { %1997 = vset.pattern.permute.xlu1 %v2193_v54  ;;  %1130 = vperm.xlu0 %2028, %v2335_v2   ;;  %s225_s21 = scalar_lea.vmem [#allocation2], %s1637_s11 }
  0x98   : > { %430 = vperm.xlu1 %1997, %v2335_v2   ;;  %s1549_s22 = sshll.u32 %s225_s21, 4  ;;  %s2817_s22 = int_to_ptr.vmem [resolvable:$true] %s1549_s22 }
  0x99   : > { %s2061_s5 = scalar_lea.vmem %s2817_s22, 128 }
  0x9a   : > { %v2415_v55 = vpop.permute.xlu1 %662  ;;  %v2417_v56 = vpop.permute.xlu0 %639  ;;  %p2062_p12 = scmp.ne.s32.totalorder %s2817_s22, %s2061_s5 }
  0x9b   : > { %2031 = vset.pattern.permute.xlu0 %v2194_v57  ;;  %v642_v37 = vsub.f32 %v2478_v35, %v2417_v56  ;;  %v665_v48 = vsub.f32 %v2478_v35, %v2415_v55  ;;  %v246_v55 = vmul.f32 0.125, %v244_v16 }
  0x9c   : > { %1998 = vset.pattern.permute.xlu1 %v2195_v58  ;;  %469 = vperm.xlu0 %2031, %v2335_v2   ;;  %p2063_p13 = pnand %p2062_p12, %p2312_p4 }
  0x9d   : > { %1044 = vperm.xlu1 %1998, %v2335_v2   ;;  %v643_v41 = vand.u32 2147483647, %v642_v37  ;;  %v666_v58 = vand.u32 2147483647, %v665_v48 }
  0x9e   : > { %p2064_p0 = pneg %p2063_p13 }
  0x9f   : > { %v2421_v59 = vpop.permute.xlu1 %670  ;;  %v2423_v60 = vpop.permute.xlu0 %647  ;;  %v644_v54 = vsub.f32 1.0, %v643_v41 }
  0xa0   : > { %2034 = vset.pattern.permute.xlu0 %v2196_v61  ;;  %v650_v38 = vsub.f32 %v2464_v25, %v2423_v60  ;;  %v673_v42 = vsub.f32 %v2464_v25, %v2421_v59  ;;  %v2213_v59 = vmov 91  }
  0xa1   : > { %2000 = vset.pattern.permute.xlu1 %v2197_v62  ;;  %539 = vperm.xlu0 %2034, %v2335_v2  }
  0xa2   : > { %1067 = vperm.xlu1 %2000, %v2335_v2   ;;  %v651_v44 = vand.u32 2147483647, %v650_v38  ;;  %v674_v56 = vand.u32 2147483647, %v673_v42 }
  0xa4   : > { %v2427_v63 = vpop.permute.xlu1 %850  ;;  %v2429_v0 = vpop.permute.xlu0 %858  ;;  %v652_v57 = vsub.f32 1.0, %v651_v44  ;;  %v675_v5 = vsub.f32 1.0, %v674_v56 }
  0xa5   : > { %2037 = vset.pattern.permute.xlu0 %v2198_v1  ;;  %v2215_v1 = vmov 95   ;;  %v861_v42 = vsub.f32 %v2464_v25, %v2429_v0 }
  0xa6   : > { %2001 = vset.pattern.permute.xlu1 %v2199_v3  ;;  %570 = vperm.xlu0 %2037, %v2335_v2   ;;  %v645_v3 = vmax.f32 %v644_v54, 0.0 }
  0xa7   : > { %1075 = vperm.xlu1 %2001, %v2335_v2  }
  0xa9   : > { %v2436_v6 = vpop.permute.xlu1 %873  ;;  %v2438_v7 = vpop.permute.xlu0 %685 }
  0xaa   : > { %994 = vrot.lane.b32.xlu0 %v2433_v4, %s2173_s12  ;;  %v688_v49 = vsub.f32 %v2478_v35, %v2438_v7  ;;  %v653_v7 = vmax.f32 %v652_v57, 0.0  ;;  %v876_v54 = vsub.f32 %v2478_v35, %v2436_v6 }
  0xab   : > { %2002 = vset.pattern.permute.xlu1 %v2200_v9  ;;  %2041 = vset.pattern.permute.xlu0 %v2201_v10 }
  0xac   : > { %1238 = vperm.xlu1 %2002, %v2335_v2   ;;  %v689_v60 = vand.u32 2147483647, %v688_v49 }
  0xae   : > { %v2443_v11 = vpop.permute.xlu1 %881  ;;  %v2445_v12 = vpop.permute.xlu0 %904  ;;  %593 = vperm.xlu0 %2041, %v2335_v2   ;;  %v690_v16 = vsub.f32 1.0, %v689_v60 }
  0xaf   : > { %v884_v44 = vsub.f32 %v2464_v25, %v2443_v11 }
  0xb0   : > { %2004 = vset.pattern.permute.xlu1 %v2202_v14  ;;  %v667_v14 = vsub.f32 1.0, %v666_v58  ;;  %v691_v37 = vmax.f32 %v690_v16, 0.0 }
  0xb1   : > { %1261 = vperm.xlu1 %2004, %v2335_v2  }
  0xb2   : > { %2044 = vset.pattern.permute.xlu0 %v2203_v15  ;;  %v2517_v15 = vfloor.f32 %v246_v55  ;;  %v668_v28 = vmax.f32 %v667_v14, 0.0 }
  0xb3   : > { %v2452_v17 = vpop.permute.xlu1 %693  ;;  %v2454_v18 = vpop.permute.xlu0 %919  ;;  %608 = vperm.xlu0 %2044, %v2335_v2  }
  0xb4   : > { %v696_v50 = vsub.f32 %v2464_v25, %v2452_v17  ;;  %v922_v60 = vsub.f32 %v2478_v35, %v2454_v18 }
  0xb5   : > { %2005 = vset.pattern.permute.xlu1 %v2204_v19 }
  0xb6   : > { %1269 = vperm.xlu1 %2005, %v2335_v2   ;;  %v697_v61 = vand.u32 2147483647, %v696_v50 }
  0xb7   : > { %1330 = vrot.lane.b32.xlu0 %v2373_v31, %s2205_s13 }
  0xb8   : > { %v2460_v21 = vpop.permute.xlu1 %896  ;;  %v2462_v22 = vpop.permute.xlu0 %679  ;;  %2047 = vset.pattern.permute.xlu0 %v2206_v23  ;;  %v698_v17 = vsub.f32 1.0, %v697_v61  ;;  %v676_v23 = vmax.f32 %v675_v5, 0.0 }
  0xb9   : > { %v899_v48 = vsub.f32 %v2478_v35, %v2460_v21  ;;  %v862_v21 = vand.u32 2147483647, %v861_v42 }
  0xba   : > { %2007 = vset.pattern.permute.xlu1 %v2207_v24  ;;  %v699_v38 = vmax.f32 %v698_v17, 0.0  ;;  %v677_v49 = vmul.f32 %v676_v23, %v668_v28  ;;  %v923_v23 = vand.u32 2147483647, %v922_v60 }
  0xbb   : > { %300 = vperm.xlu1 %2007, %v2335_v2   ;;  %486 = vperm.xlu0 %2047, %v2335_v2   ;;  %v900_v61 = vand.u32 2147483647, %v899_v48  ;;  %v863_v16 = vsub.f32 1.0, %v862_v21 }
  0xbc   : > { %v682_v56 = vmul.f32 %v2462_v22, %v677_v49 }
  0xbd   : > { %v2468_v26 = vpop.permute.xlu1 %708  ;;  %v2470_v27 = vpop.permute.xlu0 %702 }
  0xbe   : > { %v711_v8 = vsub.f32 %v2478_v35, %v2468_v26  ;;  %v654_v26 = vmul.f32 %v653_v7, %v645_v3  ;;  %v877_v3 = vand.u32 2147483647, %v876_v54 }
  0xbf   : > { %2008 = vset.pattern.permute.xlu1 %v2208_v29  ;;  %2050 = vset.pattern.permute.xlu0 %v2209_v30  ;;  %v248_v29 = vmul.f32 8.0, %v2517_v15 }
  0xc0   : > { %1090 = vperm.xlu1 %2008, %v2335_v2   ;;  %509 = vperm.xlu0 %2050, %v2335_v2   ;;  %v712_v24 = vand.u32 2147483647, %v711_v8 }
  0xc1   : > { %v2541_v0 = vsub.f32 %v2448_v13, %v248_v29  ;;  %v2218_v13 = vmov 32  }
  0xc2   : > { %v717_v33 = vpop.permute.xlu1 %716  ;;  %v2475_v34 = vpop.permute.xlu0 %260  ;;  %v713_v50 = vsub.f32 1.0, %v712_v24  ;;  %v901_v24 = vsub.f32 1.0, %v900_v61 }
  0xc3   : > { %v719_v62 = vsub.f32 %v2464_v25, %v717_v33  ;;  %v263_v5 = vsub.f32 %v2541_v0, %v2475_v34  ;;  %v2219_v34 = vmov 93  }
  0xc4   : > { %2010 = vset.pattern.permute.xlu1 %v2210_v36  ;;  %1376 = vrot.lane.b32.xlu0 %v2396_v43, %s2205_s13  ;;  %v853_v36 = vsub.f32 %v2478_v35, %v2427_v63  ;;  %v714_v6 = vmax.f32 %v713_v50, 0.0 }
  0xc5   : > { %370 = vperm.xlu1 %2010, %v2335_v2   ;;  %2053 = vset.pattern.permute.xlu0 %v2212_v46  ;;  %v720_v19 = vand.u32 2147483647, %v719_v62  ;;  %v2217_v46 = vmov 70  }
  0xc6   : > { %v854_v11 = vand.u32 2147483647, %v853_v36  ;;  %v264_v36 = vand.u32 2147483647, %v263_v5 }
  0xc7   : > { %v2487_v39 = vpop.permute.xlu1 %927  ;;  %v2489_v40 = vpop.permute.xlu0 %291  ;;  %v721_v41 = vsub.f32 1.0, %v720_v19 }
  0xc8   : > { %625 = vperm.xlu0 %2053, %v2335_v2   ;;  %v930_v22 = vsub.f32 %v2464_v25, %v2487_v39  ;;  %v855_v14 = vsub.f32 1.0, %v854_v11  ;;  %v878_v39 = vsub.f32 1.0, %v877_v3  ;;  %v265_v54 = vsub.f32 1.0, %v264_v36 }
  0xc9   : > { %2011 = vset.pattern.permute.xlu1 %v2211_v45  ;;  %v907_v45 = vsub.f32 %v2464_v25, %v2445_v12  ;;  %v700_v12 = vmul.f32 %v699_v38, %v691_v37  ;;  %v722_v57 = vmax.f32 %v721_v41, 0.0  ;;  %v864_v38 = vmax.f32 %v863_v16, 0.0 }
  0xca   : > { %393 = vperm.xlu1 %2011, %v2335_v2   ;;  %v931_v29 = vand.u32 2147483647, %v930_v22  ;;  %v879_v50 = vmax.f32 %v878_v39, 0.0 }
  0xcb   : > { %v705_v7 = vmul.f32 %v2470_v27, %v700_v12  ;;  %v723_v8 = vmul.f32 %v722_v57, %v714_v6  ;;  %v856_v27 = vmax.f32 %v855_v14, 0.0  ;;  %v266_v6 = vmax.f32 %v265_v54, 0.0 }
  0xcc   : > { %v657_v51 = vpop.permute.xlu1 %656  ;;  %v2501_v52 = vpop.permute.xlu0 %361  ;;  %1186 = vrot.lane.b32.xlu0 %v2504_v53, %s2214_s14 }
  0xcd   : > { %2054 = vset.pattern.permute.xlu0 %v2215_v1  ;;  %v659_v63 = vmul.f32 %v657_v51, %v654_v26  ;;  %v908_v51 = vand.u32 2147483647, %v907_v45  ;;  %v924_v45 = vsub.f32 1.0, %v923_v23 }
  0xce   : > { %2013 = vset.pattern.permute.xlu1 %v2213_v59  ;;  %v885_v59 = vand.u32 2147483647, %v884_v44 }
  0xcf   : > { %1292 = vperm.xlu1 %2013, %v2335_v2   ;;  %v683_v62 = vadd.f32 %v682_v56, %v659_v63  ;;  %v909_v17 = vsub.f32 1.0, %v908_v51  ;;  %v932_v63 = vsub.f32 1.0, %v931_v29  ;;  %v2220_v56 = vmov 11  }
  0xd0   : > { %1188 = vrot.lane.b32.xlu0 %v2433_v4, %s2214_s14  ;;  %v886_v18 = vsub.f32 1.0, %v885_v59  ;;  %v925_v59 = vmax.f32 %v924_v45, 0.0  ;;  %v865_v51 = vmul.f32 %v864_v38, %v856_v27  ;;  %v2223_v29 = vmov 86  }
  0xd1   : > { %v2513_v9 = vpop.permute.xlu1 %867  ;;  %v2515_v10 = vpop.permute.xlu0 %306  ;;  %v706_v26 = vadd.f32 %v705_v7, %v683_v62  ;;  %v910_v44 = vmax.f32 %v909_v17, 0.0  ;;  %v933_v61 = vmax.f32 %v932_v63, 0.0  ;;  %v2227_v63 = vmov 49  }
  0xd2   : > { %v887_v41 = vmax.f32 %v886_v18, 0.0  ;;  %v870_v22 = vmul.f32 %v2513_v9, %v865_v51  ;;  %v2222_v9 = vmov 62  }
  0xd3   : > { %2014 = vset.pattern.permute.xlu1 %v2216_v20  ;;  %v934_v18 = vmul.f32 %v933_v61, %v925_v59 }
  0xd4   : > { %323 = vperm.xlu1 %2014, %v2335_v2   ;;  %v888_v12 = vmul.f32 %v887_v41, %v879_v50 }
  0xd6   : > { %v2523_v30 = vpop.permute.xlu1 %890  ;;  %v2525_v33 = vpop.permute.xlu0 %407 }
  0xd7   : > { %v893_v62 = vmul.f32 %v2523_v30, %v888_v12 }
  0xd8   : > { %2016 = vset.pattern.permute.xlu1 %v2217_v46  ;;  %v902_v46 = vmax.f32 %v901_v24, 0.0 }
  0xd9   : > { %1121 = vperm.xlu1 %2016, %v2335_v2   ;;  %v894_v16 = vadd.f32 %v893_v62, %v870_v22  ;;  %v2229_v22 = vmov 73  }
  0xda   : > { %v911_v60 = vmul.f32 %v910_v44, %v902_v46 }
  0xdb   : > { %v2544_v58 = vpop.permute.xlu1 %913  ;;  %v2546_v55 = vpop.permute.xlu0 %422 }
  0xdc   : > { %v916_v5 = vmul.f32 %v2544_v58, %v911_v60  ;;  %v425_v54 = vsub.f32 %v2541_v0, %v2546_v55 }
  0xdd   : > { %2017 = vset.pattern.permute.xlu1 %v2218_v13 }
  0xde   : > { %416 = vperm.xlu1 %2017, %v2335_v2   ;;  %v426_v12 = vand.u32 2147483647, %v425_v54 }
  0xe0   : > { %v726_v19 = vpop.permute.xlu1 %725  ;;  %v2556_v20 = vpop.permute.xlu0 %1052  ;;  %v427_v51 = vsub.f32 1.0, %v426_v12 }
  0xe1   : > { %v728_v28 = vmul.f32 %v726_v19, %v723_v8  ;;  %v2221_v8 = vmov 35   ;;  %v917_v19 = vadd.f32 %v916_v5, %v894_v16 }
  0xe2   : > { %2018 = vset.pattern.permute.xlu1 %v2219_v34 }
  0xe3   : > { %v729_v37 = vadd.f32 %v728_v28, %v706_v26  ;;  %1307 = vperm.xlu1 %2018, %v2335_v2  }
  0xe4   : > { %v943_v42 = vpop.permute.xlu0 %942 }
  0xe5   : > { %v730_v48 = vpack.c.bf16 %v729_v37, %v729_v37  ;;  %v269_v49 = vpop.permute.xlu1 %268  ;;  %1711 = vmatpush3.bf16.msra.mxu1 %v943_v42  ;;  %v2224_v37 = vmov 89   ;;  %v2225_v42 = vmov 92  }
  0xe6   : > { %v271_v11 = vsub.f32 %v2517_v15, %v269_v49  ;;  %1716 = vmatprep.subr.bf16.mxu1 %v2171_v32 }
  0xe7   : > { %2020 = vset.pattern.permute.xlu1 %v2220_v56  ;;  %1695 = vmatmul.mubr.msk.bf16.vlgmr.msra.gmra.mrb[0].mxu0 %vm737_vm1, %v730_v48  ;;  %v2226_v48 = vmov 48   ;;  %v2228_v56 = vmov 52  }
  0xe8   : > { %v272_v57 = vand.u32 2147483647, %v271_v11  ;;  %346 = vperm.xlu1 %2020, %v2335_v2   ;;  %v2563_v21 = vpop.permute.xlu0 %1246  ;;  %1699 = vmatpush3.bf16.msra.mxu0 %v2396_v43 }
  0xe9   : > { %1700 = vmatprep.subr.bf16.mxu0 %v2171_v32  ;;  %1706 = vmatprep.mubr.msk.bf16.mxu0 %vm2175_vm0, %v2171_v32 }
  0xea   : > { %v273_v13 = vsub.f32 1.0, %v272_v57  ;;  %v2570_v3 = vpop.permute.xlu1 %283  ;;  %v1055_v57 = vsub.f32 %v2464_v25, %v2556_v20 }
  0xec   : > { %v274_v7 = vmax.f32 %v273_v13, 0.0  ;;  %2021 = vset.pattern.permute.xlu1 %v2221_v8  ;;  %1701 = vmatpush3.bf16.msra.mxu0 %v2404_v47  ;;  %v1056_v61 = vand.u32 2147483647, %v1055_v57 }
  0xed   : > { %439 = vperm.xlu1 %2021, %v2335_v2   ;;  %v278_v14 = vpop.permute.xlu0 %277  ;;  %1702 = vmatprep.subr.bf16.mxu0 %v2171_v32 }
  0xee   : > { %v275_v30 = vmul.f32 %v274_v7, %v266_v6  ;;  %v428_v6 = vmax.f32 %v427_v51, 0.0  ;;  %v1057_v5 = vsub.f32 1.0, %v1056_v61 }
  0xef   : > { %v937_v17 = vpop.permute.xlu1 %936 }
  0xf0   : > { %v939_v23 = vmul.f32 %v937_v17, %v934_v18  ;;  %v2577_v24 = vmul.f32 %v278_v14, %v275_v30  ;;  %1703 = vmatpush3.bf16.msra.mxu0 %v2504_v53  ;;  %v1058_v14 = vmax.f32 %v1057_v5, 0.0  ;;  %v2230_v30 = vmov 75  }
  0xf1   : > { %2022 = vset.pattern.permute.xlu1 %v2222_v9  ;;  %1704 = vmatprep.subr.bf16.mxu0 %v2171_v32 }
  0xf2   : > { %v940_v58 = vadd.f32 %v939_v23, %v917_v19  ;;  %1061 = vperm.xlu1 %2022, %v2335_v2   ;;  %v2582_v26 = vpop.permute.xlu0 %1098  ;;  %v1249_v23 = vsub.f32 %v2464_v25, %v2563_v21 }
  0xf4   : > { %v941_v28 = vpack.c.bf16 %v940_v58, %v940_v58  ;;  %v2584_v39 = vpop.permute.xlu1 %353  ;;  %1705 = vmatpush3.bf16.msra.mxu0 %v2433_v4 }
  0xf5   : > { %1728 = vmatprep.subr.bf16.mxu0 %v2171_v32 }
  0xf6   : > { %2024 = vset.pattern.permute.xlu1 %v2223_v29  ;;  %1713 = vmatmul.mubr.msk.bf16.vlgmr.msra.gmra.mrb[0].mxu1 %vm737_vm1, %v941_v28  ;;  %v2231_v29 = vmov 54  }
  0xf7   : > { %1255 = vperm.xlu1 %2024, %v2335_v2   ;;  %v2590_v36 = vpop.permute.xlu0 %1284  ;;  %1724 = vmatprep.mubr.msk.bf16.mxu1 %vm2175_vm0, %v2171_v32 }
  0xf9   : > { %v2594_v34 = vpop.permute.xlu1 %376 }
  0xfb   : > { %2025 = vset.pattern.permute.xlu1 %v2224_v37 }
  0xfc   : > { %1278 = vperm.xlu1 %2025, %v2335_v2   ;;  %v2597_v27 = vpop.permute.xlu0 %1113 }
  0xfe   : > { %v2599_v38 = vpop.permute.xlu1 %384 }
 0x100   : > { %992 = vrot.lane.b32.xlu1 %v2504_v53, %s2173_s12  ;;  %v989_v41 = vpop.permute.xlu0 %988 }
 0x101   : > { %2027 = vset.pattern.permute.xlu1 %v2225_v42  ;;  %1717 = vmatpush3.bf16.msra.mxu1 %v989_v41  ;;  %v1250_v41 = vand.u32 2147483647, %v1249_v23  ;;  %v294_v42 = vsub.f32 %v2517_v15, %v2489_v40  ;;  %v2234_v23 = vmov 57  }
 0x102   : > { %1718 = vmatprep.subr.bf16.mxu1 %v2171_v32 }
 0x103   : > { %v2604_v44 = vpop.permute.xlu1 %314  ;;  %v1251_v12 = vsub.f32 1.0, %v1250_v41 }
 0x104   : > { %1301 = vperm.xlu1 %2027, %v2335_v2   ;;  %v2607_v45 = vpop.permute.xlu0 %1315 }
 0x108   : > { %v2609_v46 = vpop.permute.xlu1 %399  ;;  %2029 = vset.pattern.permute.xlu1 %v2226_v48  ;;  %v991_v49 = vpop.permute.xlu0 %990  ;;  %v286_v48 = vsub.f32 %v2541_v0, %v2570_v3  ;;  %v1252_v3 = vmax.f32 %v1251_v12, 0.0 }
 0x109   : > { %446 = vperm.xlu1 %2029, %v2335_v2   ;;  %1719 = vmatpush3.bf16.msra.mxu1 %v991_v49 }
 0x10a   : > { %1720 = vmatprep.subr.bf16.mxu1 %v2171_v32  ;;  %v287_v51 = vand.u32 2147483647, %v286_v48 }
 0x10d   : > { %v2613_v50 = vpop.permute.xlu1 %329  ;;  %2030 = vset.pattern.permute.xlu1 %v2227_v63 }
 0x10e   : > { %454 = vperm.xlu1 %2030, %v2335_v2  }
 0x112   : > { %v2618_v11 = vpop.permute.xlu1 %337  ;;  %2032 = vset.pattern.permute.xlu1 %v2228_v56  ;;  %v2232_v56 = vmov 55  }
 0x113   : > { %477 = vperm.xlu1 %2032, %v2335_v2  }
 0x117   : > { %v431_v59 = vpop.permute.xlu1 %430  ;;  %2033 = vset.pattern.permute.xlu1 %v2215_v1 }
 0x118   : > { %v433_v60 = vsub.f32 %v2517_v15, %v431_v59  ;;  %1324 = vperm.xlu1 %2033, %v2335_v2   ;;  %v295_v59 = vand.u32 2147483647, %v294_v42 }
 0x11a   : > { %v434_v55 = vand.u32 2147483647, %v433_v60  ;;  %v296_v5 = vsub.f32 1.0, %v295_v59 }
 0x11c   : > { %v435_v62 = vsub.f32 1.0, %v434_v55  ;;  %v1045_v13 = vpop.permute.xlu1 %1044  ;;  %2035 = vset.pattern.permute.xlu1 %v2229_v22  ;;  %v1085_v55 = vpop.permute.xlu0 %1084  ;;  %v2233_v22 = vmov 78  }
 0x11d   : > { %v1047_v7 = vsub.f32 %v2478_v35, %v1045_v13  ;;  %547 = vperm.xlu1 %2035, %v2335_v2  }
 0x11e   : > { %v436_v20 = vmax.f32 %v435_v62, 0.0 }
 0x11f   : > { %v1048_v8 = vand.u32 2147483647, %v1047_v7  ;;  %v288_v7 = vsub.f32 1.0, %v287_v51 }
 0x120   : > { %v2628_v1 = vmul.f32 %v436_v20, %v428_v6 }
 0x121   : > { %v1049_v16 = vsub.f32 1.0, %v1048_v8  ;;  %v1068_v18 = vpop.permute.xlu1 %1067  ;;  %2036 = vset.pattern.permute.xlu1 %v2230_v30  ;;  %v297_v30 = vmax.f32 %v296_v5, 0.0 }
 0x122   : > { %v1070_v17 = vsub.f32 %v2478_v35, %v1068_v18  ;;  %562 = vperm.xlu1 %2036, %v2335_v2  }
 0x123   : > { %v1050_v19 = vmax.f32 %v1049_v16, 0.0 }
 0x124   : > { %v1071_v9 = vand.u32 2147483647, %v1070_v17  ;;  %v289_v17 = vmax.f32 %v288_v7, 0.0  ;;  %v1108_v7 = vpop.permute.xlu0 %1107 }
 0x125   : > { %v2634_v58 = vmul.f32 %v1058_v14, %v1050_v19 }
 0x126   : > { %v1076_v28 = vpop.permute.xlu1 %1075  ;;  %2038 = vset.pattern.permute.xlu1 %v2231_v29  ;;  %v1072_v49 = vsub.f32 1.0, %v1071_v9  ;;  %v298_v41 = vmul.f32 %v297_v30, %v289_v17  ;;  %v379_v30 = vsub.f32 %v2541_v0, %v2594_v34 }
 0x127   : > { %v1078_v37 = vsub.f32 %v2464_v25, %v1076_v28  ;;  %492 = vperm.xlu1 %2038, %v2335_v2   ;;  %v1101_v28 = vsub.f32 %v2464_v25, %v2582_v26  ;;  %v2236_v26 = vmov 82  }
 0x128   : > { %v1073_v60 = vmax.f32 %v1072_v49, 0.0  ;;  %v2235_v49 = vmov 58  }
 0x129   : > { %v1079_v63 = vand.u32 2147483647, %v1078_v37 }
 0x12b   : > { %v1080_v21 = vsub.f32 1.0, %v1079_v63  ;;  %v1239_v54 = vpop.permute.xlu1 %1238  ;;  %2039 = vset.pattern.permute.xlu1 %v2232_v56 }
 0x12c   : > { %v1241_v57 = vsub.f32 %v2478_v35, %v1239_v54  ;;  %500 = vperm.xlu1 %2039, %v2335_v2   ;;  %v2648_v2 = vld [vmem:[%s2332_s8] sm:$0xff]  ;;  %s2244_s8 = smov 16  }
 0x12d   : > { %v1081_v61 = vmax.f32 %v1080_v21, 0.0  ;;  %v1102_v21 = vand.u32 2147483647, %v1101_v28  ;;  %v2238_v28 = vmov 74  }
 0x12e   : > { %v1242_v40 = vand.u32 2147483647, %v1241_v57 }
 0x12f   : > { %v1082_v6 = vmul.f32 %v1081_v61, %v1073_v60  ;;  %v1103_v51 = vsub.f32 1.0, %v1102_v21  ;;  %v309_v61 = vsub.f32 %v2541_v0, %v2515_v10  ;;  %v387_v10 = vsub.f32 %v2517_v15, %v2599_v38 }
 0x130   : > { %v1243_v62 = vsub.f32 1.0, %v1242_v40  ;;  %v1262_v13 = vpop.permute.xlu1 %1261  ;;  %2040 = vset.pattern.permute.xlu1 %v2233_v22  ;;  %v317_v40 = vsub.f32 %v2517_v15, %v2604_v44  ;;  %v410_v38 = vsub.f32 %v2517_v15, %v2525_v33  ;;  %v1116_v33 = vsub.f32 %v2478_v35, %v2597_v27 }
 0x131   : > { %v1264_v20 = vsub.f32 %v2478_v35, %v1262_v13  ;;  %v2645_v8 = vmul.f32 %v1085_v55, %v1082_v6  ;;  %585 = vperm.xlu1 %2040, %v2648_v2   ;;  %v1104_v6 = vmax.f32 %v1103_v51, 0.0  ;;  %v2237_v13 = vmov 50  }
 0x132   : > { %v1244_v14 = vmax.f32 %v1243_v62, 0.0  ;;  %v310_v62 = vand.u32 2147483647, %v309_v61  ;;  %v318_v22 = vand.u32 2147483647, %v317_v40  ;;  %v2239_v21 = vmov 77  }
 0x133   : > { %v1265_v16 = vand.u32 2147483647, %v1264_v20  ;;  %v364_v20 = vsub.f32 %v2517_v15, %v2501_v52 }
 0x134   : > { %v2651_v18 = vmul.f32 %v1252_v3, %v1244_v14  ;;  %v311_v14 = vsub.f32 1.0, %v310_v62  ;;  %v319_v17 = vsub.f32 1.0, %v318_v22  ;;  %v340_v62 = vsub.f32 %v2517_v15, %v2618_v11 }
 0x135   : > { %v1270_v19 = vpop.permute.xlu1 %1269  ;;  %2042 = vset.pattern.permute.xlu1 %v2234_v23  ;;  %v1266_v29 = vsub.f32 1.0, %v1265_v16  ;;  %v388_v23 = vand.u32 2147483647, %v387_v10  ;;  %v365_v52 = vand.u32 2147483647, %v364_v20 }
 0x136   : > { %v1272_v9 = vsub.f32 %v2464_v25, %v1270_v19  ;;  %515 = vperm.xlu1 %2042, %v2648_v2  }
 0x137   : > { %v1267_v54 = vmax.f32 %v1266_v29, 0.0  ;;  %v312_v29 = vmax.f32 %v311_v14, 0.0 }
 0x138   : > { %v1273_v37 = vand.u32 2147483647, %v1272_v9  ;;  %v402_v9 = vsub.f32 %v2541_v0, %v2609_v46 }
 0x13a   : > { %v1274_v42 = vsub.f32 1.0, %v1273_v37  ;;  %v301_v48 = vpop.permute.xlu1 %300  ;;  %2043 = vset.pattern.permute.xlu1 %v2235_v49  ;;  %v380_v37 = vand.u32 2147483647, %v379_v30  ;;  %v403_v49 = vand.u32 2147483647, %v402_v9 }
 0x13b   : > { %v303_v63 = vmul.f32 %v301_v48, %v298_v41  ;;  %523 = vperm.xlu1 %2043, %v2648_v2   ;;  %v320_v41 = vmax.f32 %v319_v17, 0.0  ;;  %v389_v48 = vsub.f32 1.0, %v388_v23 }
 0x13c   : > { %v1275_v56 = vmax.f32 %v1274_v42, 0.0  ;;  %v411_v42 = vand.u32 2147483647, %v410_v38 }
 0x13d   : > { %v2659_v12 = vadd.f32 %v303_v63, %v2577_v24  ;;  %v366_v63 = vsub.f32 1.0, %v365_v52  ;;  %v390_v51 = vmax.f32 %v389_v48, 0.0  ;;  %v1131_v48 = vpop.permute.xlu0 %1130 }
 0x13e   : > { %v2661_v57 = vmul.f32 %v1275_v56, %v1267_v54  ;;  %v381_v54 = vsub.f32 1.0, %v380_v37  ;;  %v321_v56 = vmul.f32 %v320_v41, %v312_v29 }
 0x13f   : > { %v1091_v59 = vpop.permute.xlu1 %1090  ;;  %2045 = vset.pattern.permute.xlu1 %v2236_v26  ;;  %v412_v26 = vsub.f32 1.0, %v411_v42  ;;  %v367_v40 = vmax.f32 %v366_v63, 0.0 }
 0x140   : > { %v1093_v60 = vsub.f32 %v2478_v35, %v1091_v59  ;;  %616 = vperm.xlu1 %2045, %v2648_v2  }
 0x141   : > { %v413_v22 = vmax.f32 %v412_v26, 0.0 }
 0x142   : > { %v1094_v55 = vand.u32 2147483647, %v1093_v60  ;;  %v404_v60 = vsub.f32 1.0, %v403_v49 }
 0x144   : > { %v1095_v24 = vsub.f32 1.0, %v1094_v55  ;;  %v2669_v3 = vpop.permute.xlu1 %370  ;;  %1136 = vrot.lane.b32.xlu1 %v2373_v31, %s2214_s14  ;;  %v356_v31 = vsub.f32 %v2541_v0, %v2584_v39  ;;  %v1117_v55 = vand.u32 2147483647, %v1116_v33  ;;  %v2707_v33 = vpop.permute.xlu0 %469 }
 0x145   : > { %2046 = vset.pattern.permute.xlu1 %v2237_v13  ;;  %v2240_v13 = vmov 80  }
 0x146   : > { %v1096_v5 = vmax.f32 %v1095_v24, 0.0  ;;  %v357_v39 = vand.u32 2147483647, %v356_v31  ;;  %v382_v24 = vmax.f32 %v381_v54, 0.0  ;;  %v1118_v20 = vsub.f32 1.0, %v1117_v55 }
 0x147   : > { %v341_v31 = vand.u32 2147483647, %v340_v62 }
 0x148   : > { %463 = vperm.xlu1 %2046, %v2648_v2   ;;  %v1105_v44 = vmul.f32 %v1104_v6, %v1096_v5  ;;  %v358_v46 = vsub.f32 1.0, %v357_v39  ;;  %v405_v5 = vmax.f32 %v404_v60, 0.0  ;;  %v391_v10 = vmul.f32 %v390_v51, %v382_v24 }
 0x149   : > { %v394_v16 = vpop.permute.xlu1 %393  ;;  %v1119_v23 = vmax.f32 %v1118_v20, 0.0  ;;  %v342_v52 = vsub.f32 1.0, %v341_v31  ;;  %v2241_v39 = vmov 59  }
 0x14a   : > { %v2682_v19 = vmul.f32 %v1108_v7, %v1105_v44  ;;  %v359_v6 = vmax.f32 %v358_v46, 0.0  ;;  %v332_v7 = vsub.f32 %v2541_v0, %v2613_v50  ;;  %v396_v11 = vmul.f32 %v394_v16, %v391_v10 }
 0x14b   : > { %v414_v38 = vmul.f32 %v413_v22, %v405_v5  ;;  %v343_v49 = vmax.f32 %v342_v52, 0.0 }
 0x14c   : > { %2048 = vset.pattern.permute.xlu1 %v2238_v28  ;;  %v368_v30 = vmul.f32 %v367_v40, %v359_v6  ;;  %v333_v17 = vand.u32 2147483647, %v332_v7 }
 0x14d   : > { %556 = vperm.xlu1 %2048, %v2648_v2  }
 0x14e   : > { %v2689_v34 = vpop.permute.xlu1 %1292  ;;  %v334_v41 = vsub.f32 1.0, %v333_v17 }
 0x14f   : > { %v1295_v40 = vsub.f32 %v2464_v25, %v2689_v34 }
 0x151   : > { %2049 = vset.pattern.permute.xlu1 %v2239_v21  ;;  %v1296_v24 = vand.u32 2147483647, %v1295_v40 }
 0x152   : > { %579 = vperm.xlu1 %2049, %v2648_v2  }
 0x153   : > { %v324_v59 = vpop.permute.xlu1 %323  ;;  %v1297_v7 = vsub.f32 1.0, %v1296_v24 }
 0x154   : > { %v326_v61 = vmul.f32 %v324_v59, %v321_v56 }
 0x156   : > { %v327_v27 = vadd.f32 %v326_v61, %v2659_v12  ;;  %1182 = vrot.lane.b32.xlu1 %v2396_v43, %s2214_s14  ;;  %v373_v43 = vmul.f32 %v2669_v3, %v368_v30  ;;  %v335_v3 = vmax.f32 %v334_v41, 0.0 }
 0x157   : > { %2051 = vset.pattern.permute.xlu1 %v2240_v13 }
 0x158   : > { %v1122_v44 = vpop.permute.xlu1 %1121  ;;  %v397_v50 = vadd.f32 %v396_v11, %v373_v43  ;;  %v344_v21 = vmul.f32 %v343_v49, %v335_v3 }
 0x159   : > { %v1124_v14 = vsub.f32 %v2464_v25, %v1122_v44 }
 0x15a   : > { %602 = vperm.xlu1 %2051, %v2648_v2  }
 0x15b   : > { %v1125_v12 = vand.u32 2147483647, %v1124_v14 }
 0x15d   : > { %v1126_v9 = vsub.f32 1.0, %v1125_v12  ;;  %v417_v28 = vpop.permute.xlu1 %416 }
 0x15e   : > { %v419_v29 = vmul.f32 %v417_v28, %v414_v38  ;;  %2052 = vset.pattern.permute.xlu1 %v2241_v39 }
 0x15f   : > { %v1127_v37 = vmax.f32 %v1126_v9, 0.0  ;;  %532 = vperm.xlu1 %2052, %v2648_v2   ;;  %v2713_v2 = vpop.permute.xlu0 %539 }
 0x160   : > { %v420_v16 = vadd.f32 %v419_v29, %v397_v50 }
 0x161   : > { %v1128_v42 = vmul.f32 %v1127_v37, %v1119_v23 }
 0x162   : > { %v1308_v63 = vpop.permute.xlu1 %1307 }
 0x163   : > { %1184 = vrot.lane.b32.xlu1 %v2404_v47, %s2214_s14  ;;  %v2721_v61 = vpop.permute.xlu0 %570  ;;  %v1133_v62 = vmul.f32 %v1131_v48, %v1128_v42  ;;  %s1656_s14 = sshll.u32 %s2131_s18, 7  ;;  %s2246_s18 = smov [#allocation2]  }
 0x164   : > { %s2065_s6 = sshll.u32 %s2246_s18, 4  ;;  %s2066_s6 = int_to_ptr.vmem [resolvable:$false] %s2065_s6 }
 0x165   : > { %s2067_s7 = scalar_lea.vmem %s2066_s6, 256  ;;  %p2068_p1 = scmp.lt.s32.totalorder %s2817_s22, %s2066_s6 }
 0x166   : > { %p2069_p2 = scmp.lt.s32.totalorder %s2067_s7, %s2061_s5 }
 0x167   : > { %v347_v46 = vpop.permute.xlu1 %346  ;;  %1378 = vrot.lane.b32.xlu1 %v2404_v47, %s2205_s13  ;;  %v995_v13 = vpop.permute.xlu0 %994 }
 0x168   : > { %v349_v54 = vmul.f32 %v347_v46, %v344_v21  ;;  %p2070_p3 = por %p2069_p2, %p2068_p1 }
 0x16a   : > { %v350_v56 = vadd.f32 %v349_v54, %v327_v27  ;;  %p2071_p5 = pnand %p2070_p3, %p2064_p0 }
 0x16b   : > { %1380 = vrot.lane.b32.xlu1 %v2504_v53, %s2205_s13  ;;  %v1287_v53 = vsub.f32 %v2478_v35, %v2590_v36  ;;  %v2732_v36 = vpop.permute.xlu0 %593 }
 0x16c   : > { %v351_v59 = vpack.c.bf16 %v350_v56, %v350_v56  ;;  %v440_v26 = vpop.permute.xlu1 %439 }
 0x16d   : > { %v442_v51 = vmul.f32 %v440_v26, %v2628_v1  ;;  %v1288_v6 = vand.u32 2147483647, %v1287_v53 }
 0x16e   : > { %1707 = vmatmul.mubr.msk.bf16.vlgmr.msra.gmra.mrb[0].mxu0 %vm805_vm2, %v351_v59 }
 0x16f   : > { %v443_v60 = vadd.f32 %v442_v51, %v420_v16  ;;  %1382 = vrot.lane.b32.xlu1 %v2433_v4, %s2205_s13  ;;  %1730 = vmatprep.mubr.msk.bf16.mxu0 %vm2175_vm0, %v2171_v32  ;;  %v1289_v5 = vsub.f32 1.0, %v1288_v6 }
 0x171   : > { %v1062_v47 = vpop.permute.xlu1 %1061  ;;  %v1290_v44 = vmax.f32 %v1289_v5, 0.0  ;;  %v444_v12 = vpack.c.bf16 %v443_v60, %v443_v60 }
 0x172   : > { %v1064_v1 = vmul.f32 %v1062_v47, %v2634_v58 }
 0x174   : > { %v1088_v55 = vadd.f32 %v2645_v8, %v1064_v1  ;;  %v1298_v8 = vmax.f32 %v1297_v7, 0.0 }
 0x176   : > { %v1111_v4 = vadd.f32 %v2682_v19, %v1088_v55  ;;  %v1256_v27 = vpop.permute.xlu1 %1255  ;;  %v2737_v19 = vpop.permute.xlu0 %608  ;;  %v1299_v31 = vmul.f32 %v1298_v8, %v1290_v44 }
 0x177   : > { %v1258_v34 = vmul.f32 %v1256_v27, %v2651_v18  ;;  %v1318_v18 = vsub.f32 %v2464_v25, %v2607_v45  ;;  %v472_v25 = vsub.f32 %v2541_v0, %v2707_v33 }
 0x178   : > { %v2730_v22 = vadd.f32 %v1133_v62, %v1111_v4 }
 0x179   : > { %v1319_v9 = vand.u32 2147483647, %v1318_v18  ;;  %v473_v39 = vand.u32 2147483647, %v472_v25 }
 0x17a   : > { %v1331_v43 = vpop.permute.xlu0 %1330  ;;  %v1135_v18 = vpack.c.bf16 %v2730_v22, %v2730_v22 }
 0x17b   : > { %v1279_v10 = vpop.permute.xlu1 %1278  ;;  %v1320_v52 = vsub.f32 1.0, %v1319_v9 }
 0x17c   : > { %v1281_v58 = vmul.f32 %v1279_v10, %v2661_v57  ;;  %v1310_v57 = vsub.f32 %v2478_v35, %v1308_v63  ;;  %v474_v63 = vsub.f32 1.0, %v473_v39 }
 0x17d   : > { %v1321_v16 = vmax.f32 %v1320_v52, 0.0 }
 0x17e   : > { %v1282_v20 = vadd.f32 %v1281_v58, %v1258_v34  ;;  %v1311_v28 = vand.u32 2147483647, %v1310_v57  ;;  %v487_v56 = vpop.permute.xlu0 %486  ;;  %v475_v26 = vmax.f32 %v474_v63, 0.0  ;;  %v542_v34 = vsub.f32 %v2541_v0, %v2713_v2 }
 0x17f   : > { %v993_v14 = vpop.permute.xlu1 %992  ;;  %v573_v58 = vsub.f32 %v2517_v15, %v2721_v61  ;;  %v596_v61 = vsub.f32 %v2517_v15, %v2732_v36 }
 0x180   : > { %1721 = vmatpush3.bf16.msra.mxu1 %v993_v14  ;;  %v1312_v50 = vsub.f32 1.0, %v1311_v28  ;;  %v543_v14 = vand.u32 2147483647, %v542_v34 }
 0x181   : > { %1722 = vmatprep.subr.bf16.mxu1 %v2171_v32  ;;  %v597_v52 = vand.u32 2147483647, %v596_v61 }
 0x182   : > { %v1313_v42 = vmax.f32 %v1312_v50, 0.0  ;;  %v2752_v1 = vpop.permute.xlu0 %509  ;;  %v544_v2 = vsub.f32 1.0, %v543_v14 }
 0x183   : > { %v1302_v30 = vpop.permute.xlu1 %1301 }
 0x184   : > { %v1304_v11 = vmul.f32 %v1302_v30, %v1299_v31  ;;  %1723 = vmatpush3.bf16.msra.mxu1 %v995_v13  ;;  %v1322_v33 = vmul.f32 %v1321_v16, %v1313_v42  ;;  %v574_v31 = vand.u32 2147483647, %v573_v58  ;;  %v598_v16 = vsub.f32 1.0, %v597_v52 }
 0x185   : > { %1746 = vmatprep.subr.bf16.mxu1 %v2171_v32 }
 0x186   : > { %v1305_v17 = vadd.f32 %v1304_v11, %v1282_v20  ;;  %v1377_v62 = vpop.permute.xlu0 %1376  ;;  %v575_v57 = vsub.f32 1.0, %v574_v31 }
 0x187   : > { %1725 = vmatmul.mubr.msk.bf16.vlgmr.msra.gmra.mrb[0].mxu1 %vm805_vm2, %v444_v12 }
 0x188   : > { %v447_v38 = vpop.permute.xlu1 %446  ;;  %1747 = vmatpush3.bf16.msra.mxu1 %v1331_v43  ;;  %1748 = vmatprep.mubr.msk.bf16.mxu1 %vm2175_vm0, %v2171_v32  ;;  %v576_v36 = vmax.f32 %v575_v57, 0.0 }
 0x189   : > { %v449_v23 = vsub.f32 %v2541_v0, %v447_v38  ;;  %1752 = vmatprep.subr.bf16.mxu1 %v2171_v32 }
 0x18b   : > { %v450_v45 = vand.u32 2147483647, %v449_v23 }
 0x18d   : > { %v455_v35 = vpop.permute.xlu1 %454  ;;  %v451_v37 = vsub.f32 1.0, %v450_v45 }
 0x18e   : > { %v457_v29 = vsub.f32 %v2517_v15, %v455_v35  ;;  %v545_v35 = vmax.f32 %v544_v2, 0.0 }
 0x18f   : > { %v452_v21 = vmax.f32 %v451_v37, 0.0 }
 0x190   : > { %v458_v41 = vand.u32 2147483647, %v457_v29 }
 0x192   : > { %v459_v48 = vsub.f32 1.0, %v458_v41  ;;  %v478_v49 = vpop.permute.xlu1 %477 }
 0x193   : > { %v480_v3 = vsub.f32 %v2517_v15, %v478_v49 }
 0x194   : > { %v460_v46 = vmax.f32 %v459_v48, 0.0 }
 0x195   : > { %v481_v54 = vand.u32 2147483647, %v480_v3 }
 0x196   : > { %v461_v59 = vmul.f32 %v460_v46, %v452_v21 }
 0x197   : > { %v482_v51 = vsub.f32 1.0, %v481_v54  ;;  %v1325_v60 = vpop.permute.xlu1 %1324 }
 0x198   : > { %v1327_v47 = vmul.f32 %v1325_v60, %v1322_v33 }
 0x199   : > { %v483_v53 = vmax.f32 %v482_v51, 0.0 }
 0x19a   : > { %v1328_v40 = vadd.f32 %v1327_v47, %v1305_v17  ;;  %v611_v17 = vsub.f32 %v2541_v0, %v2737_v19 }
 0x19b   : > { %v484_v55 = vmul.f32 %v483_v53, %v475_v26  ;;  %v599_v26 = vmax.f32 %v598_v16, 0.0 }
 0x19c   : > { %v1329_v6 = vpack.c.bf16 %v1328_v40, %v1328_v40  ;;  %v548_v24 = vpop.permute.xlu1 %547  ;;  %v612_v50 = vand.u32 2147483647, %v611_v17 }
 0x19d   : > { %v550_v44 = vsub.f32 %v2517_v15, %v548_v24  ;;  %v489_v38 = vmul.f32 %v487_v56, %v484_v55 }
 0x19e   : > { %1749 = vmatmul.mubr.msk.bf16.vlgmr.msra.gmra.mrb[4].mxu1 %vm737_vm1, %v1329_v6  ;;  %v613_v42 = vsub.f32 1.0, %v612_v50 }
 0x19f   : > { %1753 = vmatpush3.bf16.msra.mxu1 %v1377_v62  ;;  %1760 = vmatprep.mubr.msk.bf16.mxu1 %vm2175_vm0, %v2171_v32  ;;  %v551_v30 = vand.u32 2147483647, %v550_v44 }
 0x1a0   : > { %1754 = vmatprep.subr.bf16.mxu1 %v2171_v32  ;;  %v614_v51 = vmax.f32 %v613_v42, 0.0 }
 0x1a1   : > { %v563_v4 = vpop.permute.xlu1 %562  ;;  %v552_v43 = vsub.f32 1.0, %v551_v30 }
 0x1a2   : > { %v565_v20 = vsub.f32 %v2541_v0, %v563_v4 }
 0x1a3   : > { %v553_v19 = vmax.f32 %v552_v43, 0.0 }
 0x1a4   : > { %v566_v12 = vand.u32 2147483647, %v565_v20 }
 0x1a5   : > { %v554_v3 = vmul.f32 %v553_v19, %v545_v35  ;;  %v1448_v19 = vld [vmem:[%s2865_s2] sm:$0xff] }
 0x1a6   : > { %v493_v27 = vpop.permute.xlu1 %492  ;;  %v567_v9 = vsub.f32 1.0, %v566_v12 }
 0x1a7   : > { %v495_v54 = vsub.f32 %v2541_v0, %v493_v27 }
 0x1a8   : > { %v568_v29 = vmax.f32 %v567_v9, 0.0 }
 0x1a9   : > { %v496_v24 = vand.u32 2147483647, %v495_v54 }
 0x1aa   : > { %v577_v21 = vmul.f32 %v576_v36, %v568_v29  ;;  %v1449_v29 = vld [vmem:[%s2865_s2 + $0x8] sm:$0xff] }
 0x1ab   : > { %v501_v13 = vpop.permute.xlu1 %500  ;;  %v497_v34 = vsub.f32 1.0, %v496_v24 }
 0x1ac   : > { %v503_v48 = vsub.f32 %v2517_v15, %v501_v13 }
 0x1ad   : > { %v498_v14 = vmax.f32 %v497_v34, 0.0 }
 0x1ae   : > { %v504_v60 = vand.u32 2147483647, %v503_v48  ;;  %v1450_v48 = vld [vmem:[%s2865_s2 + $0x10] sm:$0xff] }
 0x1b0   : > { %v586_v5 = vpop.permute.xlu1 %585  ;;  %v505_v4 = vsub.f32 1.0, %v504_v60 }
 0x1b1   : > { %v588_v28 = vsub.f32 %v2541_v0, %v586_v5  ;;  %v626_v5 = vpop.permute.xlu0 %625 }
 0x1b3   : > { %v589_v39 = vand.u32 2147483647, %v588_v28 }
 0x1b5   : > { %v2758_v7 = vpop.permute.xlu1 %515  ;;  %v590_v49 = vsub.f32 1.0, %v589_v39  ;;  %v1187_v61 = vpop.permute.xlu0 %1186  ;;  %v2242_v39 = vmov 0.0|0.0  }
 0x1b6   : > { %v518_v53 = vsub.f32 %v2541_v0, %v2758_v7 }
 0x1b7   : > { %v591_v47 = vmax.f32 %v590_v49, 0.0  ;;  %v1451_v49 = vld [vmem:[%s2865_s2 + $0x18] sm:$0xff] }
 0x1b8   : > { %v519_v27 = vand.u32 2147483647, %v518_v53 }
 0x1b9   : > { %v600_v13 = vmul.f32 %v599_v26, %v591_v47  ;;  %v1189_v28 = vpop.permute.xlu0 %1188 }
 0x1ba   : > { %v524_v10 = vpop.permute.xlu1 %523  ;;  %v520_v20 = vsub.f32 1.0, %v519_v27 }
 0x1bb   : > { %v526_v33 = vsub.f32 %v2517_v15, %v524_v10 }
 0x1bc   : > { %v521_v12 = vmax.f32 %v520_v20, 0.0 }
 0x1bd   : > { %v527_v62 = vand.u32 2147483647, %v526_v33 }
 0x1bf   : > { %v617_v8 = vpop.permute.xlu1 %616  ;;  %v528_v58 = vsub.f32 1.0, %v527_v62 }
 0x1c0   : > { %v619_v22 = vsub.f32 %v2517_v15, %v617_v8  ;;  %v506_v8 = vmax.f32 %v505_v4, 0.0 }
 0x1c1   : > { %v529_v31 = vmax.f32 %v528_v58, 0.0 }
 0x1c2   : > { %v620_v37 = vand.u32 2147483647, %v619_v22 }
 0x1c3   : > { %v1137_v11 = vpop.permute.xlu1 %1136  ;;  %v530_v2 = vmul.f32 %v529_v31, %v521_v12 }
 0x1c4   : > { %1729 = vmatpush3.bf16.msra.mxu0 %v1137_v11  ;;  %v621_v63 = vsub.f32 1.0, %v620_v37  ;;  %v1776_v37 = vpack.c.bf16 %v1449_v29, %v1448_v19 }
 0x1c5   : > { %1734 = vmatprep.subr.bf16.mxu0 %v2171_v32 }
 0x1c6   : > { %v622_v40 = vmax.f32 %v621_v63, 0.0  ;;  %v1779_v63 = vpack.c.bf16 %v1451_v49, %v1450_v48 }
 0x1c7   : > { %v464_v23 = vpop.permute.xlu1 %463  ;;  %1731 = vmatmul.mubr.msk.bf16.vlgmr.msra.gmra.mrb[4].mxu0 %vm737_vm1, %v1135_v18  ;;  %v507_v18 = vmul.f32 %v506_v8, %v498_v14 }
 0x1c8   : > { %v466_v25 = vmul.f32 %v464_v23, %v461_v59  ;;  %1742 = vmatprep.mubr.msk.bf16.mxu0 %vm2175_vm0, %v2171_v32  ;;  %v623_v15 = vmul.f32 %v622_v40, %v614_v51 }
 0x1c9   : > { %v512_v17 = vmul.f32 %v2752_v1, %v507_v18 }
 0x1ca   : > { %v490_v45 = vadd.f32 %v489_v38, %v466_v25  ;;  %v628_v0 = vmul.f32 %v626_v5, %v623_v15 }
 0x1cc   : > { %v557_v41 = vpop.permute.xlu1 %556  ;;  %v513_v38 = vadd.f32 %v512_v17, %v490_v45 }
 0x1cd   : > { %v559_v56 = vmul.f32 %v557_v41, %v554_v3 }
 0x1d1   : > { %v580_v46 = vpop.permute.xlu1 %579 }
 0x1d2   : > { %v582_v59 = vmul.f32 %v580_v46, %v577_v21 }
 0x1d4   : > { %v583_v55 = vadd.f32 %v582_v59, %v559_v56 }
 0x1d5   : > { %v1183_v6 = vpop.permute.xlu1 %1182 }
 0x1d6   : > { %1735 = vmatpush3.bf16.msra.mxu0 %v1183_v6  ;;  %v1653_v6 = vld [vmem:[%s2866_s3] ss:$0 sm:$0xff] }
 0x1d7   : > { %1736 = vmatprep.subr.bf16.mxu0 %v2171_v32 }
 0x1d9   : > { %v603_v10 = vpop.permute.xlu1 %602 }
 0x1da   : > { %v605_v44 = vmul.f32 %v603_v10, %v600_v13 }
 0x1dc   : > { %v606_v7 = vadd.f32 %v605_v44, %v583_v55 }
 0x1de   : > { %v629_v30 = vadd.f32 %v628_v0, %v606_v7  ;;  %v533_v11 = vpop.permute.xlu1 %532 }
 0x1df   : > { %v535_v43 = vmul.f32 %v533_v11, %v530_v2 }
 0x1e0   : > { %v630_v45 = vpack.c.bf16 %v629_v30, %v629_v30 }
 0x1e1   : > { %v536_v9 = vadd.f32 %v535_v43, %v513_v38 }
 0x1e2   : > { %v1185_v57 = vpop.permute.xlu1 %1184 }
 0x1e3   : > { %1737 = vmatpush3.bf16.msra.mxu0 %v1185_v57  ;;  %v537_v25 = vpack.c.bf16 %v536_v9, %v536_v9 }
 0x1e4   : > { %1738 = vmatprep.subr.bf16.mxu0 %v2171_v32 }
 0x1e6   : > { %v1379_v23 = vpop.permute.xlu1 %1378 }
 0x1e7   : > { %1739 = vmatpush3.bf16.msra.mxu0 %v1187_v61  ;;  %1755 = vmatpush3.bf16.msra.mxu1 %v1379_v23 }
 0x1e8   : > { %1756 = vmatprep.subr.bf16.mxu1 %v2171_v32  ;;  %1740 = vmatprep.subr.bf16.mxu0 %v2171_v32 }
 0x1ea   : > { %v1381_v22 = vpop.permute.xlu1 %1380 }
 0x1eb   : > { %1741 = vmatpush3.bf16.msra.mxu0 %v1189_v28  ;;  %1757 = vmatpush3.bf16.msra.mxu1 %v1381_v22 }
 0x1ec   : > { %1758 = vmatprep.subr.bf16.mxu1 %v2171_v32  ;;  %1775 = vmatprep.subr.bf16.mxu0 %v2242_v39 }
 0x1ee   : > { %v1383_v1 = vpop.permute.xlu1 %1382  ;;  %1743 = vmatmul.mubr.msk.bf16.vlgmr.msra.gmra.mrb[4].mxu0 %vm805_vm2, %v537_v25 }
 0x1ef   : > { %1759 = vmatpush3.bf16.msra.mxu1 %v1383_v1  ;;  %1772 = vmatprep.mubr.msk.f32.mxu0 %vm2175_vm0, %v2171_v32 }
 0x1f0   : > { %1777 = vmatpush3.bf16.msra.mxu0 %v1776_v37 }
 0x1f1   : > { %1778 = vmatprep.subr.bf16.mxu0 %v2242_v39 }
 0x1f2   : > { %1761 = vmatmul.mubr.msk.bf16.vlgmr.msra.gmra.mrb[4].mxu1 %vm805_vm2, %v630_v45 }
 0x1f4   : > { %1780 = vmatpush3.bf16.msra.mxu0 %v1779_v63 }
 0x241   : > { %v843_v35 = vpop.f32.mrb[0].mxu0 }
 0x242   : > { %v1708_v36 = vpop.f32.mrb[1].mxu0 }
 0x243   : > { %v846_v52 = vpop.f32.mrb[2].mxu0 }
 0x244   : > { %v1709_v50 = vpop.f32.mrb[3].mxu0 }
 0x25a   : > { %v1037_v32 = vpop.f32.mrb[0].mxu1 }
 0x25b   : > { %1432 = vrot.lane.b32.xlu0 %v1037_v32, %s2243_s29  ;;  %v1726_v41 = vpop.f32.mrb[1].mxu1  ;;  %s2815_s29 = scalar_lea.hbm %s2867_s4, %s1656_s14 }
 0x25c   : > { %v1040_v16 = vpop.f32.mrb[2].mxu1 }
 0x25d   : > { %v1727_v42 = vpop.f32.mrb[3].mxu1 }
 0x2c1   : > { %v1231_v3 = vpop.f32.mrb[4].mxu0 }
 0x2c2   : > { %1436 = vrot.lane.b32.xlu1 %v1231_v3, %s2244_s8  ;;  %v1744_v21 = vpop.f32.mrb[5].mxu0 }
 0x2c3   : > { %v1234_v46 = vpop.f32.mrb[6].mxu0 }
 0x2c4   : > { %v1745_v54 = vpop.f32.mrb[7].mxu0 }
 0x2c5   : > { %v1425_v33 = vpop.f32.mrb[4].mxu1 }
 0x2c6   : > { %1440 = vrot.lane.b32.xlu0 %v1425_v33, %s2245_s9  ;;  %v1762_v56 = vpop.f32.mrb[5].mxu1 }
 0x2c7   : > { %v1428_v59 = vpop.f32.mrb[6].mxu1 }
 0x2c8   : > { %v1763_v26 = vpop.f32.mrb[7].mxu1 }
 0x2cd   : > { %v1433_v51 = vpop.permute.xlu0 %1432 }
 0x2ce   : > { %v1444_v47 = vsel %vm1443_vm3, %v843_v35, %v1433_v51 }
 0x334   : > { %v1437_v60 = vpop.permute.xlu1 %1436 }
 0x335   : > { %v1445_v53 = vsel %vm737_vm1, %v1444_v47, %v1437_v60 }
 0x338   : > { %v1441_v40 = vpop.permute.xlu0 %1440 }
 0x339   : > { %v1447_v55 = vsel %vm1446_vm4, %v1445_v53, %v1441_v40 }
 0x33a   : > { %1773 = vmatmul.mubr.msk.f32.vlgmr.msra.gmra.mrb[8].mxu0 %vm1459_vm5, %v1447_v55 }
 0x40d   : > { %v1529_v24 = vpop.f32.mrb[8].mxu0 }
 0x40e   : > { %v1530_v62 = vadd.f32 %v1653_v6, %v1529_v24  ;;  %v1774_v4 = vpop.f32.mrb[9].mxu0 }
 0x410   : > { %1533 = vst.msk [vmem:[%s225_s21] sm:$0xff] %vm1459_vm5, %v1530_v62 }
 0x411   : > { %2074 = shalt.err (!%p2071_p5)
}
 0x412   : > { %s2075_s8 = scalar_lea.hbm %s2815_s29, 128  ;;  %s2079_s11 = scalar_lea.hbm %s2867_s4, 256 }
 0x413   : > { %p2076_p6 = scmp.ne.s32.totalorder %s2815_s29, %s2075_s8  ;;  %p2080_p10 = scmp.lt.u32.totalorder %s2815_s29, %s2867_s4 }
 0x414   : > { %p2081_p11 = scmp.lt.u32.totalorder %s2079_s11, %s2075_s8  ;;  %p2083_p13 = scmp.lt.u32.totalorder %s2075_s8, %s2815_s29 }
 0x415   : > { %p2077_p7 = pnand %p2076_p6, %p2312_p4 }
 0x416   : > { %p2082_p12 = por %p2081_p11, %p2080_p10 }
 0x417   : > { %p2078_p9 = pneg %p2077_p7 }
 0x418   : > { %p2084_p0 = por %p2083_p13, %p2082_p12 }
 0x41a   : > { %p2085_p1 = pnand %p2084_p0, %p2078_p9 }
 0x41c   : > { %2088 = shalt.err (!%p2085_p1)
}
 0x41d   : > { %1798 = dma.vmem_to_hbm [thread:$0]  (%p2312_p4), %s2817_s22, 128, %s2815_s29, %s1535_s30  }
 0x41e PF: > { %p1804_p2 = scmp.ge.s32.totalorder %s2139_s20, 2  ;;  %s1561_s14 = sand.u32 1, %s2119_s15  }
 0x41f   : > { %s1562_s21 = scalar_lea.sflag [#allocation3], %s1561_s14 }
 0x420   : > { %p1801_p3 = pnand %p1804_p2, %p2319_p8 }
 0x422   : > { %2114 = dma.done.wait (!%p1801_p3), %s1562_s21, 128  }
 0x423   : > { %2116 = vsyncadd (!%p1801_p3), %s1562_s21, 4294967168  ;;  %s17_s20 = sadd.s32 1, %s2139_s20   ;;  %s2870_s15 = smov %s2123_s16 }
 0x424   : > { %p14_p5 = scmp.ge.s32.totalorder %s17_s20, 4   ;;  %s2871_s16 = smov %s2127_s17 }
 0x425   : > { %s2872_s17 = smov %s2325_s28  ;;  %s2873_s18 = smov %s2135_s19 }
 0x426   : > { %s2874_s19 = smov %s2876_s23  ;;  %16 = sbr.rel (!%p14_p5) target bundleno = 4 (0x4), region = 74 }
 0x42d   :  { %1567 = vsyncpa [#allocation3], 1 }
 0x42e   :  { %1569 = vsyncpa [#allocation3 + $0x1], 1 }

</bundles_post_ra>
